<compile_context>
chip_gen: v6e
topology: v6e:2x2x1
jax: 0.10.0
libtpu: 0.0.40
codegen_flags: <defaults>
</compile_context>

<pallas_src>
import functools

import jax
import jax.numpy as jnp
import numpy as np
from jax import lax
from jax.experimental import pallas as pl
from jax.experimental.pallas import tpu as pltpu

EPS = 1e-5
LANE = 128


def _round_up(x, m):
    return ((x + m - 1) // m) * m


def _fold_bn(gamma, beta, mean, var):
    scale = gamma / jnp.sqrt(var + EPS)
    bias = beta - mean * scale
    return scale, bias


def _sigmoid(x):
    # sigmoid(x) = 0.5 * (1 + tanh(x/2)): one EUP push instead of exp + divide.
    return 0.5 * (jnp.tanh(0.5 * x) + 1.0)


def _swish(x):
    return x * _sigmoid(x)


# ---------------------------------------------------------------------------
# Fused MBConv kernel (one batch image per grid step, everything in VMEM)
# ---------------------------------------------------------------------------
def _fused_mbconv_kernel(x_ref, pw_w_ref, s1_ref, b1_ref,
                         dw_w_ref, s2_ref, b2_ref,
                         se_w1_ref, se_b1_ref, se_w2t_ref, se_b2c_ref,
                         pwl_w_ref, s3_ref, b3_ref,
                         o_ref,
                         *, H, W, Cin_p, Cmid_p, Cout_p, K, has_residual):
    pad = (K - 1) // 2
    bf16 = jnp.bfloat16
    f32 = jnp.float32

    # ---- 1x1 expand conv + BN1 + swish (MXU: bf16 operands, f32 accum) ----
    x2d = x_ref[...].reshape(H * W, Cin_p)                     # f32
    y = jnp.dot(x2d.astype(bf16), pw_w_ref[...],               # pw_w is bf16
                preferred_element_type=f32)                    # (H*W, Cmid_p)
    y = _swish(y * s1_ref[...] + b1_ref[...])
    y3 = y.reshape(H, W, Cmid_p)

    # ---- depthwise KxK (stride 1, SAME), all in registers ------------------
    # No halo scratch: width (sublane) shifts are static slices of a
    # zero-padded value, hoisted out of the kh loop; height shifts are
    # leading-dim slices.  Accumulator is seeded from the first tap.
    wv = dw_w_ref[...]                                         # (K, K, Cmid_p)
    zcol = jnp.zeros((H, pad, Cmid_p), f32)
    zrow = jnp.zeros((pad, W, Cmid_p), f32)
    ypw = jnp.concatenate([zcol, y3, zcol], axis=1)            # (H, W+2p, C)

    acc = None
    for kw in range(K):
        colw = ypw[:, kw:kw + W, :]                            # (H, W, C)
        colp = jnp.concatenate([zrow, colw, zrow], axis=0)     # (H+2p, W, C)
        for kh in range(K):
            tap = colp[kh:kh + H] * wv[kh, kw]
            acc = tap if acc is None else acc + tap
    y2 = _swish(acc.reshape(H * W, Cmid_p) * s2_ref[...] + b2_ref[...])

    # ---- squeeze-excite -----------------------------------------------------
    pooled = jnp.mean(y2, axis=0, keepdims=True)               # (1, Cmid_p)
    # conv_reduce: one tiny MXU dot (M=1); conv_expand: VPU multiply + XLU
    # lane-reduce against W2^T so the gate comes out as a (Cmid_p, 1) column.
    hidden = jnp.dot(pooled, se_w1_ref[...],
                     preferred_element_type=f32) + se_b1_ref[...]   # (1, Cr_p)
    hidden = _swish(hidden)
    gate = _sigmoid(jnp.sum(se_w2t_ref[...] * hidden, axis=-1, keepdims=True)
                    + se_b2c_ref[...])                         # (Cmid_p, 1)

    # ---- SE gate folded into projection weight, 1x1 project + BN3 (+res) ---
    gated_w = (pwl_w_ref[...] * gate).astype(bf16)             # (Cmid_p, Cout_p)
    z = jnp.dot(y2.astype(bf16), gated_w, preferred_element_type=f32)
    z = z * s3_ref[...] + b3_ref[...]
    if has_residual:
        z = z + x2d                                            # Cin_p == Cout_p
    o_ref[...] = z.reshape(o_ref.shape)


def inverted_residual(x_nhwc, p, has_residual):
    N, H, W, Cin = x_nhwc.shape
    Cmid = p["pw_w"].shape[1]
    Cout = p["pwl_w"].shape[1]
    K = p["dw_w"].shape[0]
    Cr = p["se_w1"].shape[1]

    # Lane-pad every channel dim to a multiple of 128.
    Cin_p = _round_up(Cin, LANE)
    Cmid_p = _round_up(Cmid, LANE)
    Cout_p = _round_up(Cout, LANE)
    Cr_p = _round_up(Cr, LANE)

    s1, b1 = _fold_bn(*p["bn1"])
    s2, b2 = _fold_bn(*p["bn2"])
    s3, b3 = _fold_bn(*p["bn3"])

    def pad2(a, r, c):
        return jnp.pad(a, ((0, r - a.shape[0]), (0, c - a.shape[1])))

    def pad_row(v, c):
        v = v.reshape(1, -1)
        return jnp.pad(v, ((0, 0), (0, c - v.shape[1])))

    x_p = jnp.pad(x_nhwc, ((0, 0), (0, 0), (0, 0), (0, Cin_p - Cin)))
    pw_w = pad2(p["pw_w"], Cin_p, Cmid_p).astype(jnp.bfloat16)     # pre-cast
    pwl_w = pad2(p["pwl_w"], Cmid_p, Cout_p).astype(jnp.bfloat16)  # pre-cast
    dw_w = jnp.pad(p["dw_w"], ((0, 0), (0, 0), (0, Cmid_p - Cmid)))
    se_w1 = pad2(p["se_w1"], Cmid_p, Cr_p)
    se_w2t = jnp.transpose(pad2(p["se_w2"], Cr_p, Cmid_p))         # (Cmid_p, Cr_p)
    se_b1 = pad_row(p["se_b1"], Cr_p)
    se_b2c = pad_row(p["se_b2"], Cmid_p).reshape(Cmid_p, 1)
    s1p, b1p = pad_row(s1, Cmid_p), pad_row(b1, Cmid_p)
    s2p, b2p = pad_row(s2, Cmid_p), pad_row(b2, Cmid_p)
    s3p, b3p = pad_row(s3, Cout_p), pad_row(b3, Cout_p)

    kernel = functools.partial(_fused_mbconv_kernel, H=H, W=W, Cin_p=Cin_p,
                               Cmid_p=Cmid_p, Cout_p=Cout_p, K=K,
                               has_residual=has_residual)

    cost = pl.CostEstimate(
        flops=int(N * (2 * H * W * Cin_p * Cmid_p            # 1x1 expand
                       + 2 * K * K * H * W * Cmid_p          # depthwise
                       + 2 * Cmid_p * Cr_p + 2 * Cr_p * Cmid_p  # SE
                       + 2 * H * W * Cmid_p * Cout_p)),      # 1x1 project
        transcendentals=int(N * (2 * H * W * Cmid_p + Cr_p + Cmid_p)),
        bytes_accessed=int(N * (4 * H * W * (Cin_p + Cout_p))
                           + 2 * (Cin_p * Cmid_p + Cmid_p * Cout_p)
                           + 4 * (K * K * Cmid_p + 2 * Cmid_p * Cr_p
                                  + 6 * Cmid_p + 2 * Cout_p + Cr_p)),
    )

    out = pl.pallas_call(
        kernel,
        out_shape=jax.ShapeDtypeStruct((N, H, W, Cout_p), jnp.float32),
        grid=(N,),
        in_specs=[
            pl.BlockSpec((1, H, W, Cin_p), lambda n: (n, 0, 0, 0)),   # x
            pl.BlockSpec((Cin_p, Cmid_p), lambda n: (0, 0)),          # pw_w (bf16)
            pl.BlockSpec((1, Cmid_p), lambda n: (0, 0)),              # s1
            pl.BlockSpec((1, Cmid_p), lambda n: (0, 0)),              # b1
            pl.BlockSpec((K, K, Cmid_p), lambda n: (0, 0, 0)),        # dw_w
            pl.BlockSpec((1, Cmid_p), lambda n: (0, 0)),              # s2
            pl.BlockSpec((1, Cmid_p), lambda n: (0, 0)),              # b2
            pl.BlockSpec((Cmid_p, Cr_p), lambda n: (0, 0)),           # se_w1
            pl.BlockSpec((1, Cr_p), lambda n: (0, 0)),                # se_b1
            pl.BlockSpec((Cmid_p, Cr_p), lambda n: (0, 0)),           # se_w2^T
            pl.BlockSpec((Cmid_p, 1), lambda n: (0, 0)),              # se_b2 col
            pl.BlockSpec((Cmid_p, Cout_p), lambda n: (0, 0)),         # pwl_w (bf16)
            pl.BlockSpec((1, Cout_p), lambda n: (0, 0)),              # s3
            pl.BlockSpec((1, Cout_p), lambda n: (0, 0)),              # b3
        ],
        out_specs=pl.BlockSpec((1, H, W, Cout_p), lambda n: (n, 0, 0, 0)),
        compiler_params=pltpu.CompilerParams(
            dimension_semantics=("parallel",),
            # Plenty of headroom at these shapes on v5e/v6e/v7x; re-derive
            # when adding row tiling at real EfficientNet sizes.
            vmem_limit_bytes=32 * 1024 * 1024),
        cost_estimate=cost,
    )(x_p, pw_w, s1p, b1p, dw_w, s2p, b2p,
      se_w1, se_b1, se_w2t, se_b2c, pwl_w, s3p, b3p)

    return out[..., :Cout]


# ---------------------------------------------------------------------------
# Pure-JAX reference (same bf16-MXU factorization, f32 elementwise math)
# ---------------------------------------------------------------------------
def ref_forward(x, p, has_residual):
    s1, b1 = _fold_bn(*p["bn1"])
    s2, b2 = _fold_bn(*p["bn2"])
    s3, b3 = _fold_bn(*p["bn3"])
    bf16 = jnp.bfloat16
    Cmid = p["pw_w"].shape[1]

    y = jnp.einsum("nhwc,cd->nhwd", x.astype(bf16), p["pw_w"].astype(bf16),
                   preferred_element_type=jnp.float32)
    y = y * s1 + b1
    y = y * jax.nn.sigmoid(y)

    dw_hwio = p["dw_w"][:, :, None, :]                      # (K, K, 1, Cmid)
    y = lax.conv_general_dilated(
        y, dw_hwio, window_strides=(1, 1), padding="SAME",
        feature_group_count=Cmid,
        dimension_numbers=("NHWC", "HWIO", "NHWC"),
        precision=lax.Precision.HIGHEST)
    y = y * s2 + b2
    y = y * jax.nn.sigmoid(y)

    pooled = jnp.mean(y, axis=(1, 2))
    se = pooled @ p["se_w1"] + p["se_b1"]
    se = se * jax.nn.sigmoid(se)
    gate = jax.nn.sigmoid(se @ p["se_w2"] + p["se_b2"])     # (N, Cmid)

    yg = y * gate[:, None, None, :]
    z = jnp.einsum("nhwc,cd->nhwd", yg.astype(bf16), p["pwl_w"].astype(bf16),
                   preferred_element_type=jnp.float32)
    z = z * s3 + b3
    if has_residual:
        z = z + x
    return z


if __name__ == "__main__":
    key = jax.random.PRNGKey(0)
    N, Cin, H, W = 2, 4, 16, 16
    Cout = 4
    K = 3
    expansion = 6
    Cmid = Cin * expansion                  # 24
    Cr = max(1, int(Cin * 0.25))            # 1
    has_residual = (Cin == Cout)            # stride == 1

    keys = iter(jax.random.split(key, 32))

    def rnd(shape, scale=0.1):
        return jax.random.normal(next(keys), shape, jnp.float32) * scale

    def bn_params(c):
        gamma = 1.0 + rnd((c,))
        beta = rnd((c,))
        mean = rnd((c,))
        var = jnp.abs(rnd((c,))) + 0.5
        return (gamma, beta, mean, var)

    x_nchw = jax.random.normal(next(keys), (N, Cin, H, W), jnp.float32)

    params = dict(
        pw_w=rnd((Cin, Cmid)),              # torch conv_pw weight (Cmid,Cin,1,1)^T
        bn1=bn_params(Cmid),
        dw_w=rnd((K, K, Cmid)),             # torch conv_dw weight (Cmid,1,K,K) -> HWC
        bn2=bn_params(Cmid),
        se_w1=rnd((Cmid, Cr)),              # conv_reduce
        se_b1=rnd((Cr,)),
        se_w2=rnd((Cr, Cmid)),              # conv_expand
        se_b2=rnd((Cmid,)),
        pwl_w=rnd((Cmid, Cout)),            # conv_pwl
        bn3=bn_params(Cout),
    )

    x_nhwc = jnp.transpose(x_nchw, (0, 2, 3, 1))

    out = inverted_residual(x_nhwc, params, has_residual)
    out = jax.block_until_ready(out)

    ref = jax.block_until_ready(ref_forward(x_nhwc, params, has_residual))
    np.testing.assert_allclose(np.asarray(out), np.asarray(ref),
                               rtol=2e-3, atol=2e-3)

    # back to NCHW to mirror the PyTorch output convention
    out_nchw = jnp.transpose(out, (0, 3, 1, 2))
    assert out_nchw.shape == (N, Cout, H, W)

    print("KERNEL_OK")
</pallas_src>

<mosaic_0001>
module attributes {stable_mosaic.version = 11 : i64} {
  func.func @_fused_mbconv_kernel(%arg0: i32, %arg1: memref<1x16x16x128xf32, #tpu.memory_space<vmem>>, %arg2: memref<128x128xbf16, #tpu.memory_space<vmem>>, %arg3: memref<1x128xf32, #tpu.memory_space<vmem>>, %arg4: memref<1x128xf32, #tpu.memory_space<vmem>>, %arg5: memref<3x3x128xf32, #tpu.memory_space<vmem>>, %arg6: memref<1x128xf32, #tpu.memory_space<vmem>>, %arg7: memref<1x128xf32, #tpu.memory_space<vmem>>, %arg8: memref<128x128xf32, #tpu.memory_space<vmem>>, %arg9: memref<1x128xf32, #tpu.memory_space<vmem>>, %arg10: memref<128x128xf32, #tpu.memory_space<vmem>>, %arg11: memref<128x1xf32, #tpu.memory_space<vmem>>, %arg12: memref<128x128xbf16, #tpu.memory_space<vmem>>, %arg13: memref<1x128xf32, #tpu.memory_space<vmem>>, %arg14: memref<1x128xf32, #tpu.memory_space<vmem>>, %arg15: memref<1x16x16x128xf32, #tpu.memory_space<vmem>>) attributes {dimension_semantics = [#tpu.dimension_semantics<parallel>], iteration_bounds = array<i64: 2>, scalar_prefetch = 0 : i64, scratch_operands = 0 : i64, tpu.core_type = #tpu.core_type<tc>, window_params = [{transform_indices = @transform_0, window_bounds = array<i64: 1, 16, 16, 128>}, {pipeline_mode = #tpu.pipeline_mode<synchronous>, transform_indices = @transform_1, window_bounds = array<i64: 128, 128>}, {pipeline_mode = #tpu.pipeline_mode<synchronous>, transform_indices = @transform_2, window_bounds = array<i64: 1, 128>}, {pipeline_mode = #tpu.pipeline_mode<synchronous>, transform_indices = @transform_3, window_bounds = array<i64: 1, 128>}, {pipeline_mode = #tpu.pipeline_mode<synchronous>, transform_indices = @transform_4, window_bounds = array<i64: 3, 3, 128>}, {pipeline_mode = #tpu.pipeline_mode<synchronous>, transform_indices = @transform_5, window_bounds = array<i64: 1, 128>}, {pipeline_mode = #tpu.pipeline_mode<synchronous>, transform_indices = @transform_6, window_bounds = array<i64: 1, 128>}, {pipeline_mode = #tpu.pipeline_mode<synchronous>, transform_indices = @transform_7, window_bounds = array<i64: 128, 128>}, {pipeline_mode = #tpu.pipeline_mode<synchronous>, transform_indices = @transform_8, window_bounds = array<i64: 1, 128>}, {pipeline_mode = #tpu.pipeline_mode<synchronous>, transform_indices = @transform_9, window_bounds = array<i64: 128, 128>}, {pipeline_mode = #tpu.pipeline_mode<synchronous>, transform_indices = @transform_10, window_bounds = array<i64: 128, 1>}, {pipeline_mode = #tpu.pipeline_mode<synchronous>, transform_indices = @transform_11, window_bounds = array<i64: 128, 128>}, {pipeline_mode = #tpu.pipeline_mode<synchronous>, transform_indices = @transform_12, window_bounds = array<i64: 1, 128>}, {pipeline_mode = #tpu.pipeline_mode<synchronous>, transform_indices = @transform_13, window_bounds = array<i64: 1, 128>}, {transform_indices = @transform_14, window_bounds = array<i64: 1, 16, 16, 128>}]} {
    %c0 = arith.constant 0 : index
    %c0_0 = arith.constant 0 : index
    %c0_1 = arith.constant 0 : index
    %c0_2 = arith.constant 0 : index
    %0 = vector.load %arg1[%c0, %c0_0, %c0_1, %c0_2] : memref<1x16x16x128xf32, #tpu.memory_space<vmem>>, vector<1x16x16x128xf32>
    %1 = vector.shape_cast %0 : vector<1x16x16x128xf32> to vector<256x128xf32>
    %2 = arith.truncf %1 : vector<256x128xf32> to vector<256x128xbf16>
    %c0_3 = arith.constant 0 : index
    %c0_4 = arith.constant 0 : index
    %3 = vector.load %arg2[%c0_3, %c0_4] : memref<128x128xbf16, #tpu.memory_space<vmem>>, vector<128x128xbf16>
    %cst = arith.constant dense<0.000000e+00> : vector<256x128xf32>
    %4 = tpu.matmul %2, %3, %cst {dimension_numbers = #tpu.dot_dimension_numbers<[1], [0], [0], [1], [0, 0, 1, 1], [], []>} : vector<256x128xbf16>, vector<128x128xbf16>, vector<256x128xf32> -> vector<256x128xf32>
    %c0_5 = arith.constant 0 : index
    %c0_6 = arith.constant 0 : index
    %5 = vector.load %arg3[%c0_5, %c0_6] : memref<1x128xf32, #tpu.memory_space<vmem>>, vector<1x128xf32>
    %6 = vector.broadcast %5 : vector<1x128xf32> to vector<256x128xf32>
    %7 = arith.mulf %4, %6 : vector<256x128xf32>
    %c0_7 = arith.constant 0 : index
    %c0_8 = arith.constant 0 : index
    %8 = vector.load %arg4[%c0_7, %c0_8] : memref<1x128xf32, #tpu.memory_space<vmem>>, vector<1x128xf32>
    %9 = vector.broadcast %8 : vector<1x128xf32> to vector<256x128xf32>
    %10 = arith.addf %7, %9 : vector<256x128xf32>
    %cst_9 = arith.constant 5.000000e-01 : f32
    %11 = vector.broadcast %cst_9 : f32 to vector<256x128xf32>
    %12 = arith.mulf %11, %10 : vector<256x128xf32>
    %13 = math.tanh %12 : vector<256x128xf32>
    %cst_10 = arith.constant 1.000000e+00 : f32
    %14 = vector.broadcast %cst_10 : f32 to vector<256x128xf32>
    %15 = arith.addf %13, %14 : vector<256x128xf32>
    %cst_11 = arith.constant 5.000000e-01 : f32
    %16 = vector.broadcast %cst_11 : f32 to vector<256x128xf32>
    %17 = arith.mulf %16, %15 : vector<256x128xf32>
    %18 = arith.mulf %10, %17 : vector<256x128xf32>
    %19 = vector.shape_cast %18 : vector<256x128xf32> to vector<16x16x128xf32>
    %c0_12 = arith.constant 0 : index
    %c0_13 = arith.constant 0 : index
    %c0_14 = arith.constant 0 : index
    %20 = vector.load %arg5[%c0_12, %c0_13, %c0_14] : memref<3x3x128xf32, #tpu.memory_space<vmem>>, vector<3x3x128xf32>
    %cst_15 = arith.constant 0.000000e+00 : f32
    %21 = vector.broadcast %cst_15 : f32 to vector<16x1x128xf32>
    %cst_16 = arith.constant 0.000000e+00 : f32
    %22 = vector.broadcast %cst_16 : f32 to vector<1x16x128xf32>
    %23 = tpu.concatenate %21, %19, %21 in 1 : vector<16x1x128xf32>, vector<16x16x128xf32>, vector<16x1x128xf32> -> vector<16x18x128xf32>
    %24 = vector.extract_strided_slice %23 {offsets = [0, 0, 0], sizes = [16, 16, 128], strides = [1, 1, 1]} : vector<16x18x128xf32> to vector<16x16x128xf32>
    %25 = tpu.concatenate %22, %24, %22 in 0 : vector<1x16x128xf32>, vector<16x16x128xf32>, vector<1x16x128xf32> -> vector<18x16x128xf32>
    %26 = vector.extract_strided_slice %25 {offsets = [0, 0, 0], sizes = [16, 16, 128], strides = [1, 1, 1]} : vector<18x16x128xf32> to vector<16x16x128xf32>
    %27 = vector.extract_strided_slice %20 {offsets = [0, 0, 0], sizes = [1, 1, 128], strides = [1, 1, 1]} : vector<3x3x128xf32> to vector<1x1x128xf32>
    %28 = vector.shape_cast %27 : vector<1x1x128xf32> to vector<128xf32>
    %29 = vector.shape_cast %28 : vector<128xf32> to vector<1x1x128xf32>
    %30 = vector.broadcast %29 : vector<1x1x128xf32> to vector<16x16x128xf32>
    %31 = arith.mulf %26, %30 : vector<16x16x128xf32>
    %32 = vector.extract_strided_slice %25 {offsets = [1, 0, 0], sizes = [16, 16, 128], strides = [1, 1, 1]} : vector<18x16x128xf32> to vector<16x16x128xf32>
    %33 = vector.extract_strided_slice %20 {offsets = [1, 0, 0], sizes = [1, 1, 128], strides = [1, 1, 1]} : vector<3x3x128xf32> to vector<1x1x128xf32>
    %34 = vector.shape_cast %33 : vector<1x1x128xf32> to vector<128xf32>
    %35 = vector.shape_cast %34 : vector<128xf32> to vector<1x1x128xf32>
    %36 = vector.broadcast %35 : vector<1x1x128xf32> to vector<16x16x128xf32>
    %37 = arith.mulf %32, %36 : vector<16x16x128xf32>
    %38 = arith.addf %31, %37 : vector<16x16x128xf32>
    %39 = vector.extract_strided_slice %25 {offsets = [2, 0, 0], sizes = [16, 16, 128], strides = [1, 1, 1]} : vector<18x16x128xf32> to vector<16x16x128xf32>
    %40 = vector.extract_strided_slice %20 {offsets = [2, 0, 0], sizes = [1, 1, 128], strides = [1, 1, 1]} : vector<3x3x128xf32> to vector<1x1x128xf32>
    %41 = vector.shape_cast %40 : vector<1x1x128xf32> to vector<128xf32>
    %42 = vector.shape_cast %41 : vector<128xf32> to vector<1x1x128xf32>
    %43 = vector.broadcast %42 : vector<1x1x128xf32> to vector<16x16x128xf32>
    %44 = arith.mulf %39, %43 : vector<16x16x128xf32>
    %45 = arith.addf %38, %44 : vector<16x16x128xf32>
    %46 = vector.extract_strided_slice %23 {offsets = [0, 1, 0], sizes = [16, 16, 128], strides = [1, 1, 1]} : vector<16x18x128xf32> to vector<16x16x128xf32>
    %47 = tpu.concatenate %22, %46, %22 in 0 : vector<1x16x128xf32>, vector<16x16x128xf32>, vector<1x16x128xf32> -> vector<18x16x128xf32>
    %48 = vector.extract_strided_slice %47 {offsets = [0, 0, 0], sizes = [16, 16, 128], strides = [1, 1, 1]} : vector<18x16x128xf32> to vector<16x16x128xf32>
    %49 = vector.extract_strided_slice %20 {offsets = [0, 1, 0], sizes = [1, 1, 128], strides = [1, 1, 1]} : vector<3x3x128xf32> to vector<1x1x128xf32>
    %50 = vector.shape_cast %49 : vector<1x1x128xf32> to vector<128xf32>
    %51 = vector.shape_cast %50 : vector<128xf32> to vector<1x1x128xf32>
    %52 = vector.broadcast %51 : vector<1x1x128xf32> to vector<16x16x128xf32>
    %53 = arith.mulf %48, %52 : vector<16x16x128xf32>
    %54 = arith.addf %45, %53 : vector<16x16x128xf32>
    %55 = vector.extract_strided_slice %47 {offsets = [1, 0, 0], sizes = [16, 16, 128], strides = [1, 1, 1]} : vector<18x16x128xf32> to vector<16x16x128xf32>
    %56 = vector.extract_strided_slice %20 {offsets = [1, 1, 0], sizes = [1, 1, 128], strides = [1, 1, 1]} : vector<3x3x128xf32> to vector<1x1x128xf32>
    %57 = vector.shape_cast %56 : vector<1x1x128xf32> to vector<128xf32>
    %58 = vector.shape_cast %57 : vector<128xf32> to vector<1x1x128xf32>
    %59 = vector.broadcast %58 : vector<1x1x128xf32> to vector<16x16x128xf32>
    %60 = arith.mulf %55, %59 : vector<16x16x128xf32>
    %61 = arith.addf %54, %60 : vector<16x16x128xf32>
    %62 = vector.extract_strided_slice %47 {offsets = [2, 0, 0], sizes = [16, 16, 128], strides = [1, 1, 1]} : vector<18x16x128xf32> to vector<16x16x128xf32>
    %63 = vector.extract_strided_slice %20 {offsets = [2, 1, 0], sizes = [1, 1, 128], strides = [1, 1, 1]} : vector<3x3x128xf32> to vector<1x1x128xf32>
    %64 = vector.shape_cast %63 : vector<1x1x128xf32> to vector<128xf32>
    %65 = vector.shape_cast %64 : vector<128xf32> to vector<1x1x128xf32>
    %66 = vector.broadcast %65 : vector<1x1x128xf32> to vector<16x16x128xf32>
    %67 = arith.mulf %62, %66 : vector<16x16x128xf32>
    %68 = arith.addf %61, %67 : vector<16x16x128xf32>
    %69 = vector.extract_strided_slice %23 {offsets = [0, 2, 0], sizes = [16, 16, 128], strides = [1, 1, 1]} : vector<16x18x128xf32> to vector<16x16x128xf32>
    %70 = tpu.concatenate %22, %69, %22 in 0 : vector<1x16x128xf32>, vector<16x16x128xf32>, vector<1x16x128xf32> -> vector<18x16x128xf32>
    %71 = vector.extract_strided_slice %70 {offsets = [0, 0, 0], sizes = [16, 16, 128], strides = [1, 1, 1]} : vector<18x16x128xf32> to vector<16x16x128xf32>
    %72 = vector.extract_strided_slice %20 {offsets = [0, 2, 0], sizes = [1, 1, 128], strides = [1, 1, 1]} : vector<3x3x128xf32> to vector<1x1x128xf32>
    %73 = vector.shape_cast %72 : vector<1x1x128xf32> to vector<128xf32>
    %74 = vector.shape_cast %73 : vector<128xf32> to vector<1x1x128xf32>
    %75 = vector.broadcast %74 : vector<1x1x128xf32> to vector<16x16x128xf32>
    %76 = arith.mulf %71, %75 : vector<16x16x128xf32>
    %77 = arith.addf %68, %76 : vector<16x16x128xf32>
    %78 = vector.extract_strided_slice %70 {offsets = [1, 0, 0], sizes = [16, 16, 128], strides = [1, 1, 1]} : vector<18x16x128xf32> to vector<16x16x128xf32>
    %79 = vector.extract_strided_slice %20 {offsets = [1, 2, 0], sizes = [1, 1, 128], strides = [1, 1, 1]} : vector<3x3x128xf32> to vector<1x1x128xf32>
    %80 = vector.shape_cast %79 : vector<1x1x128xf32> to vector<128xf32>
    %81 = vector.shape_cast %80 : vector<128xf32> to vector<1x1x128xf32>
    %82 = vector.broadcast %81 : vector<1x1x128xf32> to vector<16x16x128xf32>
    %83 = arith.mulf %78, %82 : vector<16x16x128xf32>
    %84 = arith.addf %77, %83 : vector<16x16x128xf32>
    %85 = vector.extract_strided_slice %70 {offsets = [2, 0, 0], sizes = [16, 16, 128], strides = [1, 1, 1]} : vector<18x16x128xf32> to vector<16x16x128xf32>
    %86 = vector.extract_strided_slice %20 {offsets = [2, 2, 0], sizes = [1, 1, 128], strides = [1, 1, 1]} : vector<3x3x128xf32> to vector<1x1x128xf32>
    %87 = vector.shape_cast %86 : vector<1x1x128xf32> to vector<128xf32>
    %88 = vector.shape_cast %87 : vector<128xf32> to vector<1x1x128xf32>
    %89 = vector.broadcast %88 : vector<1x1x128xf32> to vector<16x16x128xf32>
    %90 = arith.mulf %85, %89 : vector<16x16x128xf32>
    %91 = arith.addf %84, %90 : vector<16x16x128xf32>
    %92 = vector.shape_cast %91 : vector<16x16x128xf32> to vector<256x128xf32>
    %c0_17 = arith.constant 0 : index
    %c0_18 = arith.constant 0 : index
    %93 = vector.load %arg6[%c0_17, %c0_18] : memref<1x128xf32, #tpu.memory_space<vmem>>, vector<1x128xf32>
    %94 = vector.broadcast %93 : vector<1x128xf32> to vector<256x128xf32>
    %95 = arith.mulf %92, %94 : vector<256x128xf32>
    %c0_19 = arith.constant 0 : index
    %c0_20 = arith.constant 0 : index
    %96 = vector.load %arg7[%c0_19, %c0_20] : memref<1x128xf32, #tpu.memory_space<vmem>>, vector<1x128xf32>
    %97 = vector.broadcast %96 : vector<1x128xf32> to vector<256x128xf32>
    %98 = arith.addf %95, %97 : vector<256x128xf32>
    %cst_21 = arith.constant 5.000000e-01 : f32
    %99 = vector.broadcast %cst_21 : f32 to vector<256x128xf32>
    %100 = arith.mulf %99, %98 : vector<256x128xf32>
    %101 = math.tanh %100 : vector<256x128xf32>
    %cst_22 = arith.constant 1.000000e+00 : f32
    %102 = vector.broadcast %cst_22 : f32 to vector<256x128xf32>
    %103 = arith.addf %101, %102 : vector<256x128xf32>
    %cst_23 = arith.constant 5.000000e-01 : f32
    %104 = vector.broadcast %cst_23 : f32 to vector<256x128xf32>
    %105 = arith.mulf %104, %103 : vector<256x128xf32>
    %106 = arith.mulf %98, %105 : vector<256x128xf32>
    %cst_24 = arith.constant dense<0.000000e+00> : vector<128xf32>
    %107 = vector.multi_reduction <add>, %106, %cst_24 [0] : vector<256x128xf32> to vector<128xf32>
    %108 = vector.shape_cast %107 : vector<128xf32> to vector<1x128xf32>
    %cst_25 = arith.constant 2.560000e+02 : f32
    %109 = vector.broadcast %cst_25 : f32 to vector<1x128xf32>
    %110 = arith.divf %108, %109 : vector<1x128xf32>
    %c0_26 = arith.constant 0 : index
    %c0_27 = arith.constant 0 : index
    %111 = vector.load %arg8[%c0_26, %c0_27] : memref<128x128xf32, #tpu.memory_space<vmem>>, vector<128x128xf32>
    %cst_28 = arith.constant dense<0.000000e+00> : vector<1x128xf32>
    %112 = tpu.matmul %110, %111, %cst_28 {dimension_numbers = #tpu.dot_dimension_numbers<[1], [0], [0], [1], [0, 0, 1, 1], [], []>} : vector<1x128xf32>, vector<128x128xf32>, vector<1x128xf32> -> vector<1x128xf32>
    %c0_29 = arith.constant 0 : index
    %c0_30 = arith.constant 0 : index
    %113 = vector.load %arg9[%c0_29, %c0_30] : memref<1x128xf32, #tpu.memory_space<vmem>>, vector<1x128xf32>
    %114 = arith.addf %112, %113 : vector<1x128xf32>
    %cst_31 = arith.constant 5.000000e-01 : f32
    %115 = vector.broadcast %cst_31 : f32 to vector<1x128xf32>
    %116 = arith.mulf %115, %114 : vector<1x128xf32>
    %117 = math.tanh %116 : vector<1x128xf32>
    %cst_32 = arith.constant 1.000000e+00 : f32
    %118 = vector.broadcast %cst_32 : f32 to vector<1x128xf32>
    %119 = arith.addf %117, %118 : vector<1x128xf32>
    %cst_33 = arith.constant 5.000000e-01 : f32
    %120 = vector.broadcast %cst_33 : f32 to vector<1x128xf32>
    %121 = arith.mulf %120, %119 : vector<1x128xf32>
    %122 = arith.mulf %114, %121 : vector<1x128xf32>
    %c0_34 = arith.constant 0 : index
    %c0_35 = arith.constant 0 : index
    %123 = vector.load %arg10[%c0_34, %c0_35] : memref<128x128xf32, #tpu.memory_space<vmem>>, vector<128x128xf32>
    %124 = vector.broadcast %122 : vector<1x128xf32> to vector<128x128xf32>
    %125 = arith.mulf %123, %124 : vector<128x128xf32>
    %cst_36 = arith.constant dense<0.000000e+00> : vector<128xf32>
    %126 = vector.multi_reduction <add>, %125, %cst_36 [1] : vector<128x128xf32> to vector<128xf32>
    %127 = vector.shape_cast %126 : vector<128xf32> to vector<128x1xf32>
    %c0_37 = arith.constant 0 : index
    %c0_38 = arith.constant 0 : index
    %128 = vector.load %arg11[%c0_37, %c0_38] : memref<128x1xf32, #tpu.memory_space<vmem>>, vector<128x1xf32>
    %129 = arith.addf %127, %128 : vector<128x1xf32>
    %cst_39 = arith.constant 5.000000e-01 : f32
    %130 = vector.broadcast %cst_39 : f32 to vector<128x1xf32>
    %131 = arith.mulf %130, %129 : vector<128x1xf32>
    %132 = math.tanh %131 : vector<128x1xf32>
    %cst_40 = arith.constant 1.000000e+00 : f32
    %133 = vector.broadcast %cst_40 : f32 to vector<128x1xf32>
    %134 = arith.addf %132, %133 : vector<128x1xf32>
    %cst_41 = arith.constant 5.000000e-01 : f32
    %135 = vector.broadcast %cst_41 : f32 to vector<128x1xf32>
    %136 = arith.mulf %135, %134 : vector<128x1xf32>
    %c0_42 = arith.constant 0 : index
    %c0_43 = arith.constant 0 : index
    %137 = vector.load %arg12[%c0_42, %c0_43] : memref<128x128xbf16, #tpu.memory_space<vmem>>, vector<128x128xbf16>
    %138 = arith.extf %137 : vector<128x128xbf16> to vector<128x128xf32>
    %139 = vector.broadcast %136 : vector<128x1xf32> to vector<128x128xf32>
    %140 = arith.mulf %138, %139 : vector<128x128xf32>
    %141 = arith.truncf %140 : vector<128x128xf32> to vector<128x128xbf16>
    %142 = arith.truncf %106 : vector<256x128xf32> to vector<256x128xbf16>
    %cst_44 = arith.constant dense<0.000000e+00> : vector<256x128xf32>
    %143 = tpu.matmul %142, %141, %cst_44 {dimension_numbers = #tpu.dot_dimension_numbers<[1], [0], [0], [1], [0, 0, 1, 1], [], []>} : vector<256x128xbf16>, vector<128x128xbf16>, vector<256x128xf32> -> vector<256x128xf32>
    %c0_45 = arith.constant 0 : index
    %c0_46 = arith.constant 0 : index
    %144 = vector.load %arg13[%c0_45, %c0_46] : memref<1x128xf32, #tpu.memory_space<vmem>>, vector<1x128xf32>
    %145 = vector.broadcast %144 : vector<1x128xf32> to vector<256x128xf32>
    %146 = arith.mulf %143, %145 : vector<256x128xf32>
    %c0_47 = arith.constant 0 : index
    %c0_48 = arith.constant 0 : index
    %147 = vector.load %arg14[%c0_47, %c0_48] : memref<1x128xf32, #tpu.memory_space<vmem>>, vector<1x128xf32>
    %148 = vector.broadcast %147 : vector<1x128xf32> to vector<256x128xf32>
    %149 = arith.addf %146, %148 : vector<256x128xf32>
    %150 = arith.addf %149, %1 : vector<256x128xf32>
    %151 = vector.shape_cast %150 : vector<256x128xf32> to vector<1x16x16x128xf32>
    %c0_49 = arith.constant 0 : index
    %c0_50 = arith.constant 0 : index
    %c0_51 = arith.constant 0 : index
    %c0_52 = arith.constant 0 : index
    %152 = vector.load %arg15[%c0_49, %c0_50, %c0_51, %c0_52] : memref<1x16x16x128xf32, #tpu.memory_space<vmem>>, vector<1x16x16x128xf32>
    tpu.vector_store %arg15[%c0_49, %c0_50, %c0_51, %c0_52], %151 {strides = array<i32>} : memref<1x16x16x128xf32, #tpu.memory_space<vmem>>, vector<1x16x16x128xf32>,
    return
  }
  func.func @transform_0(%arg0: i32) -> (i32, i32, i32, i32) {
    %c0_i32 = arith.constant 0 : i32
    %c0_i32_0 = arith.constant 0 : i32
    %c0_i32_1 = arith.constant 0 : i32
    %c0_i32_2 = arith.constant 0 : i32
    return %arg0, %c0_i32, %c0_i32_0, %c0_i32_1 : i32, i32, i32, i32
  }
  func.func @transform_1(%arg0: i32) -> (i32, i32) {
    %c0_i32 = arith.constant 0 : i32
    %c0_i32_0 = arith.constant 0 : i32
    %c0_i32_1 = arith.constant 0 : i32
    return %c0_i32, %c0_i32_0 : i32, i32
  }
  func.func @transform_2(%arg0: i32) -> (i32, i32) {
    %c0_i32 = arith.constant 0 : i32
    %c0_i32_0 = arith.constant 0 : i32
    %c0_i32_1 = arith.constant 0 : i32
    return %c0_i32, %c0_i32_0 : i32, i32
  }
  func.func @transform_3(%arg0: i32) -> (i32, i32) {
    %c0_i32 = arith.constant 0 : i32
    %c0_i32_0 = arith.constant 0 : i32
    %c0_i32_1 = arith.constant 0 : i32
    return %c0_i32, %c0_i32_0 : i32, i32
  }
  func.func @transform_4(%arg0: i32) -> (i32, i32, i32) {
    %c0_i32 = arith.constant 0 : i32
    %c0_i32_0 = arith.constant 0 : i32
    %c0_i32_1 = arith.constant 0 : i32
    %c0_i32_2 = arith.constant 0 : i32
    return %c0_i32, %c0_i32_0, %c0_i32_1 : i32, i32, i32
  }
  func.func @transform_5(%arg0: i32) -> (i32, i32) {
    %c0_i32 = arith.constant 0 : i32
    %c0_i32_0 = arith.constant 0 : i32
    %c0_i32_1 = arith.constant 0 : i32
    return %c0_i32, %c0_i32_0 : i32, i32
  }
  func.func @transform_6(%arg0: i32) -> (i32, i32) {
    %c0_i32 = arith.constant 0 : i32
    %c0_i32_0 = arith.constant 0 : i32
    %c0_i32_1 = arith.constant 0 : i32
    return %c0_i32, %c0_i32_0 : i32, i32
  }
  func.func @transform_7(%arg0: i32) -> (i32, i32) {
    %c0_i32 = arith.constant 0 : i32
    %c0_i32_0 = arith.constant 0 : i32
    %c0_i32_1 = arith.constant 0 : i32
    return %c0_i32, %c0_i32_0 : i32, i32
  }
  func.func @transform_8(%arg0: i32) -> (i32, i32) {
    %c0_i32 = arith.constant 0 : i32
    %c0_i32_0 = arith.constant 0 : i32
    %c0_i32_1 = arith.constant 0 : i32
    return %c0_i32, %c0_i32_0 : i32, i32
  }
  func.func @transform_9(%arg0: i32) -> (i32, i32) {
    %c0_i32 = arith.constant 0 : i32
    %c0_i32_0 = arith.constant 0 : i32
    %c0_i32_1 = arith.constant 0 : i32
    return %c0_i32, %c0_i32_0 : i32, i32
  }
  func.func @transform_10(%arg0: i32) -> (i32, i32) {
    %c0_i32 = arith.constant 0 : i32
    %c0_i32_0 = arith.constant 0 : i32
    %c0_i32_1 = arith.constant 0 : i32
    return %c0_i32, %c0_i32_0 : i32, i32
  }
  func.func @transform_11(%arg0: i32) -> (i32, i32) {
    %c0_i32 = arith.constant 0 : i32
    %c0_i32_0 = arith.constant 0 : i32
    %c0_i32_1 = arith.constant 0 : i32
    return %c0_i32, %c0_i32_0 : i32, i32
  }
  func.func @transform_12(%arg0: i32) -> (i32, i32) {
    %c0_i32 = arith.constant 0 : i32
    %c0_i32_0 = arith.constant 0 : i32
    %c0_i32_1 = arith.constant 0 : i32
    return %c0_i32, %c0_i32_0 : i32, i32
  }
  func.func @transform_13(%arg0: i32) -> (i32, i32) {
    %c0_i32 = arith.constant 0 : i32
    %c0_i32_0 = arith.constant 0 : i32
    %c0_i32_1 = arith.constant 0 : i32
    return %c0_i32, %c0_i32_0 : i32, i32
  }
  func.func @transform_14(%arg0: i32) -> (i32, i32, i32, i32) {
    %c0_i32 = arith.constant 0 : i32
    %c0_i32_0 = arith.constant 0 : i32
    %c0_i32_1 = arith.constant 0 : i32
    %c0_i32_2 = arith.constant 0 : i32
    return %arg0, %c0_i32, %c0_i32_0, %c0_i32_1 : i32, i32, i32, i32
  }
}

</mosaic_0001>

<bundles_post_ra>
// kernel: tpu_custom_call.1
= control target key start
LH: loop header
LB: loop body
LE: loop exit
PB: predicated region body
PF: predicated region fallthrough
CT: control target
= control target key end

     0   :  { %s6423_s0 = inlined_call_operand.hbm [shape: f32[2,16,16,128], index: 0, kind: input, shape index: {}]   ;;  %s6424_s1 = inlined_call_operand.hbm [shape: bf16[128,128], index: 1, kind: input, shape index: {}]   ;;  %s6425_s2 = inlined_call_operand.vmem [shape: f32[1,128], index: 2, kind: input, shape index: {}]   ;;  %s6426_s3 = inlined_call_operand.hbm [shape: f32[1,128], index: 3, kind: input, shape index: {}]   ;;  %s6427_s4 = inlined_call_operand.vmem [shape: f32[3,3,128], index: 4, kind: input, shape index: {}]   ;;  %s6428_s5 = inlined_call_operand.hbm [shape: f32[1,128], index: 5, kind: input, shape index: {}]   ;;  %s6429_s6 = inlined_call_operand.hbm [shape: f32[1,128], index: 6, kind: input, shape index: {}]   ;;  %s6430_s7 = inlined_call_operand.vmem [shape: f32[128,128], index: 7, kind: input, shape index: {}]   ;;  %s6431_s8 = inlined_call_operand.vmem [shape: f32[1,128], index: 8, kind: input, shape index: {}]   ;;  %s6432_s9 = inlined_call_operand.hbm [shape: f32[128,128], index: 9, kind: input, shape index: {}]   ;;  %s6433_s10 = inlined_call_operand.vmem [shape: f32[128,1], index: 10, kind: input, shape index: {}]   ;;  %s6434_s11 = inlined_call_operand.hbm [shape: bf16[128,128], index: 11, kind: input, shape index: {}]   ;;  %s6435_s12 = inlined_call_operand.vmem [shape: f32[1,128], index: 12, kind: input, shape index: {}]   ;;  %s6436_s13 = inlined_call_operand.vmem [shape: f32[1,128], index: 13, kind: input, shape index: {}]   ;;  %s6437_s14 = inlined_call_operand.hbm [shape: f32[2,16,16,128], index: 14, kind: output, shape index: {}]  }
   0x1   :  { %6485 = sst [smem:[#allocation78_spill]] %s6424_s1 }
   0x2   :  { %6486 = sst [smem:[#allocation79_spill]] %s6426_s3 }
   0x3   :  { %6487 = sst [smem:[#allocation80_spill]] %s6428_s5 }
   0x4   :  { %6488 = sst [smem:[#allocation81_spill]] %s6429_s6 }
   0x5   :  { %6489 = sst [smem:[#allocation82_spill]] %s6432_s9 }
   0x6   :  { %6490 = sst [smem:[#allocation83_spill]] %s6435_s12 }
   0x7   :  { %6491 = sst [smem:[#allocation84_spill]] %s6436_s13 }
   0x8   :  { %6492 = sst [smem:[#allocation85_spill]] %s6437_s14 }
   0x9   :  { %19 = vsyncpa [#allocation3], 0 }
   0xa   :  { %21 = vsyncpa [#allocation3 + $0x1], 0 }
   0xb   :  { %22 = vsyncpa [#allocation6], 0 }
   0xc   :  { %23 = vsyncpa [#allocation9], 0 }
   0xd   :  { %24 = vsyncpa [#allocation12], 0 }
   0xe   :  { %25 = vsyncpa [#allocation4], 0 }
   0xf   :  { %27 = vsyncpa [#allocation4 + $0x1], 0  ;;  %s4162_s29 = smov 0   ;;  %s4164_s30 = smov 0  }
  0x10   :  { %s4166_s15 = smov 0   ;;  %s4168_s16 = smov 0  }
  0x11 LB: > { %s4070_s17 = smov [#allocation5]   ;;  %s4183_s19 = sadd.s32 4294967295, %s4068_s16   ;;  %s4068_s16 = sphi %s4168_s16, %s6684_s16   ;;  %s4064_s15 = sphi %s4166_s15, %s6683_s15   ;;  %s4060_s30 = sphi %s4164_s30, %s6682_s30   ;;  %s4056_s29 = sphi %s4162_s29, %s6681_s29  }
  0x12   : > { %s375_s18 = sshll.u32 %s4070_s17, 4  ;;  %p3208_p0 = scmp.ge.s32.totalorder %s4068_s16, 1  ;;  %s376_s18 = int_to_ptr.vmem [resolvable:$true] %s375_s18 }
  0x13   : > { %p6441_p1 = scmp.eq.s32.totalorder %s4183_s19, 0  ;;  %p363_p2 = scmp.lt.s32.totalorder %s4068_s16, 3 }
  0x14   : > { %s4071_s21 = smov [#allocation8]   ;;  %s4072_s24 = smov [#allocation11]  }
  0x15   : > { %p4188_p3 = pnand %p3208_p0, %p363_p2  ;;  %s406_s22 = sshll.u32 %s4071_s21, 4  ;;  %s407_s22 = int_to_ptr.vmem [resolvable:$true] %s406_s22 }
  0x16   : > { %s433_s25 = sshll.u32 %s4072_s24, 4  ;;  %s3819_s27 = scalar_lea.vmem %s376_s18, 1024  ;;  %s4201_s25 = int_to_ptr.vmem [resolvable:$true] %s433_s25 }
  0x17   : > { %s6493_s20 = scalar_select %p4188_p3, 1, 0 }
  0x18   : > { %p3512_p5 = pneg %p4188_p3  ;;  %p3820_p8 = scmp.ne.s32.totalorder %s376_s18, %s3819_s27 }
  0x19   : > { %p3827_p11 = scmp.lt.s32.totalorder %s376_s18, %s376_s18  ;;  %p3828_p12 = scmp.lt.s32.totalorder %s3819_s27, %s3819_s27 }
  0x1a   : > { %p4197_p6 = pnand %p3512_p5, %p6441_p1 }
  0x1b   : > { %p3829_p13 = por %p3828_p12, %p3827_p11 }
  0x1c   : > { %p4205_p7 = pneg %p4197_p6 }
  0x1e   : > { %p3822_p9 = pnand %p3820_p8, %p4205_p7 }
  0x20   : > { %p3823_p10 = pneg %p3822_p9 }
  0x22   : > { %p3830_p0 = pnand %p3829_p13, %p3823_p10 }
  0x24   : > { %3833 = shalt.err (!%p3830_p0)
}
  0x25   : > { %s6439_s28 = smov 64   ;;  %s6440_s17 = smov 4  }
  0x26   : > { %s6496_s1 = sld [smem:[#allocation78_spill]]  ;;  %s3845_s14 = scalar_lea.vmem %s407_s22, 16 }
  0x27   : > { %p3846_p2 = scmp.ne.s32.totalorder %s407_s22, %s3845_s14  ;;  %s3852_s27 = scalar_lea.vmem %s407_s22, 32 }
  0x28   : > { %p3853_p9 = scmp.lt.s32.totalorder %s407_s22, %s407_s22  ;;  %p3854_p10 = scmp.lt.s32.totalorder %s3852_s27, %s3845_s14 }
  0x29   : > { %p3848_p5 = pnand %p3846_p2, %p4205_p7 }
  0x2a   : > { %p3855_p11 = por %p3854_p10, %p3853_p9 }
  0x2b   : > { %p3849_p8 = pneg %p3848_p5 }
  0x2c   : > { %3515 = dma.hbm_to_vmem [thread:$0]  (!%p4197_p6), %s6496_s1, 1024, %s376_s18, [#allocation6], %s6439_s28, %s6439_s28, %s6440_s17  }
  0x2d   : > { %p3856_p12 = pnand %p3855_p11, %p3849_p8 }
  0x2f   : > { %3859 = shalt.err (!%p3856_p12)
}
  0x30   : > { %s6497_s5 = sld [smem:[#allocation80_spill]]  ;;  %s3871_s18 = scalar_lea.vmem %s4201_s25, 2048 }
  0x31   : > { %p3872_p13 = scmp.ne.s32.totalorder %s4201_s25, %s3871_s18  ;;  %p3879_p5 = scmp.lt.s32.totalorder %s4201_s25, %s4201_s25 }
  0x32   : > { %p3880_p9 = scmp.lt.s32.totalorder %s3871_s18, %s3871_s18 }
  0x33   : > { %p3874_p0 = pnand %p3872_p13, %p4205_p7 }
  0x34   : > { %p3881_p8 = por %p3880_p9, %p3879_p5 }
  0x35   : > { %p3875_p2 = pneg %p3874_p0 }
  0x36   : > { %3521 = dma.hbm_to_vmem [thread:$0]  (!%p4197_p6), %s6497_s5, 16, %s407_s22, [#allocation9]  }
  0x37   : > { %p3882_p10 = pnand %p3881_p8, %p3875_p2 }
  0x39   : > { %3885 = shalt.err (!%p3882_p10)
}
  0x3a   : > { %s6442_s14 = smov 128   ;;  %s6443_s12 = smov 8  }
  0x3b   : > { %s6498_s9 = sld [smem:[#allocation82_spill]]  ;;  %s4077_s21 = smov [#allocation7]  }
  0x3c   : > { %s392_s24 = sshll.u32 %s4077_s21, 4  ;;  %s4078_s27 = smov [#allocation10]   ;;  %s393_s24 = int_to_ptr.vmem [resolvable:$true] %s392_s24 }
  0x3d   : > { %s417_s18 = sshll.u32 %s4078_s27, 4  ;;  %s3897_s28 = scalar_lea.vmem %s393_s24, 16  ;;  %s418_s18 = int_to_ptr.vmem [resolvable:$true] %s417_s18 }
  0x3e   : > { %p3898_p11 = scmp.ne.s32.totalorder %s393_s24, %s3897_s28  ;;  %s3904_s17 = scalar_lea.vmem %s393_s24, 32 }
  0x3f   : > { %p3905_p0 = scmp.lt.s32.totalorder %s393_s24, %s393_s24  ;;  %p3906_p2 = scmp.lt.s32.totalorder %s3904_s17, %s3897_s28 }
  0x40   : > { %p3900_p12 = pnand %p3898_p11, %p4205_p7 }
  0x41   : > { %3527 = dma.hbm_to_vmem [thread:$0]  (!%p4197_p6), %s6498_s9, 2048, %s4201_s25, [#allocation12], %s6442_s14, %s6442_s14, %s6443_s12  }
  0x42   : > { %p3901_p13 = pneg %p3900_p12  ;;  %p3907_p5 = por %p3906_p2, %p3905_p0 }
  0x44   : > { %p3908_p9 = pnand %p3907_p5, %p3901_p13 }
  0x46   : > { %3911 = shalt.err (!%p3908_p9)
}
  0x47   : > { %s6499_s3 = sld [smem:[#allocation79_spill]]  ;;  %s3923_s22 = scalar_lea.vmem %s418_s18, 16 }
  0x48   : > { %p3924_p8 = scmp.ne.s32.totalorder %s418_s18, %s3923_s22  ;;  %s3930_s21 = scalar_lea.vmem %s418_s18, 32 }
  0x49   : > { %p3931_p12 = scmp.lt.s32.totalorder %s418_s18, %s418_s18  ;;  %p3932_p4 = scmp.lt.s32.totalorder %s3930_s21, %s3923_s22 }
  0x4a   : > { %p3926_p10 = pnand %p3924_p8, %p4205_p7 }
  0x4b   : > { %p3933_p1 = por %p3932_p4, %p3931_p12 }
  0x4c   : > { %p3927_p11 = pneg %p3926_p10 }
  0x4d   : > { %3518 = dma.hbm_to_vmem [thread:$0]  (!%p4197_p6), %s6499_s3, 16, %s393_s24, [#allocation6]  }
  0x4e   : > { %p3934_p0 = pnand %p3933_p1, %p3927_p11 }
  0x50   : > { %3937 = shalt.err (!%p3934_p0)
}
  0x51   : > { %s6500_s6 = sld [smem:[#allocation81_spill]]  ;;  %s4079_s24 = smov [#allocation13]  }
  0x52   : > { %s449_s27 = sshll.u32 %s4079_s24, 4  ;;  %s450_s27 = int_to_ptr.vmem [resolvable:$true] %s449_s27 }
  0x53   : > { %s3949_s13 = scalar_lea.vmem %s450_s27, 1024  ;;  %p3957_p9 = scmp.lt.s32.totalorder %s450_s27, %s450_s27 }
  0x54   : > { %p3950_p13 = scmp.ne.s32.totalorder %s450_s27, %s3949_s13  ;;  %p3958_p8 = scmp.lt.s32.totalorder %s3949_s13, %s3949_s13 }
  0x56   : > { %p3952_p2 = pnand %p3950_p13, %p4205_p7  ;;  %p3959_p4 = por %p3958_p8, %p3957_p9 }
  0x57   : > { %3524 = dma.hbm_to_vmem [thread:$0]  (!%p4197_p6), %s6500_s6, 16, %s418_s18, [#allocation9]  }
  0x58   : > { %p3953_p5 = pneg %p3952_p2 }
  0x5a   : > { %p3960_p1 = pnand %p3959_p4, %p3953_p5 }
  0x5c   : > { %3963 = shalt.err (!%p3960_p1)
}
  0x5d   : > { %s6501_s25 = smov 4   ;;  %s6502_s22 = smov 64  }
  0x5e   : > { %3530 = dma.hbm_to_vmem [thread:$0]  (!%p4197_p6), %s6434_s11, 1024, %s450_s27, [#allocation12], %s6502_s22, %s6502_s22, %s6501_s25  }
  0x5f   : > { %s3207_s23 = sadd.s32 4294967294, %s4068_s16   ;;  %s4267_s26 = sadd.s32 1, %s4068_s16  }
  0x60   : > { %s37_s28 = ssub.s32 %s4068_s16, %s4267_s26  ;;  %s40_s17 = sadd.s32 1, %s4064_s15 }
  0x61   : > { %p38_p7 = scmp.eq.s32.totalorder %s37_s28, 0  ;;  %p47_p10 = scmp.ne.s32.totalorder %s4064_s15, %s4060_s30 }
  0x62   : > { %p48_p11 = scmp.eq.s32.totalorder %s4068_s16, 0  ;;  %p53_p12 = scmp.ne.s32.totalorder %s4060_s30, %s4056_s29 }
  0x63   : > { %s4278_s24 = scalar_select %p38_p7, %s4064_s15, %s40_s17  }
  0x64   : > { %p4280_p0 = por %p48_p11, %p47_p10  ;;  %p6504_p13 = scmp.eq.s32.totalorder %s4183_s19, 0 }
  0x65   : > { %p350_p2 = scmp.eq.s32.totalorder %s4183_s19, 1  ;;  %p356_p5 = scmp.eq.s32.totalorder %s3207_s23, 1 }
  0x66   : > { %p4286_p6 = por %p6504_p13, %p53_p12  ;;  %p3545_p9 = scmp.lt.s32.totalorder %s4068_s16, 2 }
  0x67   : > { %s469_s25 = sand.u32 1, %s4064_s15   ;;  %p4293_p8 = por %p350_p2, %p47_p10 }
  0x68   : > { %s6505_s27 = scalar_select %p4286_p6, 1, 0 }
  0x69   : > { %s6506_s22 = scalar_select %p4293_p8, 1, 0 }
  0x6a   : > { %p4297_p4 = por %p356_p5, %p53_p12  ;;  %s3216_s18 = sshll.u32 %s469_s25, 8 }
  0x6b   : > { %s3247_s28 = sshll.u32 %s4068_s16, 12  ;;  %s473_s23 = scalar_lea.vmem [#allocation2], %s3216_s18 }
  0x6c   : > { %s6507_s21 = scalar_select %p4297_p4, 1, 0 }
  0x6d   : > { %s4305_s12 = scalar_lea.hbm %s6423_s0, %s3247_s28  ;;  %s480_s1 = sshll.u32 %s473_s23, 4  ;;  %s4307_s1 = int_to_ptr.vmem [resolvable:$true] %s480_s1 }
  0x6e   : > { %p4311_p1 = pnand %p3545_p9, %p4280_p0  ;;  %s4315_s5 = scalar_lea.sflag [#allocation3], %s469_s25 }
  0x6f   : > { %s3964_s6 = scalar_lea.hbm %s4305_s12, 4096  ;;  %s3969_s18 = scalar_lea.hbm %s6423_s0, 8192 }
  0x70   : > { %p3965_p7 = scmp.ne.s32.totalorder %s4305_s12, %s3964_s6  ;;  %p3966_p10 = pneg %p4311_p1 }
  0x71   : > { %p3970_p0 = scmp.lt.s32.totalorder %s4305_s12, %s6423_s0  ;;  %p3971_p13 = scmp.lt.s32.totalorder %s3969_s18, %s3964_s6 }
  0x72   : > { %p3967_p11 = pnand %p3966_p10, %p3965_p7 }
  0x73   : > { %p3972_p2 = por %p3971_p13, %p3970_p0 }
  0x74   : > { %p3968_p12 = pneg %p3967_p11 }
  0x76   : > { %p3973_p5 = pnand %p3972_p2, %p3968_p12 }
  0x78   : > { %3976 = shalt.err (!%p3973_p5)
}
  0x79   : > { %s3977_s13 = scalar_lea.vmem %s4307_s1, 4096  ;;  %s4080_s25 = smov [#allocation2]  }
  0x7a   : > { %p3978_p9 = scmp.ne.s32.totalorder %s4307_s1, %s3977_s13  ;;  %s3982_s9 = sshll.u32 %s4080_s25, 4  ;;  %s3983_s9 = int_to_ptr.vmem [resolvable:$false] %s3982_s9 }
  0x7b   : > { %s3984_s14 = scalar_lea.vmem %s3983_s9, 8192  ;;  %p3985_p11 = scmp.lt.s32.totalorder %s4307_s1, %s3983_s9 }
  0x7c   : > { %p3980_p4 = pnand %p3978_p9, %p3966_p10  ;;  %p3986_p8 = scmp.lt.s32.totalorder %s3984_s14, %s3977_s13 }
  0x7e   : > { %p3981_p7 = pneg %p3980_p4  ;;  %p3987_p6 = por %p3986_p8, %p3985_p11 }
  0x80   : > { %p3988_p3 = pnand %p3987_p6, %p3981_p7 }
  0x82   : > { %3991 = shalt.err (!%p3988_p3)
}
  0x83   : > { %s6509_s6 = smov 8   ;;  %s6510_s28 = smov 128  }
  0x84   : > { %3534 = dma.hbm_to_vmem [thread:$0]  (!%p4311_p1), %s4305_s12, 4096, %s4307_s1, %s4315_s5, %s6510_s28, %s6510_s28, %s6509_s6  }
  0x85   : > { %p6511_p4 = scmp.ne.s32.totalorder %s6493_s20, 0 }
  0x87   : > { %492 = sbr.rel (%p6511_p4) target bundleno = 1608 (0x648), region = 76 }
  0x8c   : > { %s4342_s18 = sand.u32 1, %s4060_s30   ;;  %p6512_p3 = scmp.ne.s32.totalorder %s6505_s27, 0 }
  0x8d   : > { %s3220_s9 = sshll.u32 %s4342_s18, 8  ;;  %s495_s17 = scalar_lea.sflag [#allocation3], %s4342_s18 }
  0x8e   : > { %s4348_s3 = scalar_lea.vmem [#allocation2], %s3220_s9 }
  0x8f   : > { %4035 = dma.done.wait (%p6512_p3), %s495_s17, 4096  }
  0x90   : > { %4037 = vsyncadd (%p6512_p3), %s495_s17, 4294963200  ;;  %p6513_p6 = scmp.eq.s32.totalorder %s4183_s19, 0 }
  0x92   : > { %4039 = dma.done.wait (%p6513_p6), [#allocation6], 1040   ;;  %p6514_p8 = pmov %p6513_p6 }
  0x93   : > { %p6515_p1 = pmov %p6513_p6 }
  0x94   : > { %4041 = vsyncadd (%p6514_p8), [#allocation6], 4294966256 }
  0x95   : > { %4043 = dma.done.wait (%p6515_p1), [#allocation9], 32   ;;  %p6516_p10 = pmov %p6515_p1 }
  0x96   : > { %p6517_p12 = pmov %p6515_p1 }
  0x97   : > { %4045 = vsyncadd (%p6516_p10), [#allocation9], 4294967264 }
  0x98   : > { %4047 = dma.done.wait (%p6517_p12), [#allocation12], 3072   ;;  %p6518_p0 = pmov %p6515_p1 }
  0x99   : > { %v3602_v0 = vld [vmem:[#allocation5 + $0x38] sm:$0xff]   ;;  %v3603_v1 = vld [vmem:[#allocation5 + $0x30] sm:$0xff]   ;;  %v3604_v2 = vld [vmem:[#allocation5 + $0x28] sm:$0xff]   ;;  %vm1114_vm0 = vcmask 1040384   ;;  %vm1445_vm1 = vcmask 1046528   ;;  %vm1760_vm2 = vcmask 1045504  }
  0x9a   : > { %4049 = vsyncadd (%p6518_p0), [#allocation12], 4294964224  ;;  %3353 = vmatprep.subr.bf16.mxu0 %v3602_v0  ;;  %v3605_v3 = vld [vmem:[#allocation5 + $0x20] sm:$0xff]   ;;  %v569_v5 = vld [vmem:[%s4348_s3 + $0x8] sm:$0xff]  ;;  %vm4082_vm3 = vmmov 0   ;;  %s6675_s13 = sld [smem:[#allocation83_spill]] }
  0x9b   : > { %3354 = vmatpush3.bf16.msra.mxu0 %v3602_v0  ;;  %v568_v4 = vld [vmem:[%s4348_s3] sm:$0xff]  ;;  %v3606_v7 = vld [vmem:[#allocation5 + $0x18] sm:$0xff]   ;;  %v3607_v8 = vld [vmem:[#allocation5 + $0x10] sm:$0xff]   ;;  %s6676_s6 = sld [smem:[#allocation84_spill]]  ;;  %s6249_s28 = scalar_lea.vmem [#allocation14], %s3220_s9 }
  0x9c   : > { %3355 = vmatprep.subr.bf16.mxu0 %v3603_v1  ;;  %v600_v6 = vpack.c.bf16 %v569_v5, %v568_v4  ;;  %v3608_v9 = vld [vmem:[#allocation5 + $0x8] sm:$0xff]   ;;  %v3609_v10 = vld [vmem:[#allocation5] sm:$0xff]   ;;  %v570_v11 = vld [vmem:[%s4348_s3 + $0x10] sm:$0xff]  ;;  %s3248_s9 = sshll.u32 %s4183_s19, 12  ;;  %s3077_s17 = sshll.u32 %s6249_s28, 4  ;;  %s6377_s17 = int_to_ptr.vmem [resolvable:$true] %s3077_s17 }
  0x9d   : > { %v571_v12 = vld [vmem:[%s4348_s3 + $0x18] sm:$0xff]  ;;  %v572_v13 = vld [vmem:[%s4348_s3 + $0x20] sm:$0xff]  ;;  %v573_v14 = vld [vmem:[%s4348_s3 + $0x28] sm:$0xff]  ;;  %s6677_s20 = sld [smem:[#allocation85_spill]]  ;;  %s3064_s19 = scalar_lea.sflag [#allocation4], %s4342_s18 }
  0x9e   : > { %3369 = vmatprep.mubr.bf16.mxu0 %v600_v6  ;;  %v601_v15 = vpack.c.bf16 %v571_v12, %v570_v11  ;;  %v602_v16 = vpack.c.bf16 %v573_v14, %v572_v13  ;;  %v574_v17 = vld [vmem:[%s4348_s3 + $0x30] sm:$0xff]  ;;  %v575_v18 = vld [vmem:[%s4348_s3 + $0x38] sm:$0xff]  ;;  %v576_v19 = vld [vmem:[%s4348_s3 + $0x40] sm:$0xff]  ;;  %s3992_s27 = scalar_lea.vmem %s6377_s17, 4096  ;;  %p6678_p2 = scmp.ne.s32.totalorder %s6506_s22, 0 }
  0x9f   : > { %3356 = vmatpush3.bf16.msra.mxu0 %v3603_v1  ;;  %v577_v20 = vld [vmem:[%s4348_s3 + $0x48] sm:$0xff]  ;;  %v603_v21 = vpack.c.bf16 %v575_v18, %v574_v17  ;;  %v578_v23 = vld [vmem:[%s4348_s3 + $0x50] sm:$0xff]  ;;  %v579_v24 = vld [vmem:[%s4348_s3 + $0x58] sm:$0xff]  ;;  %p3993_p13 = scmp.ne.s32.totalorder %s6377_s17, %s3992_s27  ;;  %s4084_s23 = smov [#allocation14]  }
  0xa0   : > { %3357 = vmatprep.subr.bf16.mxu0 %v3604_v2  ;;  %v604_v22 = vpack.c.bf16 %v577_v20, %v576_v19  ;;  %v580_v25 = vld [vmem:[%s4348_s3 + $0x60] sm:$0xff]  ;;  %v581_v26 = vld [vmem:[%s4348_s3 + $0x68] sm:$0xff]  ;;  %v605_v27 = vpack.c.bf16 %v579_v24, %v578_v23  ;;  %v582_v29 = vld [vmem:[%s4348_s3 + $0x70] sm:$0xff] }
  0xa1   : > { %v606_v28 = vpack.c.bf16 %v581_v26, %v580_v25  ;;  %v583_v30 = vld [vmem:[%s4348_s3 + $0x78] sm:$0xff]  ;;  %v584_v31 = vld [vmem:[%s4348_s3 + $0x80] sm:$0xff]  ;;  %v585_v32 = vld [vmem:[%s4348_s3 + $0x88] sm:$0xff]  ;;  %p3994_p5 = pnand %p3993_p13, %p6678_p2 }
  0xa2   : > { %v607_v33 = vpack.c.bf16 %v583_v30, %v582_v29  ;;  %v608_v34 = vpack.c.bf16 %v585_v32, %v584_v31  ;;  %v586_v35 = vld [vmem:[%s4348_s3 + $0x90] sm:$0xff]  ;;  %v587_v36 = vld [vmem:[%s4348_s3 + $0x98] sm:$0xff]  ;;  %v588_v37 = vld [vmem:[%s4348_s3 + $0xa0] sm:$0xff] }
  0xa3   : > { %3358 = vmatpush3.bf16.msra.mxu0 %v3604_v2  ;;  %v589_v38 = vld [vmem:[%s4348_s3 + $0xa8] sm:$0xff]  ;;  %v609_v39 = vpack.c.bf16 %v587_v36, %v586_v35  ;;  %v590_v41 = vld [vmem:[%s4348_s3 + $0xb0] sm:$0xff]  ;;  %v591_v42 = vld [vmem:[%s4348_s3 + $0xb8] sm:$0xff]  ;;  %s6375_s12 = scalar_lea.hbm %s6677_s20, %s3248_s9  ;;  %p3995_p9 = pneg %p3994_p5 }
  0xa4   : > { %3359 = vmatprep.subr.bf16.mxu0 %v3605_v3  ;;  %v610_v40 = vpack.c.bf16 %v589_v38, %v588_v37  ;;  %v592_v43 = vld [vmem:[%s4348_s3 + $0xc0] sm:$0xff]  ;;  %v593_v44 = vld [vmem:[%s4348_s3 + $0xc8] sm:$0xff]  ;;  %v611_v45 = vpack.c.bf16 %v591_v42, %v590_v41  ;;  %v594_v47 = vld [vmem:[%s4348_s3 + $0xd0] sm:$0xff] }
  0xa5   : > { %v612_v46 = vpack.c.bf16 %v593_v44, %v592_v43  ;;  %v595_v48 = vld [vmem:[%s4348_s3 + $0xd8] sm:$0xff]  ;;  %v596_v49 = vld [vmem:[%s4348_s3 + $0xe0] sm:$0xff]  ;;  %v597_v50 = vld [vmem:[%s4348_s3 + $0xe8] sm:$0xff] }
  0xa6   : > { %v613_v51 = vpack.c.bf16 %v595_v48, %v594_v47  ;;  %v614_v52 = vpack.c.bf16 %v597_v50, %v596_v49  ;;  %v598_v53 = vld [vmem:[%s4348_s3 + $0xf0] sm:$0xff]  ;;  %v599_v54 = vld [vmem:[%s4348_s3 + $0xf8] sm:$0xff]  ;;  %v4401_v56 = vld [vmem:[%s6425_s2] ss:$0 sm:$0xff] }
  0xa7   : > { %3360 = vmatpush3.bf16.msra.mxu0 %v3605_v3  ;;  %v615_v55 = vpack.c.bf16 %v599_v54, %v598_v53  ;;  %v4403_v58 = vld [vmem:[#allocation7] ss:$0 sm:$0xff]  ;;  %v1080_v29 = vld [vmem:[%s6427_s4 + $0x4] sm:$0x7] }
  0xa8   : > { %3361 = vmatprep.subr.bf16.mxu0 %v3606_v7 }
  0xab   : > { %3362 = vmatpush3.bf16.msra.mxu0 %v3606_v7  ;;  %v1243_v7 = vlaneseq }
  0xac   : > { %3363 = vmatprep.subr.bf16.mxu0 %v3607_v8 }
  0xad   : > { %v1244_v17 = vshrl.u32 %v1243_v7, 7 }
  0xaf   : > { %3364 = vmatpush3.bf16.msra.mxu0 %v3607_v8  ;;  %v4436_v24 = vsub.s32 0, %v1244_v17  ;;  %v1560_v42 = vsub.s32 1, %v1244_v17 }
  0xb0   : > { %3365 = vmatprep.subr.bf16.mxu0 %v3608_v9 }
  0xb1   : > { %6519 = vst [vmem:[#allocation20_spill] sm:$0xff] %v4436_v24  ;;  %v4464_v41 = vrot.slane %v1080_v29, %v4436_v24 }
  0xb3   : > { %3366 = vmatpush3.bf16.msra.mxu0 %v3608_v9 }
  0xb4   : > { %3367 = vmatprep.subr.bf16.mxu0 %v3609_v10 }
  0xb7   : > { %3368 = vmatpush3.bf16.msra.mxu0 %v3609_v10 }
  0xba   : > { %3370 = vmatmul.mubr.bf16.vlgmr.msra.gmra.mxu0 %v601_v15 }
  0xbb   : > { %3373 = vmatprep.mubr.bf16.mxu0 %v602_v16 }
  0xc2   : > { %3374 = vmatmul.mubr.bf16.gmra.mxu0 %v603_v21 }
  0xc3   : > { %3377 = vmatprep.mubr.bf16.mxu0 %v604_v22 }
  0xca   : > { %3378 = vmatmul.mubr.bf16.gmra.mxu0 %v605_v27  ;;  %v1079_v27 = vld [vmem:[%s6427_s4] sm:$0x7] }
  0xcb   : > { %3381 = vmatprep.mubr.bf16.mxu0 %v606_v28  ;;  %v4460_v38 = vrot.slane %v1079_v27, %v4436_v24 }
  0xd2   : > { %3382 = vmatmul.mubr.bf16.gmra.mxu0 %v607_v33  ;;  %v1081_v33 = vld [vmem:[%s6427_s4 + $0x8] sm:$0x7] }
  0xd3   : > { %3385 = vmatprep.mubr.bf16.mxu0 %v608_v34  ;;  %v4471_v47 = vrot.slane %v1081_v33, %v4436_v24 }
  0xda   : > { %3386 = vmatmul.mubr.bf16.gmra.mxu0 %v609_v39 }
  0xdb   : > { %3389 = vmatprep.mubr.bf16.mxu0 %v610_v40 }
  0xe2   : > { %3390 = vmatmul.mubr.bf16.gmra.mxu0 %v611_v45 }
  0xe3   : > { %3393 = vmatprep.mubr.bf16.mxu0 %v612_v46 }
  0xea   : > { %3394 = vmatmul.mubr.bf16.gmra.mxu0 %v613_v51 }
  0xeb   : > { %3397 = vmatprep.mubr.bf16.mxu0 %v614_v52 }
  0xf2   : > { %3398 = vmatmul.mubr.bf16.gmra.mxu0 %v615_v55 }
 0x17a   : > { %v3371_v57 = vpop.f32.mrf.mxu0 }
 0x17b   : > { %v850_v59 = vmul.f32 %v3371_v57, %v4401_v56 }
 0x17c   : > { %v714_v60 = vpop.f32.mrf.mxu0 }
 0x17d   : > { %v4407_v61 = vadd.f32 %v4403_v58, %v850_v59  ;;  %v848_v62 = vmul.f32 %v4401_v56, %v714_v60  ;;  %v1247_v60 = vmul.f32 0.0, %v4460_v38 }
 0x17e   : > { %v3372_v63 = vpop.f32.mrf.mxu0 }
 0x17f   : > { %v921_v0 = vmul.f32 0.5, %v4407_v61  ;;  %v4412_v1 = vadd.f32 %v4403_v58, %v848_v62  ;;  %v851_v2 = vmul.f32 %v3372_v63, %v4401_v56  ;;  %v4481_v62 = vrot.slane %v1079_v27, %v1560_v42 }
 0x180   : > { %v717_v3 = vpop.f32.mrf.mxu0  ;;  %v1875_v63 = vsub.s32 2, %v1244_v17 }
 0x181   : > { %3610 = vtanh.f32 %v921_v0  ;;  %v919_v4 = vmul.f32 0.5, %v4412_v1  ;;  %v4417_v5 = vadd.f32 %v4403_v58, %v851_v2  ;;  %v849_v6 = vmul.f32 %v4401_v56, %v717_v3 }
 0x182   : > { %v3375_v8 = vpop.f32.mrf.mxu0 }
 0x183   : > { %3612 = vtanh.f32 %v919_v4  ;;  %v922_v9 = vmul.f32 0.5, %v4417_v5  ;;  %v4422_v10 = vadd.f32 %v4403_v58, %v849_v6  ;;  %v854_v11 = vmul.f32 %v3375_v8, %v4401_v56 }
 0x184   : > { %v730_v12 = vpop.f32.mrf.mxu0 }
 0x185   : > { %3614 = vtanh.f32 %v922_v9  ;;  %v920_v13 = vmul.f32 0.5, %v4422_v10  ;;  %v4427_v14 = vadd.f32 %v4403_v58, %v854_v11  ;;  %v852_v15 = vmul.f32 %v4401_v56, %v730_v12 }
 0x186   : > { %v3376_v16 = vpop.f32.mrf.mxu0 }
 0x187   : > { %3616 = vtanh.f32 %v920_v13  ;;  %v855_v18 = vmul.f32 %v3376_v16, %v4401_v56  ;;  %v925_v21 = vmul.f32 0.5, %v4427_v14  ;;  %v4434_v22 = vadd.f32 %v4403_v58, %v852_v15 }
 0x188   : > { %v733_v19 = vpop.f32.mrf.mxu0  ;;  %v4492_v15 = vmul.f32 0.0, %v4481_v62  ;;  %v4496_v16 = vrot.slane %v1081_v33, %v1560_v42 }
 0x189   : > { %v853_v20 = vmul.f32 %v4401_v56, %v733_v19  ;;  %v4439_v25 = vadd.f32 %v4403_v58, %v855_v18  ;;  %3618 = vtanh.f32 %v925_v21  ;;  %v923_v34 = vmul.f32 0.5, %v4434_v22 }
 0x18a   : > { %v3379_v23 = vpop.f32.mrf.mxu0 }
 0x18b   : > { %v858_v26 = vmul.f32 %v3379_v23, %v4401_v56  ;;  %v4449_v30 = vadd.f32 %v4403_v58, %v853_v20  ;;  %v926_v39 = vmul.f32 0.5, %v4439_v25  ;;  %3620 = vtanh.f32 %v923_v34 }
 0x18c   : > { %v746_v28 = vpop.f32.mrf.mxu0  ;;  %v4502_v20 = vrot.slane %v1079_v27, %v1875_v63 }
 0x18d   : > { %v856_v31 = vmul.f32 %v4401_v56, %v746_v28  ;;  %v4457_v35 = vadd.f32 %v4403_v58, %v858_v26  ;;  %v924_v49 = vmul.f32 0.5, %v4449_v30  ;;  %3622 = vtanh.f32 %v926_v39 }
 0x18e   : > { %v3611_v32 = vpop.eup %3610  ;;  %v3380_v36 = vpop.f32.mrf.mxu0  ;;  %v4509_v26 = vrot.slane %v1080_v29, %v1875_v63  ;;  %v4511_v28 = vrot.slane %v1081_v33, %v1875_v63 }
 0x18f   : > { %v985_v37 = vadd.f32 1.0, %v3611_v32  ;;  %v4467_v43 = vadd.f32 %v4403_v58, %v856_v31  ;;  %v859_v44 = vmul.f32 %v3380_v36, %v4401_v56  ;;  %v929_v51 = vmul.f32 0.5, %v4457_v35 }
 0x190   : > { %v3613_v40 = vpop.eup %3612  ;;  %v749_v45 = vpop.f32.mrf.mxu0  ;;  %3624 = vtanh.f32 %v924_v49 }
 0x191   : > { %v1017_v46 = vmul.f32 0.5, %v985_v37  ;;  %v983_v48 = vadd.f32 1.0, %v3613_v40  ;;  %v4476_v52 = vadd.f32 %v4403_v58, %v859_v44  ;;  %v857_v53 = vmul.f32 %v4401_v56, %v749_v45 }
 0x192   : > { %v3615_v50 = vpop.eup %3614  ;;  %v927_v0 = vmul.f32 0.5, %v4467_v43  ;;  %v3383_v2 = vpop.f32.mrf.mxu0  ;;  %3626 = vtanh.f32 %v929_v51 }
 0x193   : > { %v1049_v54 = vmul.f32 %v1017_v46, %v4407_v61  ;;  %v1015_v55 = vmul.f32 0.5, %v983_v48  ;;  %v986_v57 = vadd.f32 1.0, %v3615_v50  ;;  %v930_v61 = vmul.f32 0.5, %v4476_v52 }
 0x194   : > { %v3617_v59 = vpop.eup %3616  ;;  %v4487_v8 = vadd.f32 %v4403_v58, %v857_v53  ;;  %v862_v13 = vmul.f32 %v3383_v2, %v4401_v56  ;;  %3628 = vtanh.f32 %v927_v0 }
 0x195   : > { %v1047_v3 = vmul.f32 %v1015_v55, %v4412_v1  ;;  %v1018_v4 = vmul.f32 0.5, %v986_v57  ;;  %v984_v6 = vadd.f32 1.0, %v3617_v59  ;;  %v1118_v7 = vrot.slane %v1049_v54, 7 }
 0x196   : > { %v4494_v1 = vrot.slane %v1080_v29, %v1560_v42  ;;  %v3619_v31 = vpop.eup %3618  ;;  %3630 = vtanh.f32 %v930_v61  ;;  %v4514_v34 = vmul.f32 0.5, %v4487_v8 }
 0x197   : > { %v1115_v9 = vrot.slane %v1047_v3, 7  ;;  %v1050_v11 = vmul.f32 %v1018_v4, %v4417_v5  ;;  %v1016_v12 = vmul.f32 0.5, %v984_v6  ;;  %v762_v5 = vpop.f32.mrf.mxu0  ;;  %v4505_v21 = vsel %vm1114_vm0, 0.0, %v1118_v7 }
 0x198   : > { %6521 = vst [vmem:[#allocation22_spill] sm:$0xff] %v4505_v21  ;;  %v4528_v33 = vmul.f32 %v4401_v56, %v762_v5  ;;  %v4532_v37 = vmul.f32 %v4460_v38, %v4505_v21  ;;  %v1284_v39 = vmul.f32 %v4464_v41, %v4505_v21  ;;  %v1350_v40 = vmul.f32 %v4471_v47, %v4505_v21  ;;  %v3621_v49 = vpop.eup %3620 }
 0x199   : > { %v4499_v17 = vsel %vm1114_vm0, 0.0, %v1115_v9  ;;  %v1119_v18 = vrot.slane %v1050_v11, 7  ;;  %v1048_v19 = vmul.f32 %v1016_v12, %v4422_v10  ;;  %v4517_v10 = vadd.f32 %v4403_v58, %v862_v13 }
 0x19a   : > { %6520 = vst [vmem:[#allocation21_spill] sm:$0xff] %v4499_v17  ;;  %v1282_v23 = vmul.f32 %v4464_v41, %v4499_v17  ;;  %v1248_v27 = vmul.f32 %v4460_v38, %v4499_v17  ;;  %v989_v48 = vadd.f32 1.0, %v3619_v31  ;;  %v3623_v55 = vpop.eup %3622  ;;  %v1446_v59 = vrot.slane %v4499_v17, 1 }
 0x19b   : > { %v1116_v32 = vrot.slane %v1048_v19, 7  ;;  %v4522_v36 = vsel %vm1114_vm0, %v1118_v7, %v1119_v18  ;;  %v4525_v29 = vsel %vm1114_vm0, %v1119_v18, 0.0  ;;  %v987_v5 = vadd.f32 1.0, %v3621_v49 }
 0x19c   : > { %6522 = vst [vmem:[#allocation23_spill] sm:$0xff] %v4522_v36  ;;  %6523 = vst [vmem:[#allocation24_spill] sm:$0xff] %v4525_v29  ;;  %v1314_v42 = vadd.f32 %v1282_v23, %v1247_v60  ;;  %v6448_v50 = vrot.slane %v4522_v36, 1  ;;  %v1454_v51 = vrot.slane %v4525_v29, 1  ;;  %v4548_v57 = vadd.f32 %v1284_v39, %v1248_v27 }
 0x19d   : > { %v4541_v46 = vsel %vm1114_vm0, %v1115_v9, %v1116_v32  ;;  %v1227_v53 = vsel %vm1114_vm0, %v1116_v32, 0.0  ;;  %v4554_v0 = vmul.f32 %v4460_v38, %v4522_v36  ;;  %v1285_v3 = vmul.f32 %v4464_v41, %v4522_v36  ;;  %v3625_v7 = vpop.eup %3624 }
 0x19e   : > { %6524 = vst [vmem:[#allocation25_spill] sm:$0xff] %v4541_v46  ;;  %v1283_v54 = vmul.f32 %v4464_v41, %v4541_v46  ;;  %v1381_v2 = vadd.f32 %v1350_v40, %v1314_v42  ;;  %v1351_v4 = vmul.f32 %v4471_v47, %v4522_v36  ;;  %v1447_v9 = vrot.slane %v4541_v46, 1 }
 0x19f   : > { %v1449_v11 = vrot.slane %v1227_v53, 1  ;;  %v1021_v12 = vmul.f32 0.5, %v989_v48  ;;  %v3627_v13 = vpop.eup %3626  ;;  %v1455_v18 = vsel %vm1445_vm1, %v6448_v50, %v1454_v51  ;;  %v990_v23 = vadd.f32 1.0, %v3623_v55 }
 0x1a0   : > { %v1315_v6 = vadd.f32 %v1283_v54, %v1247_v60  ;;  %v6447_v32 = vrot.slane %v4541_v46, 2  ;;  %v1764_v60 = vrot.slane %v1227_v53, 2  ;;  %v4569_v40 = vadd.f32 %v4492_v15, %v1381_v2 }
 0x1a1   : > { %v1053_v27 = vmul.f32 %v1021_v12, %v4427_v14  ;;  %v3629_v39 = vpop.eup %3628  ;;  %v1249_v42 = vmul.f32 %v4460_v38, %v4541_v46  ;;  %v1019_v48 = vmul.f32 0.5, %v987_v5  ;;  %v1022_v54 = vmul.f32 0.5, %v990_v23 }
 0x1a2   : > { %v1382_v31 = vadd.f32 %v1351_v4, %v1315_v6  ;;  %6525 = vst [vmem:[#allocation26_spill] sm:$0xff] %v4569_v40  ;;  %v4574_v51 = vmul.f32 %v4481_v62, %v1455_v18  ;;  %v1450_v49 = vsel %vm1445_vm1, %v1447_v9, %v1449_v11  ;;  %v988_v4 = vadd.f32 1.0, %v3625_v7 }
 0x1a3   : > { %v1124_v55 = vrot.slane %v1053_v27, 7  ;;  %v4578_v53 = vsel %vm1445_vm1, %v1446_v59, %v1447_v9  ;;  %v1051_v14 = vmul.f32 %v1019_v48, %v4434_v22  ;;  %v1054_v2 = vmul.f32 %v1022_v54, %v4439_v25  ;;  %v3631_v12 = vpop.eup %3630 }
 0x1a4   : > { %6526 = vst [vmem:[#allocation27_spill] sm:$0xff] %v4578_v53  ;;  %v993_v6 = vadd.f32 1.0, %v3627_v13  ;;  %v1594_v19 = vadd.f32 %v4492_v15, %v1382_v31  ;;  %v4586_v5 = vsel %vm1760_vm2, %v6447_v32, %v1764_v60  ;;  %v1020_v23 = vmul.f32 0.5, %v988_v4 }
 0x1a5   : > { %6527 = vst [vmem:[#allocation28_spill] sm:$0xff] %v4586_v5  ;;  %v991_v11 = vadd.f32 1.0, %v3629_v39  ;;  %v4589_v7 = vmul.f32 %v4494_v1, %v1455_v18  ;;  %v4592_v59 = vmul.f32 %v4496_v16, %v1455_v18  ;;  %v1317_v22 = vadd.f32 %v1285_v3, %v1249_v42 }
 0x1a6   : > { %v1630_v25 = vmul.f32 %v4494_v1, %v1450_v49  ;;  %v1214_v9 = vsel %vm1114_vm0, 0.0, %v1124_v55  ;;  %v1121_v13 = vrot.slane %v1051_v14, 7  ;;  %v1125_v15 = vrot.slane %v1054_v2, 7 }
 0x1a7   : > { %6528 = vst [vmem:[#allocation29_spill] sm:$0xff] %v4592_v59  ;;  %v1052_v31 = vmul.f32 %v1020_v23, %v4449_v30  ;;  %v1563_v60 = vmul.f32 %v4481_v62, %v4578_v53  ;;  %v4600_v27 = vmul.f32 %v4481_v62, %v1450_v49  ;;  %v4604_v39 = vmul.f32 %v4502_v20, %v4586_v5 }
 0x1a8   : > { %v1025_v18 = vmul.f32 0.5, %v993_v6  ;;  %v4606_v3 = vadd.f32 %v1630_v25, %v1594_v19  ;;  %v4609_v42 = vsel %vm1114_vm0, 0.0, %v1121_v13  ;;  %v1023_v48 = vmul.f32 0.5, %v991_v11 }
 0x1a9   : > { %6529 = vst [vmem:[#allocation30_spill] sm:$0xff] %v4604_v39  ;;  %6531 = vst [vmem:[#allocation32_spill] sm:$0xff] %v4609_v42  ;;  %v994_v54 = vadd.f32 1.0, %v3631_v12  ;;  %v4612_v30 = vmul.f32 %v4460_v38, %v1214_v9  ;;  %v1286_v4 = vmul.f32 %v4464_v41, %v4609_v42  ;;  %v1352_v49 = vmul.f32 %v4471_v47, %v4609_v42 }
 0x1aa   : > { %6530 = vst [vmem:[#allocation31_spill] sm:$0xff] %v4606_v3  ;;  %v1126_v14 = vsel %vm1114_vm0, %v1124_v55, %v1125_v15  ;;  %v1288_v2 = vmul.f32 %v4464_v41, %v1214_v9  ;;  %v1354_v19 = vmul.f32 %v4471_v47, %v1214_v9  ;;  %v1230_v6 = vsel %vm1114_vm0, %v1125_v15, 0.0 }
 0x1ab   : > { %v1122_v23 = vrot.slane %v1052_v31, 7  ;;  %v1461_v11 = vrot.slane %v1214_v9, 1  ;;  %v1776_v12 = vrot.slane %v1214_v9, 2  ;;  %v4623_v25 = vmul.f32 %v1025_v18, %v4457_v35 }
 0x1ac   : > { %3632 = vtanh.f32 %v4514_v34  ;;  %v1252_v45 = vmul.f32 %v4460_v38, %v4609_v42  ;;  %v1318_v61 = vadd.f32 %v1286_v4, %v4532_v37  ;;  %v1383_v55 = vadd.f32 %v1352_v49, %v4548_v57 }
 0x1ad   : > { %v1462_v63 = vrot.slane %v1126_v14, 1  ;;  %v1456_v32 = vrot.slane %v4609_v42, 1  ;;  %v1464_v44 = vrot.slane %v1230_v6, 1  ;;  %v4632_v15 = vmul.f32 %v1023_v48, %v4467_v43 }
 0x1ae   : > { %v1026_v9 = vmul.f32 0.5, %v994_v54  ;;  %v4636_v31 = vmul.f32 %v4460_v38, %v1126_v14  ;;  %v1777_v34 = vrot.slane %v1126_v14, 2  ;;  %v4639_v18 = vsel %vm1114_vm0, %v1121_v13, %v1122_v23 }
 0x1af   : > { %6532 = vst [vmem:[#allocation33_spill] sm:$0xff] %v4639_v18  ;;  %v1289_v37 = vmul.f32 %v4464_v41, %v1126_v14  ;;  %v1355_v57 = vmul.f32 %v4471_v47, %v1126_v14  ;;  %v1779_v4 = vrot.slane %v1230_v6, 2  ;;  %v1229_v49 = vsel %vm1114_vm0, %v1122_v23, 0.0 }
 0x1b0   : > { %v1320_v50 = vadd.f32 %v1288_v2, %v1252_v45  ;;  %v4644_v43 = vadd.f32 %v1354_v19, %v1318_v61  ;;  %v4646_v48 = vadd.f32 %v1563_v60, %v1383_v55  ;;  %v4649_v54 = vsel %vm1445_vm1, %v1461_v11, %v1462_v63 }
 0x1b1   : > { %6535 = vst [vmem:[#allocation36_spill] sm:$0xff] %v4649_v54  ;;  %v1465_v35 = vsel %vm1445_vm1, %v1462_v63, %v1464_v44  ;;  %v1287_v13 = vmul.f32 %v4464_v41, %v4639_v18  ;;  %v1353_v24 = vmul.f32 %v4471_v47, %v4639_v18  ;;  %v1457_v14 = vrot.slane %v4639_v18, 1 }
 0x1b2   : > { %6533 = vst [vmem:[#allocation34_spill] sm:$0xff] %v4644_v43  ;;  %6534 = vst [vmem:[#allocation35_spill] sm:$0xff] %v4646_v48  ;;  %v4658_v6 = vsel %vm1760_vm2, %v1776_v12, %v1777_v34  ;;  %v1459_v45 = vrot.slane %v1229_v49, 1  ;;  %v6451_v61 = vrot.slane %v4639_v18, 2  ;;  %v1774_v60 = vrot.slane %v1229_v49, 2 }
 0x1b3   : > { %6536 = vst [vmem:[#allocation37_spill] sm:$0xff] %v4658_v6  ;;  %v1780_v2 = vsel %vm1760_vm2, %v1777_v34, %v1779_v4  ;;  %v1253_v44 = vmul.f32 %v4460_v38, %v4639_v18  ;;  %v1319_v63 = vadd.f32 %v1287_v13, %v4554_v0  ;;  %v1384_v19 = vadd.f32 %v1353_v24, %v1317_v22 }
 0x1b4   : > { %v4666_v23 = vmul.f32 %v4481_v62, %v1465_v35  ;;  %v4669_v11 = vmul.f32 %v4494_v1, %v1465_v35  ;;  %v1130_v12 = vrot.slane %v4623_v25, 7  ;;  %v4674_v49 = vmul.f32 %v4496_v16, %v1465_v35 }
 0x1b5   : > { %v4678_v34 = vmul.f32 %v4502_v20, %v4658_v6  ;;  %v4681_v0 = vsel %vm1445_vm1, %v1456_v32, %v1457_v14  ;;  %v1460_v24 = vsel %vm1445_vm1, %v1457_v14, %v1459_v45  ;;  %v4685_v22 = vmul.f32 %v4502_v20, %v1780_v2 }
 0x1b6   : > { %6537 = vst [vmem:[#allocation38_spill] sm:$0xff] %v4674_v49  ;;  %6538 = vst [vmem:[#allocation39_spill] sm:$0xff] %v4681_v0  ;;  %v4689_v25 = vmul.f32 %v4509_v26, %v4658_v6  ;;  %v1386_v4 = vadd.f32 %v1355_v57, %v1319_v63  ;;  %v1775_v35 = vsel %vm1760_vm2, %v6451_v61, %v1774_v60  ;;  %v1216_v57 = vsel %vm1114_vm0, 0.0, %v1130_v12 }
 0x1b7   : > { %v4695_v13 = vmul.f32 %v4509_v26, %v1780_v2  ;;  %v4698_v32 = vmul.f32 %v4511_v28, %v1780_v2  ;;  %v4700_v55 = vadd.f32 %v1289_v37, %v1253_v44  ;;  %v1596_v14 = vadd.f32 %v4600_v27, %v1384_v19  ;;  %v3384_v2 = vpop.f32.mrf.mxu0 }
 0x1b8   : > { %6539 = vst [vmem:[#allocation40_spill] sm:$0xff] %v4689_v25  ;;  %v4704_v5 = vmul.f32 %v4481_v62, %v1460_v24  ;;  %v6541_v63 = vrot.slane %v4632_v15, 7  ;;  %v1567_v61 = vmul.f32 %v4481_v62, %v4681_v0  ;;  %v1634_v37 = vmul.f32 %v4494_v1, %v1460_v24 }
 0x1b9   : > { %6540 = vst [vmem:[#allocation41_spill] sm:$0xff] %v4698_v32  ;;  %v3633_v45 = vpop.eup %3632  ;;  %v1700_v44 = vmul.f32 %v4496_v16, %v1460_v24  ;;  %v4717_v27 = vmul.f32 %v4502_v20, %v1775_v35  ;;  %v1598_v32 = vadd.f32 %v4574_v51, %v1386_v4  ;;  %v4723_v6 = vmul.f32 %v4509_v26, %v1775_v35 }
 0x1ba   : > { %v4710_v60 = vsel %vm1114_vm0, 0.0, %v6541_v63  ;;  %v4726_v63 = vmul.f32 %v4511_v28, %v1775_v35  ;;  %v1664_v39 = vadd.f32 %v4589_v7, %v1596_v14  ;;  %v4732_v24 = vmul.f32 %v4460_v38, %v1216_v57 }
 0x1bb   : > { %v1290_v19 = vmul.f32 %v4464_v41, %v4710_v60  ;;  %6542 = vst [vmem:[#allocation42_spill] sm:$0xff] %v4723_v6  ;;  %v1356_v25 = vmul.f32 %v4471_v47, %v4710_v60  ;;  %v1292_v42 = vmul.f32 %v4464_v41, %v1216_v57  ;;  %v1058_v18 = vmul.f32 %v1026_v9, %v4476_v52 }
 0x1bc   : > { %6543 = vst [vmem:[#allocation43_spill] sm:$0xff] %v4726_v63  ;;  %v1358_v51 = vmul.f32 %v4471_v47, %v1216_v57  ;;  %v992_v6 = vadd.f32 1.0, %v3633_v45  ;;  %v4740_v35 = vadd.f32 %v4403_v58, %v4528_v33  ;;  %v765_v63 = vpop.f32.mrf.mxu0  ;;  %v933_v7 = vmul.f32 0.5, %v4517_v10 }
 0x1bd   : > { %v1322_v4 = vadd.f32 %v1290_v19, %v4612_v30  ;;  %v1387_v29 = vadd.f32 %v1356_v25, %v1320_v50  ;;  %v1131_v17 = vrot.slane %v1058_v18, 7  ;;  %v863_v14 = vmul.f32 %v3384_v2, %v4401_v56 }
 0x1be   : > { %v1471_v46 = vrot.slane %v1216_v57, 1  ;;  %v1786_v49 = vrot.slane %v1216_v57, 2  ;;  %v1024_v59 = vmul.f32 0.5, %v992_v6  ;;  %v931_v52 = vmul.f32 0.5, %v4740_v35 }
 0x1bf   : > { %v1132_v9 = vsel %vm1114_vm0, %v1130_v12, %v1131_v17  ;;  %v1232_v30 = vsel %vm1114_vm0, %v1131_v17, 0.0  ;;  %v4748_v45 = vadd.f32 %v4403_v58, %v863_v14  ;;  %v861_v33 = vmul.f32 %v4401_v56, %v765_v63 }
 0x1c0   : > { %v4751_v50 = vadd.f32 %v1634_v37, %v1598_v32  ;;  %v4753_v18 = vadd.f32 %v1700_v44, %v1664_v39  ;;  %v1256_v25 = vmul.f32 %v4460_v38, %v4710_v60  ;;  %v1389_v57 = vadd.f32 %v1358_v51, %v1322_v4 }
 0x1c1   : > { %v1599_v6 = vadd.f32 %v1567_v61, %v1387_v29  ;;  %v1472_v2 = vrot.slane %v1132_v9, 1  ;;  %v1474_v19 = vrot.slane %v1232_v30, 1  ;;  %3634 = vtanh.f32 %v933_v7 }
 0x1c2   : > { %6544 = vst [vmem:[#allocation44_spill] sm:$0xff] %v4751_v50  ;;  %6545 = vst [vmem:[#allocation45_spill] sm:$0xff] %v4753_v18  ;;  %v1569_v17 = vmul.f32 %v4481_v62, %v4649_v54  ;;  %v1787_v12 = vrot.slane %v1132_v9, 2  ;;  %v1056_v14 = vmul.f32 %v1024_v59, %v4487_v8  ;;  %3636 = vtanh.f32 %v931_v52  ;;  %v3387_v52 = vpop.f32.mrf.mxu0 }
 0x1c3   : > { %v1635_v32 = vmul.f32 %v4494_v1, %v4649_v54  ;;  %v1789_v39 = vrot.slane %v1232_v30, 2  ;;  %v934_v37 = vmul.f32 0.5, %v4748_v45  ;;  %v4764_v44 = vadd.f32 %v4403_v58, %v861_v33 }
 0x1c4   : > { %v4766_v29 = vadd.f32 %v1292_v42, %v1256_v25  ;;  %v1466_v61 = vrot.slane %v4710_v60, 1  ;;  %v1781_v63 = vrot.slane %v4710_v60, 2  ;;  %v1475_v51 = vsel %vm1445_vm1, %v1472_v2, %v1474_v19 }
 0x1c5   : > { %v1601_v4 = vadd.f32 %v1569_v17, %v1389_v57  ;;  %v4771_v8 = vadd.f32 %v1635_v32, %v1599_v6  ;;  %v4774_v59 = vmul.f32 %v4460_v38, %v1132_v9  ;;  %v1473_v7 = vsel %vm1445_vm1, %v1471_v46, %v1472_v2 }
 0x1c6   : > { %v1293_v30 = vmul.f32 %v4464_v41, %v1132_v9  ;;  %v1359_v42 = vmul.f32 %v4471_v47, %v1132_v9  ;;  %v1788_v33 = vsel %vm1760_vm2, %v1786_v49, %v1787_v12  ;;  %v1128_v25 = vrot.slane %v1056_v14, 7 }
 0x1c7   : > { %6546 = vst [vmem:[#allocation46_spill] sm:$0xff] %v4771_v8  ;;  %v4781_v60 = vmul.f32 %v4481_v62, %v1475_v51  ;;  %v1790_v57 = vsel %vm1760_vm2, %v1787_v12, %v1789_v39  ;;  %3638 = vtanh.f32 %v934_v37  ;;  %v932_v6 = vmul.f32 0.5, %v4764_v44  ;;  %v778_v39 = vpop.f32.mrf.mxu0 }
 0x1c8   : > { %v4786_v19 = vmul.f32 %v4494_v1, %v1475_v51  ;;  %v1705_v46 = vmul.f32 %v4496_v16, %v1473_v7  ;;  %v6547_v2 = vrot.slane %v4632_v15, 7  ;;  %v1231_v49 = vsel %vm1114_vm0, %v1128_v25, 0.0 }
 0x1c9   : > { %v1706_v17 = vmul.f32 %v4496_v16, %v1475_v51  ;;  %v4797_v37 = vmul.f32 %v4502_v20, %v1788_v33  ;;  %v4800_v18 = vmul.f32 %v4502_v20, %v1790_v57  ;;  %v1469_v8 = vrot.slane %v1231_v49, 1 }
 0x1ca   : > { %v1129_v9 = vsel %vm1114_vm0, %v6547_v2, %v1128_v25  ;;  %3640 = vtanh.f32 %v932_v6  ;;  %v4803_v15 = vmul.f32 %v4509_v26, %v1788_v33  ;;  %v4811_v50 = vmul.f32 %v4509_v26, %v1790_v57 }
 0x1cb   : > { %v1291_v14 = vmul.f32 %v4464_v41, %v1129_v9  ;;  %v1357_v12 = vmul.f32 %v4471_v47, %v1129_v9  ;;  %v1467_v32 = vrot.slane %v1129_v9, 1  ;;  %v4814_v3 = vmul.f32 %v4511_v28, %v1788_v33 }
 0x1cc   : > { %v2021_v48 = vmul.f32 %v4511_v28, %v1790_v57  ;;  %v1782_v0 = vrot.slane %v1129_v9, 2  ;;  %v1784_v33 = vrot.slane %v1231_v49, 2 }
 0x1cd   : > { %v1323_v25 = vadd.f32 %v1291_v14, %v4636_v31  ;;  %v1388_v51 = vadd.f32 %v1357_v12, %v4700_v55  ;;  %v4808_v2 = vsel %vm1445_vm1, %v1466_v61, %v1467_v32  ;;  %6548 = vst [vmem:[#allocation47_spill] sm:$0xff] %v4814_v3  ;;  %v1470_v54 = vsel %vm1445_vm1, %v1467_v32, %v1469_v8  ;;  %v3388_v61 = vpop.f32.mrf.mxu0 }
 0x1ce   : > { %v1637_v6 = vmul.f32 %v4494_v1, %v4808_v2  ;;  %v4822_v55 = vmul.f32 %v4481_v62, %v1473_v7  ;;  %v3635_v14 = vpop.eup %3634  ;;  %v1257_v12 = vmul.f32 %v4460_v38, %v1129_v9  ;;  %v866_v3 = vmul.f32 %v3387_v52, %v4401_v56 }
 0x1cf   : > { %v1390_v40 = vadd.f32 %v1359_v42, %v1323_v25  ;;  %v1600_v31 = vadd.f32 %v4704_v5, %v1388_v51  ;;  %v3637_v8 = vpop.eup %3636  ;;  %v1638_v43 = vmul.f32 %v4494_v1, %v1470_v54  ;;  %v1704_v5 = vmul.f32 %v4496_v16, %v1470_v54 }
 0x1d0   : > { %v1669_v57 = vadd.f32 %v1637_v6, %v1601_v4  ;;  %v4831_v25 = vmul.f32 %v4494_v1, %v1473_v7  ;;  %v864_v51 = vmul.f32 %v4401_v56, %v778_v39  ;;  %v867_v9 = vmul.f32 %v3388_v61, %v4401_v56 }
 0x1d1   : > { %v1602_v32 = vadd.f32 %v4666_v23, %v1390_v40  ;;  %v1668_v42 = vadd.f32 %v4669_v11, %v1600_v31  ;;  %v997_v52 = vadd.f32 1.0, %v3635_v14  ;;  %v995_v21 = vadd.f32 1.0, %v3637_v8 }
 0x1d2   : > { %v4835_v36 = vadd.f32 %v1293_v30, %v1257_v12  ;;  %v1783_v40 = vsel %vm1760_vm2, %v1781_v63, %v1782_v0  ;;  %v1785_v23 = vsel %vm1760_vm2, %v1782_v0, %v1784_v33  ;;  %v4840_v11 = vadd.f32 %v4403_v58, %v866_v3  ;;  %v781_v0 = vpop.f32.mrf.mxu0 }
 0x1d3   : > { %v1670_v49 = vadd.f32 %v1638_v43, %v1602_v32  ;;  %v1735_v53 = vadd.f32 %v1704_v5, %v1668_v42  ;;  %v1029_v6 = vmul.f32 0.5, %v997_v52  ;;  %v1027_v39 = vmul.f32 0.5, %v995_v21 }
 0x1d4   : > { %v3639_v31 = vpop.eup %3638  ;;  %v4844_v43 = vmul.f32 %v4481_v62, %v1470_v54  ;;  %v4848_v30 = vmul.f32 %v4496_v16, %v4808_v2  ;;  %v1736_v61 = vadd.f32 %v1705_v46, %v1669_v57  ;;  %v937_v63 = vmul.f32 0.5, %v4840_v11 }
 0x1d5   : > { %v1737_v4 = vadd.f32 %v1706_v17, %v1670_v49  ;;  %v1915_v7 = vadd.f32 %v4717_v27, %v1735_v53  ;;  %v1953_v17 = vmul.f32 %v4509_v26, %v1785_v23  ;;  %v1061_v53 = vmul.f32 %v1029_v6, %v4517_v10 }
 0x1d6   : > { %6549 = vst [vmem:[#allocation48_spill] sm:$0xff] %v4848_v30  ;;  %v4855_v21 = vmul.f32 %v1027_v39, %v4740_v35  ;;  %v4858_v54 = vmul.f32 %v4502_v20, %v1783_v40  ;;  %v4861_v27 = vmul.f32 %v4502_v20, %v1785_v23  ;;  %v998_v14 = vadd.f32 1.0, %v3639_v31  ;;  %v4892_v31 = vld [vmem:[#allocation10] ss:$0 sm:$0xff] }
 0x1d7   : > { %v1917_v3 = vadd.f32 %v4685_v22, %v1737_v4  ;;  %v4864_v46 = vadd.f32 %v4403_v58, %v864_v51  ;;  %v3641_v12 = vpop.eup %3640  ;;  %v1983_v22 = vadd.f32 %v4695_v13, %v1915_v7  ;;  %v865_v10 = vmul.f32 %v4401_v56, %v781_v0  ;;  %v4880_v4 = vld [vmem:[#allocation8] ss:$0 sm:$0xff] }
 0x1d8   : > { %v6466_v8 = vrot.slane %v4855_v21, 7  ;;  %v2019_v35 = vmul.f32 %v4511_v28, %v1785_v23  ;;  %v1136_v32 = vrot.slane %v1061_v53, 7  ;;  %v1030_v42 = vmul.f32 0.5, %v998_v14 }
 0x1d9   : > { %v1985_v33 = vadd.f32 %v1953_v17, %v1917_v3  ;;  %3642 = vtanh.f32 %v937_v63  ;;  %v1916_v5 = vadd.f32 %v4678_v34, %v1736_v61  ;;  %v996_v49 = vadd.f32 1.0, %v3641_v12 }
 0x1da   : > { %v4874_v51 = vsel %vm1114_vm0, 0.0, %v6466_v8  ;;  %v1952_v13 = vmul.f32 %v4509_v26, %v1783_v40  ;;  %v4878_v52 = vmul.f32 %v4511_v28, %v1783_v40  ;;  %v935_v23 = vmul.f32 0.5, %v4864_v46 }
 0x1db   : > { %v2052_v57 = vadd.f32 %v2021_v48, %v1985_v33  ;;  %v4884_v7 = vadd.f32 %v4403_v58, %v867_v9  ;;  %v2050_v34 = vadd.f32 %v2019_v35, %v1983_v22  ;;  %v1294_v6 = vmul.f32 %v4464_v41, %v4874_v51 }
 0x1dc   : > { %6550 = vst [vmem:[#allocation49_spill] sm:$0xff] %v4878_v52  ;;  %v4890_v39 = vadd.f32 %v4403_v58, %v865_v10  ;;  %v1218_v40 = vsel %vm1114_vm0, 0.0, %v1136_v32  ;;  %v1360_v61 = vmul.f32 %v4471_v47, %v4874_v51  ;;  %v1571_v9 = vmul.f32 %v4481_v62, %v4808_v2 }
 0x1dd   : > { %v2091_v48 = vmul.f32 %v4880_v4, %v2052_v57  ;;  %v1062_v63 = vmul.f32 %v1030_v42, %v4748_v45  ;;  %v4900_v0 = vadd.f32 %v1952_v13, %v1916_v5  ;;  %v1326_v17 = vadd.f32 %v1294_v6, %v4732_v24  ;;  %v3391_v5 = vpop.f32.mrf.mxu0 }
 0x1de   : > { %v1028_v53 = vmul.f32 0.5, %v996_v49  ;;  %v1391_v14 = vadd.f32 %v1360_v61, %v4766_v29  ;;  %3644 = vtanh.f32 %v935_v23  ;;  %v938_v22 = vmul.f32 0.5, %v4884_v7 }
 0x1df   : > { %6551 = vst [vmem:[#allocation50_spill] sm:$0xff] %v4900_v0  ;;  %v4903_v3 = vadd.f32 %v4892_v31, %v2091_v48  ;;  %v1137_v12 = vrot.slane %v1062_v63, 7  ;;  %v4909_v33 = vmul.f32 %v4880_v4, %v2050_v34  ;;  %v1362_v2 = vmul.f32 %v4471_v47, %v1218_v40 }
 0x1e0   : > { %v1060_v45 = vmul.f32 %v1028_v53, %v4764_v44  ;;  %v936_v10 = vmul.f32 0.5, %v4890_v39  ;;  %v1260_v24 = vmul.f32 %v4460_v38, %v4874_v51  ;;  %v4920_v57 = vmul.f32 %v4460_v38, %v1218_v40 }
 0x1e1   : > { %6552 = vst [vmem:[#allocation51_spill] sm:$0xff] %v4903_v3  ;;  %6553 = vst [vmem:[#allocation52_spill] sm:$0xff] %v4909_v33  ;;  %v2162_v35 = vmul.f32 0.5, %v4903_v3  ;;  %v1138_v29 = vsel %vm1114_vm0, %v1136_v32, %v1137_v12  ;;  %v1234_v42 = vsel %vm1114_vm0, %v1137_v12, 0.0  ;;  %v1296_v49 = vmul.f32 %v4464_v41, %v1218_v40 }
 0x1e2   : > { %v1481_v13 = vrot.slane %v1218_v40, 1  ;;  %v1393_v23 = vadd.f32 %v1362_v2, %v1326_v17  ;;  %v1603_v44 = vadd.f32 %v1571_v9, %v1391_v14  ;;  %v1482_v34 = vrot.slane %v1138_v29, 1  ;;  %v794_v14 = vpop.f32.mrf.mxu0 }
 0x1e3   : > { %v1484_v48 = vrot.slane %v1234_v42, 1  ;;  %3646 = vtanh.f32 %v938_v22  ;;  %v1796_v6 = vrot.slane %v1218_v40, 2  ;;  %v1134_v61 = vrot.slane %v1060_v45, 7 }
 0x1e4   : > { %3648 = vtanh.f32 %v936_v10  ;;  %v870_v63 = vmul.f32 %v3391_v5, %v4401_v56  ;;  %v4924_v32 = vadd.f32 %v1296_v49, %v1260_v24  ;;  %v1476_v53 = vrot.slane %v4874_v51, 1 }
 0x1e5   : > { %3650 = vtanh.f32 %v2162_v35  ;;  %v1605_v3 = vadd.f32 %v4822_v55, %v1393_v23  ;;  %v4930_v9 = vmul.f32 %v4460_v38, %v1138_v29  ;;  %v1485_v17 = vsel %vm1445_vm1, %v1482_v34, %v1484_v48 }
 0x1e6   : > { %v3643_v8 = vpop.eup %3642  ;;  %v1797_v40 = vrot.slane %v1138_v29, 2  ;;  %v1671_v22 = vadd.f32 %v4831_v25, %v1603_v44  ;;  %v1297_v2 = vmul.f32 %v4464_v41, %v1138_v29  ;;  %v6554_v45 = vrot.slane %v4855_v21, 7 }
 0x1e7   : > { %v1233_v35 = vsel %vm1114_vm0, %v1134_v61, 0.0  ;;  %v1363_v24 = vmul.f32 %v4471_v47, %v1138_v29  ;;  %v4941_v55 = vsel %vm1445_vm1, %v1481_v13, %v1482_v34  ;;  %v1799_v5 = vrot.slane %v1234_v42, 2 }
 0x1e8   : > { %v1135_v10 = vsel %vm1114_vm0, %v6554_v45, %v1134_v61  ;;  %v4944_v49 = vadd.f32 %v4403_v58, %v870_v63  ;;  %v4947_v23 = vmul.f32 %v4481_v62, %v1485_v17  ;;  %v1001_v44 = vadd.f32 1.0, %v3643_v8 }
 0x1e9   : > { %v1295_v25 = vmul.f32 %v4464_v41, %v1135_v10  ;;  %v4951_v21 = vmul.f32 %v4401_v56, %v794_v14  ;;  %v1798_v48 = vsel %vm1760_vm2, %v1796_v6, %v1797_v40  ;;  %v1361_v29 = vmul.f32 %v4471_v47, %v1135_v10 }
 0x1ea   : > { %v1477_v61 = vrot.slane %v1135_v10, 1  ;;  %v1479_v13 = vrot.slane %v1233_v35, 1  ;;  %v4956_v42 = vmul.f32 %v4494_v1, %v1485_v17  ;;  %v1709_v58 = vmul.f32 %v4496_v16, %v4941_v55 }
 0x1eb   : > { %v1710_v34 = vmul.f32 %v4496_v16, %v1485_v17  ;;  %v1327_v63 = vadd.f32 %v1295_v25, %v4774_v59  ;;  %v3645_v8 = vpop.eup %3644  ;;  %v1800_v56 = vsel %vm1760_vm2, %v1797_v40, %v1799_v5  ;;  %v1392_v14 = vadd.f32 %v1361_v29, %v4835_v36 }
 0x1ec   : > { %v1478_v6 = vsel %vm1445_vm1, %v1476_v53, %v1477_v61  ;;  %v1480_v45 = vsel %vm1445_vm1, %v1477_v61, %v1479_v13  ;;  %v4967_v12 = vmul.f32 %v4502_v20, %v1798_v48  ;;  %v1792_v52 = vrot.slane %v1135_v10, 2 }
 0x1ed   : > { %v1394_v33 = vadd.f32 %v1363_v24, %v1327_v63  ;;  %v1641_v0 = vmul.f32 %v4494_v1, %v1478_v6  ;;  %v1604_v17 = vadd.f32 %v4844_v43, %v1392_v14  ;;  %v1707_v59 = vmul.f32 %v4496_v16, %v1478_v6 }
 0x1ee   : > { %v1794_v25 = vrot.slane %v1233_v35, 2  ;;  %v1033_v30 = vmul.f32 0.5, %v1001_v44  ;;  %v4973_v40 = vmul.f32 %v4502_v20, %v1800_v56  ;;  %v1642_v53 = vmul.f32 %v4494_v1, %v1480_v45 }
 0x1ef   : > { %v1606_v36 = vadd.f32 %v4781_v60, %v1394_v33  ;;  %v1673_v5 = vadd.f32 %v1641_v0, %v1605_v3  ;;  %v1261_v24 = vmul.f32 %v4460_v38, %v1135_v10  ;;  %v1672_v61 = vadd.f32 %v4786_v19, %v1604_v17 }
 0x1f0   : > { %6555 = vst [vmem:[#allocation53_spill] sm:$0xff] %v4973_v40  ;;  %v3647_v29 = vpop.eup %3646  ;;  %v1708_v13 = vmul.f32 %v4496_v16, %v1480_v45  ;;  %v1738_v43 = vadd.f32 %v1707_v59, %v1671_v22  ;;  %v4981_v35 = vmul.f32 %v4509_v26, %v1798_v48  ;;  %v4984_v44 = vmul.f32 %v4509_v26, %v1800_v56 }
 0x1f1   : > { %v3649_v63 = vpop.eup %3648  ;;  %v1674_v14 = vadd.f32 %v1642_v53, %v1606_v36  ;;  %v1740_v60 = vadd.f32 %v1709_v58, %v1673_v5  ;;  %v1795_v3 = vsel %vm1760_vm2, %v1792_v52, %v1794_v25  ;;  %v1065_v10 = vmul.f32 %v1033_v30, %v4840_v11 }
 0x1f2   : > { %6556 = vst [vmem:[#allocation54_spill] sm:$0xff] %v4981_v35  ;;  %v4986_v33 = vpop.eup %3650  ;;  %v1739_v0 = vadd.f32 %v1708_v13, %v1672_v61  ;;  %v999_v19 = vadd.f32 1.0, %v3645_v8  ;;  %v2024_v17 = vmul.f32 %v4511_v28, %v1798_v48  ;;  %v2025_v22 = vmul.f32 %v4511_v28, %v1800_v56 }
 0x1f3   : > { %6557 = vst [vmem:[#allocation55_spill] sm:$0xff] %v4986_v33  ;;  %v1741_v59 = vadd.f32 %v1710_v34, %v1674_v14  ;;  %v1918_v40 = vadd.f32 %v4858_v54, %v1738_v43  ;;  %v4993_v35 = vadd.f32 %v1297_v2, %v1261_v24  ;;  %v6558_v36 = vrot.slane %v4874_v51, 2 }
 0x1f4   : > { %v1919_v53 = vadd.f32 %v4861_v27, %v1739_v0  ;;  %v1031_v5 = vmul.f32 0.5, %v999_v19  ;;  %v1920_v25 = vadd.f32 %v4797_v37, %v1740_v60  ;;  %v1957_v30 = vmul.f32 %v4509_v26, %v1795_v3 }
 0x1f5   : > { %v1793_v58 = vsel %vm1760_vm2, %v6558_v36, %v1792_v52  ;;  %v1921_v11 = vadd.f32 %v4800_v18, %v1741_v59  ;;  %v2023_v48 = vmul.f32 %v4511_v28, %v1795_v3  ;;  %v1142_v54 = vrot.slane %v1065_v10, 7 }
 0x1f6   : > { %v1987_v34 = vadd.f32 %v4811_v50, %v1919_v53  ;;  %v5005_v2 = vmul.f32 %v1031_v5, %v4864_v46  ;;  %v1002_v51 = vadd.f32 1.0, %v3647_v29  ;;  %v5008_v52 = vmul.f32 %v4481_v62, %v1480_v45  ;;  %v5044_v53 = vld [vmem:[#allocation7] ss:$0 sm:$0xff] }
 0x1f7   : > { %v1956_v27 = vmul.f32 %v4509_v26, %v1793_v58  ;;  %v1986_v37 = vadd.f32 %v4803_v15, %v1918_v40  ;;  %v1989_v8 = vadd.f32 %v1957_v30, %v1921_v11  ;;  %v5013_v18 = vmul.f32 %v4502_v20, %v1793_v58 }
 0x1f8   : > { %v5016_v56 = vmul.f32 %v4502_v20, %v1795_v3  ;;  %v2022_v50 = vmul.f32 %v4511_v28, %v1793_v58  ;;  %v2054_v24 = vadd.f32 %v2023_v48, %v1987_v34  ;;  %v1139_v29 = vrot.slane %v5005_v2, 7 }
 0x1f9   : > { %v1988_v46 = vadd.f32 %v1956_v27, %v1920_v25  ;;  %v2056_v61 = vadd.f32 %v2025_v22, %v1989_v8  ;;  %v1575_v45 = vmul.f32 %v4481_v62, %v1478_v6  ;;  %v1220_v15 = vsel %vm1114_vm0, 0.0, %v1142_v54 }
 0x1fa   : > { %v2093_v13 = vmul.f32 %v4880_v4, %v2054_v24  ;;  %v1577_v40 = vmul.f32 %v4481_v62, %v4941_v55  ;;  %v1034_v43 = vmul.f32 0.5, %v1002_v51  ;;  %v2053_v14 = vadd.f32 %v2022_v50, %v1986_v37  ;;  %v3392_v50 = vpop.f32.mrf.mxu0 }
 0x1fb   : > { %v2095_v60 = vmul.f32 %v4880_v4, %v2056_v61  ;;  %v5029_v0 = vsel %vm1114_vm0, 0.0, %v1139_v29  ;;  %v1000_v3 = vadd.f32 1.0, %v3649_v63  ;;  %v1643_v22 = vmul.f32 %v4494_v1, %v4941_v55 }
 0x1fc   : > { %v5032_v10 = vadd.f32 %v4892_v31, %v2093_v13  ;;  %v1298_v6 = vmul.f32 %v4464_v41, %v5029_v0  ;;  %v1364_v19 = vmul.f32 %v4471_v47, %v5029_v0  ;;  %v2055_v59 = vadd.f32 %v2024_v17, %v1988_v46 }
 0x1fd   : > { %v5041_v36 = vmul.f32 %v4460_v38, %v1220_v15  ;;  %v1066_v58 = vmul.f32 %v1034_v43, %v4884_v7  ;;  %v5048_v63 = vadd.f32 %v5044_v53, %v4951_v21  ;;  %v5051_v5 = vadd.f32 %v4892_v31, %v2095_v60 }
 0x1fe   : > { %6559 = vst [vmem:[#allocation56_spill] sm:$0xff] %v5032_v10  ;;  %v1300_v25 = vmul.f32 %v4464_v41, %v1220_v15  ;;  %v1330_v11 = vadd.f32 %v1298_v6, %v4920_v57  ;;  %v1395_v55 = vadd.f32 %v1364_v19, %v4924_v32  ;;  %v5057_v17 = vmul.f32 %v4880_v4, %v2053_v14 }
 0x1ff   : > { %6560 = vst [vmem:[#allocation57_spill] sm:$0xff] %v5051_v5  ;;  %v1143_v30 = vrot.slane %v1066_v58, 7  ;;  %v1032_v7 = vmul.f32 0.5, %v1000_v3  ;;  %v941_v48 = vmul.f32 0.5, %v4944_v49  ;;  %v2164_v34 = vmul.f32 0.5, %v5032_v10 }
 0x200   : > { %6561 = vst [vmem:[#allocation58_spill] sm:$0xff] %v5057_v17  ;;  %v1366_v21 = vmul.f32 %v4471_v47, %v1220_v15  ;;  %v1491_v51 = vrot.slane %v1220_v15, 1  ;;  %v1264_v27 = vmul.f32 %v4460_v38, %v5029_v0  ;;  %v939_v8 = vmul.f32 0.5, %v5048_v63 }
 0x201   : > { %v1144_v37 = vsel %vm1114_vm0, %v1142_v54, %v1143_v30  ;;  %v1236_v57 = vsel %vm1114_vm0, %v1143_v30, 0.0  ;;  %v1064_v32 = vmul.f32 %v1032_v7, %v4890_v39  ;;  %v5069_v24 = vmul.f32 %v4880_v4, %v2055_v59  ;;  %v5075_v39 = vld [vmem:[%s6425_s2] ss:$0 sm:$0xff] }
 0x202   : > { %v2166_v46 = vmul.f32 0.5, %v5051_v5  ;;  %v1397_v61 = vadd.f32 %v1366_v21, %v1330_v11  ;;  %v1607_v13 = vadd.f32 %v1575_v45, %v1395_v55  ;;  %v1806_v43 = vrot.slane %v1220_v15, 2  ;;  %v797_v55 = vpop.f32.mrf.mxu0 }
 0x203   : > { %6562 = vst [vmem:[#allocation59_spill] sm:$0xff] %v5069_v24  ;;  %v1492_v14 = vrot.slane %v1144_v37, 1  ;;  %v1494_v60 = vrot.slane %v1236_v57, 1  ;;  %3652 = vtanh.f32 %v941_v48  ;;  %v1807_v54 = vrot.slane %v1144_v37, 2 }
 0x204   : > { %3654 = vtanh.f32 %v2164_v34  ;;  %v1140_v3 = vrot.slane %v1064_v32, 7  ;;  %v871_v6 = vmul.f32 %v5075_v39, %v3392_v50  ;;  %v5078_v19 = vadd.f32 %v1300_v25, %v1264_v27  ;;  %v5109_v50 = vpop.f32.mrf.mxu0 }
 0x205   : > { %v1486_v59 = vrot.slane %v5029_v0, 1  ;;  %v1801_v45 = vrot.slane %v5029_v0, 2  ;;  %3656 = vtanh.f32 %v939_v8  ;;  %v1609_v15 = vadd.f32 %v1577_v40, %v1397_v61 }
 0x206   : > { %3658 = vtanh.f32 %v2166_v46  ;;  %v1675_v58 = vadd.f32 %v1643_v22, %v1607_v13  ;;  %v5083_v11 = vmul.f32 %v4460_v38, %v1144_v37  ;;  %v5086_v30 = vmul.f32 %v4464_v41, %v1144_v37 }
 0x207   : > { %v1367_v7 = vmul.f32 %v4471_v47, %v1144_v37  ;;  %v1495_v25 = vsel %vm1445_vm1, %v1492_v14, %v1494_v60  ;;  %v1809_v48 = vrot.slane %v1236_v57, 2  ;;  %v5091_v34 = vsel %vm1445_vm1, %v1491_v51, %v1492_v14 }
 0x208   : > { %v1808_v0 = vsel %vm1760_vm2, %v1806_v43, %v1807_v54  ;;  %v1141_v40 = vsel %vm1114_vm0, %v1139_v29, %v1140_v3  ;;  %v5098_v22 = vadd.f32 %v5044_v53, %v871_v6  ;;  %v1235_v21 = vsel %vm1114_vm0, %v1140_v3, 0.0 }
 0x209   : > { %v1299_v27 = vmul.f32 %v4464_v41, %v1141_v40  ;;  %v1365_v37 = vmul.f32 %v4471_v47, %v1141_v40  ;;  %v5104_v57 = vmul.f32 %v5075_v39, %v797_v55  ;;  %v5107_v51 = vmul.f32 %v4481_v62, %v1495_v25 }
 0x20a   : > { %v1487_v32 = vrot.slane %v1141_v40, 1  ;;  %v1489_v8 = vrot.slane %v1235_v21, 1  ;;  %v1802_v2 = vrot.slane %v1141_v40, 2  ;;  %v5112_v29 = vmul.f32 %v4494_v1, %v1495_v25 }
 0x20b   : > { %v1713_v46 = vmul.f32 %v4496_v16, %v5091_v34  ;;  %v1331_v61 = vadd.f32 %v1299_v27, %v4930_v9  ;;  %v1396_v13 = vadd.f32 %v1365_v37, %v4993_v35  ;;  %v1714_v43 = vmul.f32 %v4496_v16, %v1495_v25 }
 0x20c   : > { %v5120_v14 = vsel %vm1445_vm1, %v1486_v59, %v1487_v32  ;;  %v5123_v60 = vsel %vm1445_vm1, %v1487_v32, %v1489_v8  ;;  %v1804_v3 = vrot.slane %v1235_v21, 2  ;;  %v1810_v6 = vsel %vm1760_vm2, %v1807_v54, %v1809_v48  ;;  %v5139_v21 = vpop.f32.mrf.mxu0 }
 0x20d   : > { %v1398_v55 = vadd.f32 %v1367_v7, %v1331_v61  ;;  %v1608_v5 = vadd.f32 %v5008_v52, %v1396_v13  ;;  %v1645_v10 = vmul.f32 %v4494_v1, %v5120_v14  ;;  %v5130_v9 = vmul.f32 %v4502_v20, %v1808_v0 }
 0x20e   : > { %v1646_v35 = vmul.f32 %v4494_v1, %v5123_v60  ;;  %v1711_v59 = vmul.f32 %v4496_v16, %v5120_v14  ;;  %v5137_v25 = vsel %vm1760_vm2, %v1801_v45, %v1802_v2  ;;  %v1712_v48 = vmul.f32 %v4496_v16, %v5123_v60 }
 0x20f   : > { %v1610_v54 = vadd.f32 %v4947_v23, %v1398_v55  ;;  %v1676_v52 = vadd.f32 %v4956_v42, %v1608_v5  ;;  %v1677_v7 = vadd.f32 %v1645_v10, %v1609_v15  ;;  %v5146_v37 = vmul.f32 %v4509_v26, %v1808_v0 }
 0x210   : > { %v3653_v27 = vpop.eup %3652  ;;  %v2028_v32 = vmul.f32 %v4511_v28, %v1808_v0  ;;  %v1742_v8 = vadd.f32 %v1711_v59, %v1675_v58  ;;  %v1805_v45 = vsel %vm1760_vm2, %v1802_v2, %v1804_v3  ;;  %v5153_v13 = vmul.f32 %v4502_v20, %v1810_v6  ;;  %v5162_v0 = vpop.f32.mrf.mxu0 }
 0x211   : > { %v5150_v61 = vpop.eup %3654  ;;  %v1678_v23 = vadd.f32 %v1646_v35, %v1610_v54  ;;  %v1743_v42 = vadd.f32 %v1712_v48, %v1676_v52  ;;  %v1744_v10 = vadd.f32 %v1713_v46, %v1677_v7  ;;  %v5156_v15 = vmul.f32 %v4509_v26, %v1810_v6  ;;  %v6565_v54 = vld [vmem:[#allocation54_spill] sm:$0xff]  ;;  %v6566_v48 = vld [vmem:[#allocation53_spill] sm:$0xff] }
 0x212   : > { %6563 = vst [vmem:[#allocation60_spill] sm:$0xff] %v5150_v61  ;;  %v3657_v5 = vpop.eup %3656  ;;  %v1265_v55 = vmul.f32 %v4460_v38, %v1141_v40  ;;  %v1922_v33 = vadd.f32 %v5013_v18, %v1742_v8  ;;  %v1960_v58 = vmul.f32 %v4509_v26, %v5137_v25  ;;  %v1961_v59 = vmul.f32 %v4509_v26, %v1805_v45 }
 0x213   : > { %v5164_v2 = vpop.eup %3658  ;;  %v1745_v3 = vadd.f32 %v1714_v43, %v1678_v23  ;;  %v1923_v35 = vadd.f32 %v5016_v56, %v1743_v42  ;;  %v1924_v46 = vadd.f32 %v4967_v12, %v1744_v10  ;;  %v2026_v40 = vmul.f32 %v4511_v28, %v5137_v25 }
 0x214   : > { %6564 = vst [vmem:[#allocation61_spill] sm:$0xff] %v5164_v2  ;;  %v1990_v52 = vadd.f32 %v6565_v54, %v1922_v33  ;;  %v2027_v18 = vmul.f32 %v4511_v28, %v1805_v45  ;;  %v1005_v7 = vadd.f32 1.0, %v3653_v27  ;;  %v1003_v43 = vadd.f32 1.0, %v3657_v5  ;;  %v813_v33 = vpop.f32.mrf.mxu0 }
 0x215   : > { %v1925_v8 = vadd.f32 %v6566_v48, %v1745_v3  ;;  %v1991_v61 = vadd.f32 %v4984_v44, %v1923_v35  ;;  %v1992_v2 = vadd.f32 %v1960_v58, %v1924_v46  ;;  %v2029_v56 = vmul.f32 %v4511_v28, %v1810_v6 }
 0x216   : > { %v5177_v12 = vadd.f32 %v5086_v30, %v1265_v55  ;;  %v2057_v23 = vadd.f32 %v2026_v40, %v1990_v52  ;;  %v1037_v42 = vmul.f32 0.5, %v1005_v7  ;;  %v1035_v17 = vmul.f32 0.5, %v1003_v43 }
 0x217   : > { %v1993_v10 = vadd.f32 %v1961_v59, %v1925_v8  ;;  %v2058_v54 = vadd.f32 %v2027_v18, %v1991_v61  ;;  %v2059_v24 = vadd.f32 %v2028_v32, %v1992_v2  ;;  %v942_v44 = vmul.f32 0.5, %v5098_v22  ;;  %v3399_v2 = vpop.f32.mrf.mxu0 }
 0x218   : > { %v2096_v27 = vmul.f32 %v4880_v4, %v2057_v23  ;;  %v5181_v3 = vmul.f32 %v1037_v42, %v4944_v49  ;;  %v5186_v6 = vadd.f32 %v5044_v53, %v5104_v57  ;;  %v5191_v61 = vmul.f32 %v1035_v17, %v5048_v63 }
 0x219   : > { %v2060_v30 = vadd.f32 %v2029_v56, %v1993_v10  ;;  %v2097_v5 = vmul.f32 %v4880_v4, %v2058_v54  ;;  %v2098_v55 = vmul.f32 %v4880_v4, %v2059_v24  ;;  %3660 = vtanh.f32 %v942_v44  ;;  %v826_v43 = vpop.f32.mrf.mxu0 }
 0x21a   : > { %v5194_v32 = vadd.f32 %v4892_v31, %v2096_v27  ;;  %v6471_v49 = vrot.slane %v5181_v3, 7  ;;  %v940_v58 = vmul.f32 0.5, %v5186_v6  ;;  %v6470_v63 = vrot.slane %v5191_v61, 7 }
 0x21b   : > { %v2099_v57 = vmul.f32 %v4880_v4, %v2060_v30  ;;  %v5200_v35 = vadd.f32 %v4892_v31, %v2097_v5  ;;  %v5203_v46 = vadd.f32 %v4892_v31, %v2098_v55  ;;  %v5208_v17 = vmul.f32 %v4481_v62, %v5123_v60  ;;  %v3400_v5 = vpop.f32.mrf.mxu0 }
 0x21c   : > { %v2167_v24 = vmul.f32 0.5, %v5194_v32  ;;  %v1581_v59 = vmul.f32 %v4481_v62, %v5091_v34  ;;  %3662 = vtanh.f32 %v940_v58  ;;  %v874_v7 = vmul.f32 %v5075_v39, %v5109_v50 }
 0x21d   : > { %v5214_v52 = vadd.f32 %v4892_v31, %v2099_v57  ;;  %v2168_v40 = vmul.f32 0.5, %v5200_v35  ;;  %v2169_v18 = vmul.f32 0.5, %v5203_v46  ;;  %v5222_v60 = vmul.f32 %v4502_v20, %v5137_v25 }
 0x21e   : > { %v5225_v48 = vmul.f32 %v4502_v20, %v1805_v45  ;;  %3664 = vtanh.f32 %v2167_v24  ;;  %v5230_v8 = vsel %vm1114_vm0, 0.0, %v6471_v49  ;;  %v5236_v50 = vsel %vm1114_vm0, 0.0, %v6470_v63 }
 0x21f   : > { %v2170_v56 = vmul.f32 0.5, %v5214_v52  ;;  %3666 = vtanh.f32 %v2168_v40  ;;  %v1579_v25 = vmul.f32 %v4481_v62, %v5120_v14  ;;  %v1302_v45 = vmul.f32 %v4464_v41, %v5236_v50 }
 0x220   : > { %3668 = vtanh.f32 %v2169_v18  ;;  %v1368_v23 = vmul.f32 %v4471_v47, %v5236_v50  ;;  %v1647_v42 = vmul.f32 %v4494_v1, %v5091_v34  ;;  %v5248_v10 = vmul.f32 %v4460_v38, %v5230_v8 }
 0x221   : > { %3670 = vtanh.f32 %v2170_v56  ;;  %v1304_v54 = vmul.f32 %v4464_v41, %v5230_v8  ;;  %v5253_v14 = vadd.f32 %v5044_v53, %v874_v7  ;;  %v1370_v27 = vmul.f32 %v4471_v47, %v5230_v8 }
 0x222   : > { %v1334_v44 = vadd.f32 %v1302_v45, %v5041_v36  ;;  %v1399_v30 = vadd.f32 %v1368_v23, %v5078_v19  ;;  %v872_v34 = vmul.f32 %v5075_v39, %v5139_v21  ;;  %v875_v58 = vmul.f32 %v5075_v39, %v5162_v0 }
 0x223   : > { %v945_v55 = vmul.f32 0.5, %v5253_v14  ;;  %v873_v57 = vmul.f32 %v5075_v39, %v813_v33  ;;  %v878_v24 = vmul.f32 %v5075_v39, %v3399_v2  ;;  %v1268_v40 = vmul.f32 %v4460_v38, %v5236_v50 }
 0x224   : > { %v1401_v18 = vadd.f32 %v1370_v27, %v1334_v44  ;;  %v5269_v36 = vadd.f32 %v5044_v53, %v872_v34  ;;  %v876_v19 = vmul.f32 %v5075_v39, %v826_v43  ;;  %v1611_v21 = vadd.f32 %v1579_v25, %v1399_v30  ;;  %v829_v27 = vpop.f32.mrf.mxu0 }
 0x225   : > { %v5273_v7 = vadd.f32 %v5044_v53, %v875_v58  ;;  %v5276_v56 = vadd.f32 %v5044_v53, %v873_v57  ;;  %v5279_v0 = vadd.f32 %v5044_v53, %v878_v24  ;;  %3672 = vtanh.f32 %v945_v55 }
 0x226   : > { %v943_v23 = vmul.f32 0.5, %v5269_v36  ;;  %v3661_v43 = vpop.eup %3660  ;;  %v5288_v30 = vadd.f32 %v5044_v53, %v876_v19  ;;  %v5290_v34 = vadd.f32 %v1304_v54, %v1268_v40  ;;  %v5292_v58 = vadd.f32 %v1581_v59, %v1401_v18 }
 0x227   : > { %v946_v44 = vmul.f32 0.5, %v5273_v7  ;;  %v1006_v57 = vadd.f32 1.0, %v3661_v43  ;;  %v879_v24 = vmul.f32 %v5075_v39, %v3400_v5  ;;  %v5295_v63 = vadd.f32 %v1647_v42, %v1611_v21 }
 0x228   : > { %6567 = vst [vmem:[#allocation54_spill] sm:$0xff] %v5288_v30  ;;  %v944_v2 = vmul.f32 0.5, %v5276_v56  ;;  %v949_v25 = vmul.f32 0.5, %v5279_v0  ;;  %v877_v55 = vmul.f32 %v5075_v39, %v829_v27  ;;  %3674 = vtanh.f32 %v943_v23 }
 0x229   : > { %v3663_v45 = vpop.eup %3662  ;;  %v1038_v33 = vmul.f32 0.5, %v1006_v57  ;;  %v5301_v54 = vadd.f32 %v5044_v53, %v879_v24  ;;  %3676 = vtanh.f32 %v946_v44  ;;  %v947_v40 = vmul.f32 0.5, %v5288_v30  ;;  %v6573_v44 = vld [vmem:[#allocation23_spill] sm:$0xff]  ;;  %v6575_v24 = vld [vmem:[#allocation22_spill] sm:$0xff] }
 0x22a   : > { %v1004_v49 = vadd.f32 1.0, %v3663_v45  ;;  %v5305_v5 = vmul.f32 0.0, %v4471_v47  ;;  %v5308_v42 = vmul.f32 0.0, %v4496_v16  ;;  %v5312_v45 = vmul.f32 0.0, %v4511_v28 }
 0x22b   : > { %6568 = vst [vmem:[#allocation53_spill] sm:$0xff] %v5301_v54  ;;  %v3665_v59 = vpop.eup %3664  ;;  %v1070_v39 = vmul.f32 %v1038_v33, %v5098_v22  ;;  %3678 = vtanh.f32 %v944_v2  ;;  %v5315_v43 = vadd.f32 %v5044_v53, %v877_v55  ;;  %v6574_v57 = vrot.slane %v6573_v44, 1 }
 0x22c   : > { %6569 = vst [vmem:[#allocation62_spill] sm:$0xff] %v5305_v5  ;;  %6570 = vst [vmem:[#allocation63_spill] sm:$0xff] %v5308_v42  ;;  %v3667_v18 = vpop.eup %3666  ;;  %v2231_v19 = vadd.f32 1.0, %v3665_v59  ;;  %v1036_v21 = vmul.f32 0.5, %v1004_v49  ;;  %v6576_v5 = vrot.slane %v6575_v24, 1  ;;  %3680 = vtanh.f32 %v949_v25 }
 0x22d   : > { %6571 = vst [vmem:[#allocation64_spill] sm:$0xff] %v5312_v45  ;;  %v3669_v23 = vpop.eup %3668  ;;  %v2232_v27 = vadd.f32 1.0, %v3667_v18  ;;  %6572 = vst [vmem:[#allocation65_spill] sm:$0xff] %v5315_v43  ;;  %v1149_v22 = vrot.slane %v1070_v39, 7  ;;  %v950_v49 = vmul.f32 0.5, %v5301_v54  ;;  %v6578_v18 = vld [vmem:[#allocation27_spill] sm:$0xff]  ;;  %3682 = vtanh.f32 %v947_v40 }
 0x22e   : > { %v5322_v42 = vsel %vm1445_vm1, %v6576_v5, %v6574_v57  ;;  %v3671_v59 = vpop.eup %3670  ;;  %v2233_v30 = vadd.f32 1.0, %v3669_v23  ;;  %v2263_v45 = vmul.f32 0.5, %v2231_v19  ;;  %v1068_v2 = vmul.f32 %v1036_v21, %v5186_v6 }
 0x22f   : > { %6577 = vst [vmem:[#allocation66_spill] sm:$0xff] %v5322_v42  ;;  %v2234_v33 = vadd.f32 1.0, %v3671_v59  ;;  %v5328_v53 = vmul.f32 %v4494_v1, %v6578_v18  ;;  %v2264_v55 = vmul.f32 0.5, %v2232_v27  ;;  %v6580_v24 = vrot.slane %v5181_v3, 7  ;;  %v6581_v59 = vld [vmem:[#allocation34_spill] sm:$0xff] }
 0x230   : > { %v1238_v57 = vsel %vm1114_vm0, %v1149_v22, 0.0  ;;  %v1565_v25 = vmul.f32 %v4481_v62, %v5322_v42  ;;  %v2265_v39 = vmul.f32 0.5, %v2233_v30  ;;  %v948_v19 = vmul.f32 0.5, %v5315_v43 }
 0x231   : > { %6579 = vst [vmem:[#allocation27_spill] sm:$0xff] %v5328_v53  ;;  %v1150_v5 = vsel %vm1114_vm0, %v6580_v24, %v1149_v22  ;;  %v2266_v23 = vmul.f32 0.5, %v2234_v33  ;;  %v1504_v21 = vrot.slane %v1238_v57, 1  ;;  %3684 = vtanh.f32 %v950_v49 }
 0x232   : > { %v1502_v6 = vrot.slane %v1150_v5, 1  ;;  %v5338_v18 = vadd.f32 %v1565_v25, %v6581_v59  ;;  %v5341_v3 = vmul.f32 %v2263_v45, %v5194_v32  ;;  %v1817_v27 = vrot.slane %v1150_v5, 2  ;;  %v3673_v44 = vpop.eup %3672 }
 0x233   : > { %v1819_v24 = vrot.slane %v1238_v57, 2  ;;  %v1146_v22 = vrot.slane %v1068_v2, 7  ;;  %v5344_v53 = vmul.f32 %v2264_v55, %v5200_v35  ;;  %v5347_v30 = vmul.f32 %v4460_v38, %v1150_v5 }
 0x234   : > { %6582 = vst [vmem:[#allocation34_spill] sm:$0xff] %v5338_v18  ;;  %6583 = vst [vmem:[#allocation67_spill] sm:$0xff] %v5341_v3  ;;  %v1305_v40 = vmul.f32 %v4464_v41, %v1150_v5  ;;  %v1505_v49 = vsel %vm1445_vm1, %v1502_v6, %v1504_v21  ;;  %v5352_v33 = vmul.f32 %v2265_v39, %v5203_v46  ;;  %v6587_v2 = vrot.slane %v5230_v8, 1 }
 0x235   : > { %6584 = vst [vmem:[#allocation68_spill] sm:$0xff] %v5344_v53  ;;  %v5355_v32 = vmul.f32 %v2266_v23, %v5214_v52  ;;  %v1371_v45 = vmul.f32 %v4471_v47, %v1150_v5  ;;  %v6588_v55 = vrot.slane %v5230_v8, 2  ;;  %v1820_v25 = vsel %vm1760_vm2, %v1817_v27, %v1819_v24  ;;  %v3675_v39 = vpop.eup %3674 }
 0x236   : > { %6585 = vst [vmem:[#allocation69_spill] sm:$0xff] %v5352_v33  ;;  %v5361_v35 = vsel %vm1445_vm1, %v6587_v2, %v1502_v6  ;;  %v6589_v21 = vrot.slane %v5191_v61, 7  ;;  %v1237_v52 = vsel %vm1114_vm0, %v1146_v22, 0.0  ;;  %v5372_v5 = vmul.f32 %v4481_v62, %v1505_v49  ;;  %v5377_v8 = vpop.eup %3676 }
 0x237   : > { %6586 = vst [vmem:[#allocation70_spill] sm:$0xff] %v5355_v32  ;;  %v1818_v57 = vsel %vm1760_vm2, %v6588_v55, %v1817_v27  ;;  %v5375_v23 = vmul.f32 %v4494_v1, %v1505_v49  ;;  %v1009_v6 = vadd.f32 1.0, %v3673_v44  ;;  %3686 = vtanh.f32 %v948_v19 }
 0x238   : > { %v1147_v46 = vsel %vm1114_vm0, %v6589_v21, %v1146_v22  ;;  %6590 = vst [vmem:[#allocation71_spill] sm:$0xff] %v5372_v5  ;;  %v1717_v59 = vmul.f32 %v4496_v16, %v5361_v35  ;;  %v1718_v61 = vmul.f32 %v4496_v16, %v1505_v49  ;;  %v5383_v27 = vmul.f32 %v4502_v20, %v1818_v57  ;;  %v5390_v19 = vpop.eup %3678 }
 0x239   : > { %6591 = vst [vmem:[#allocation72_spill] sm:$0xff] %v5375_v23  ;;  %v1303_v24 = vmul.f32 %v4464_v41, %v1147_v46  ;;  %v5387_v22 = vmul.f32 %v4502_v20, %v1820_v25  ;;  %v1369_v2 = vmul.f32 %v4471_v47, %v1147_v46  ;;  %v1497_v55 = vrot.slane %v1147_v46, 1  ;;  %v5400_v53 = vpop.eup %3680 }
 0x23a   : > { %6592 = vst [vmem:[#allocation73_spill] sm:$0xff] %v5383_v27  ;;  %v1499_v44 = vrot.slane %v1237_v52, 1  ;;  %v5393_v21 = vmul.f32 %v4509_v26, %v1818_v57  ;;  %v5396_v32 = vmul.f32 %v4509_v26, %v1820_v25  ;;  %v1269_v49 = vmul.f32 %v4460_v38, %v1147_v46 }
 0x23b   : > { %6593 = vst [vmem:[#allocation74_spill] sm:$0xff] %v5387_v22  ;;  %v1335_v33 = vadd.f32 %v1303_v24, %v5083_v11  ;;  %v1400_v3 = vadd.f32 %v1369_v2, %v5177_v12  ;;  %v6596_v18 = vrot.slane %v5236_v50, 1  ;;  %v1812_v54 = vrot.slane %v1147_v46, 2  ;;  %v5412_v2 = vpop.eup %3682 }
 0x23c   : > { %6594 = vst [vmem:[#allocation75_spill] sm:$0xff] %v5393_v21  ;;  %6595 = vst [vmem:[#allocation76_spill] sm:$0xff] %v5396_v32  ;;  %v1500_v43 = vsel %vm1445_vm1, %v1497_v55, %v1499_v44  ;;  %v2032_v21 = vmul.f32 %v4511_v28, %v1818_v57  ;;  %v1814_v27 = vrot.slane %v1237_v52, 2  ;;  %v2033_v23 = vmul.f32 %v4511_v28, %v1820_v25 }
 0x23d   : > { %v1498_v42 = vsel %vm1445_vm1, %v6596_v18, %v1497_v55  ;;  %v1402_v22 = vadd.f32 %v1371_v45, %v1335_v33  ;;  %v1612_v11 = vadd.f32 %v5208_v17, %v1400_v3  ;;  %v1041_v12 = vmul.f32 0.5, %v1009_v6 }
 0x23e   : > { %v1649_v32 = vmul.f32 %v4494_v1, %v1498_v42  ;;  %v1715_v24 = vmul.f32 %v4496_v16, %v1498_v42  ;;  %v5414_v5 = vadd.f32 %v1305_v40, %v1269_v49  ;;  %v1650_v46 = vmul.f32 %v4494_v1, %v1500_v43  ;;  %v5419_v45 = vpop.eup %3684 }
 0x23f   : > { %v1614_v18 = vadd.f32 %v5107_v51, %v1402_v22  ;;  %v1680_v57 = vadd.f32 %v5112_v29, %v1612_v11  ;;  %v1716_v25 = vmul.f32 %v4496_v16, %v1500_v43  ;;  %v6597_v3 = vrot.slane %v5236_v50, 2 }
 0x240   : > { %v1681_v33 = vadd.f32 %v1649_v32, %v5292_v58  ;;  %v1746_v17 = vadd.f32 %v1715_v24, %v5295_v63  ;;  %v5428_v40 = vmul.f32 %v4481_v62, %v1500_v43  ;;  %v1815_v22 = vsel %vm1760_vm2, %v1812_v54, %v1814_v27 }
 0x241   : > { %v1813_v52 = vsel %vm1760_vm2, %v6597_v3, %v1812_v54  ;;  %v1682_v51 = vadd.f32 %v1650_v46, %v1614_v18  ;;  %v1747_v58 = vadd.f32 %v1716_v25, %v1680_v57  ;;  %v5433_v29 = vmul.f32 %v1041_v12, %v5253_v14 }
 0x242   : > { %v1748_v6 = vadd.f32 %v1717_v59, %v1681_v33  ;;  %v1926_v32 = vadd.f32 %v5222_v60, %v1746_v17  ;;  %v1007_v55 = vadd.f32 1.0, %v3675_v39  ;;  %v1964_v50 = vmul.f32 %v4509_v26, %v1813_v52 }
 0x243   : > { %v1749_v44 = vadd.f32 %v1718_v61, %v1682_v51  ;;  %v2030_v49 = vmul.f32 %v4511_v28, %v1813_v52  ;;  %v1927_v43 = vadd.f32 %v5225_v48, %v1747_v58  ;;  %v1154_v54 = vrot.slane %v5433_v29, 7 }
 0x244   : > { %v1928_v63 = vadd.f32 %v5130_v9, %v1748_v6  ;;  %v1994_v59 = vadd.f32 %v5146_v37, %v1926_v32  ;;  %v1039_v27 = vmul.f32 0.5, %v1007_v55  ;;  %v5441_v11 = vpop.eup %3686  ;;  %v5444_v60 = vmul.f32 %v4502_v20, %v1813_v52 }
 0x245   : > { %v1929_v14 = vadd.f32 %v5153_v13, %v1749_v44  ;;  %v1965_v9 = vmul.f32 %v4509_v26, %v1815_v22  ;;  %v1995_v61 = vadd.f32 %v5156_v15, %v1927_v43  ;;  %v2031_v24 = vmul.f32 %v4511_v28, %v1815_v22 }
 0x246   : > { %v1996_v39 = vadd.f32 %v1964_v50, %v1928_v63  ;;  %v2061_v48 = vadd.f32 %v2030_v49, %v1994_v59  ;;  %v5451_v37 = vmul.f32 %v1039_v27, %v5269_v36  ;;  %v5456_v46 = vsel %vm1114_vm0, 0.0, %v1154_v54 }
 0x247   : > { %v1997_v12 = vadd.f32 %v1965_v9, %v1929_v14  ;;  %v1010_v13 = vadd.f32 1.0, %v5377_v8  ;;  %v5460_v33 = vmul.f32 %v4502_v20, %v1815_v22  ;;  %v2062_v57 = vadd.f32 %v2031_v24, %v1995_v61 }
 0x248   : > { %v2063_v18 = vadd.f32 %v2032_v21, %v1996_v39  ;;  %v2100_v15 = vmul.f32 %v4880_v4, %v2061_v48  ;;  %v1583_v25 = vmul.f32 %v4481_v62, %v1498_v42  ;;  %v1151_v21 = vrot.slane %v5451_v37, 7 }
 0x249   : > { %v2064_v17 = vadd.f32 %v2033_v23, %v1997_v12  ;;  %v1585_v3 = vmul.f32 %v4481_v62, %v5361_v35  ;;  %v2101_v52 = vmul.f32 %v4880_v4, %v2062_v57  ;;  %v5474_v51 = vmul.f32 %v4460_v38, %v5456_v46 }
 0x24a   : > { %v2102_v36 = vmul.f32 %v4880_v4, %v2063_v18  ;;  %v5470_v8 = vadd.f32 %v4892_v31, %v2100_v15  ;;  %v1651_v42 = vmul.f32 %v4494_v1, %v5361_v35  ;;  %v5483_v22 = vsel %vm1114_vm0, 0.0, %v1151_v21 }
 0x24b   : > { %v2103_v23 = vmul.f32 %v4880_v4, %v2064_v17  ;;  %v1042_v58 = vmul.f32 0.5, %v1010_v13  ;;  %v5486_v32 = vadd.f32 %v4892_v31, %v2101_v52  ;;  %v1306_v44 = vmul.f32 %v4464_v41, %v5483_v22 }
 0x24c   : > { %v5480_v6 = vadd.f32 %v4892_v31, %v2102_v36  ;;  %v2171_v55 = vmul.f32 0.5, %v5470_v8  ;;  %v1008_v63 = vadd.f32 1.0, %v5390_v19  ;;  %v1372_v50 = vmul.f32 %v4471_v47, %v5483_v22 }
 0x24d   : > { %v5493_v35 = vadd.f32 %v4892_v31, %v2103_v23  ;;  %v1013_v49 = vadd.f32 1.0, %v5400_v53  ;;  %v2172_v43 = vmul.f32 0.5, %v5486_v32  ;;  %v1374_v59 = vmul.f32 %v4471_v47, %v5456_v46 }
 0x24e   : > { %v2173_v4 = vmul.f32 0.5, %v5480_v6  ;;  %3688 = vtanh.f32 %v2171_v55  ;;  %v1338_v27 = vadd.f32 %v1306_v44, %v5248_v10  ;;  %v1272_v31 = vmul.f32 %v4460_v38, %v5483_v22 }
 0x24f   : > { %v2174_v19 = vmul.f32 0.5, %v5493_v35  ;;  %v1403_v14 = vadd.f32 %v1372_v50, %v5290_v34  ;;  %v1308_v53 = vmul.f32 %v4464_v41, %v5456_v46  ;;  %v1074_v9 = vmul.f32 %v1042_v58, %v5273_v7 }
 0x250   : > { %3690 = vtanh.f32 %v2173_v4  ;;  %v1040_v39 = vmul.f32 0.5, %v1008_v63  ;;  %v1405_v61 = vadd.f32 %v1374_v59, %v1338_v27  ;;  %v1045_v48 = vmul.f32 0.5, %v1013_v49 }
 0x251   : > { %3692 = vtanh.f32 %v2172_v43  ;;  %v1615_v24 = vadd.f32 %v1583_v25, %v1403_v14  ;;  %v1511_v10 = vrot.slane %v5456_v46, 1  ;;  %v1826_v37 = vrot.slane %v5456_v46, 2 }
 0x252   : > { %3694 = vtanh.f32 %v2174_v19  ;;  %v1155_v12 = vrot.slane %v1074_v9, 7  ;;  %v1072_v18 = vmul.f32 %v1040_v39, %v5276_v56  ;;  %v5513_v13 = vadd.f32 %v1308_v53, %v1272_v31 }
 0x253   : > { %v1506_v34 = vrot.slane %v5483_v22, 1  ;;  %v1011_v7 = vadd.f32 1.0, %v5412_v2  ;;  %v1014_v46 = vadd.f32 1.0, %v5419_v45  ;;  %v1617_v36 = vadd.f32 %v1585_v3, %v1405_v61 }
 0x254   : > { %v1156_v15 = vsel %vm1114_vm0, %v1154_v54, %v1155_v12  ;;  %v1240_v25 = vsel %vm1114_vm0, %v1155_v12, 0.0  ;;  %v1152_v17 = vrot.slane %v1072_v18, 7  ;;  %v5523_v52 = vadd.f32 %v1651_v42, %v1615_v24 }
 0x255   : > { %v1512_v56 = vrot.slane %v1156_v15, 1  ;;  %v5526_v23 = vmul.f32 %v1045_v48, %v5279_v0  ;;  %v1514_v58 = vrot.slane %v1240_v25, 1  ;;  %v1827_v55 = vrot.slane %v1156_v15, 2 }
 0x256   : > { %v1829_v44 = vrot.slane %v1240_v25, 2  ;;  %v1153_v2 = vsel %vm1114_vm0, %v1151_v21, %v1152_v17  ;;  %v5533_v63 = vmul.f32 0.5, %v1011_v7  ;;  %v5536_v45 = vadd.f32 1.0, %v5441_v11 }
 0x257   : > { %v5530_v29 = vsel %vm1445_vm1, %v1511_v10, %v1512_v56  ;;  %v1307_v54 = vmul.f32 %v4464_v41, %v1153_v2  ;;  %v5539_v3 = vmul.f32 %v4460_v38, %v1156_v15  ;;  %v1515_v0 = vsel %vm1445_vm1, %v1512_v56, %v1514_v58 }
 0x258   : > { %v1828_v42 = vsel %vm1760_vm2, %v1826_v37, %v1827_v55  ;;  %v5543_v4 = vmul.f32 0.5, %v1014_v46  ;;  %v1309_v21 = vmul.f32 %v4464_v41, %v1156_v15  ;;  %v1375_v50 = vmul.f32 %v4471_v47, %v1156_v15 }
 0x259   : > { %v1830_v49 = vsel %vm1760_vm2, %v1827_v55, %v1829_v44  ;;  %v1239_v43 = vsel %vm1114_vm0, %v1152_v17, 0.0  ;;  %v5550_v11 = vmul.f32 %v4481_v62, %v1515_v0  ;;  %v5553_v59 = vmul.f32 %v4494_v1, %v1515_v0 }
 0x25a   : > { %v1721_v27 = vmul.f32 %v4496_v16, %v5530_v29  ;;  %v1273_v19 = vmul.f32 %v4460_v38, %v1153_v2  ;;  %v1722_v14 = vmul.f32 %v4496_v16, %v1515_v0  ;;  %v5560_v53 = vmul.f32 %v4502_v20, %v1828_v42 }
 0x25b   : > { %v3689_v31 = vpop.eup %3688  ;;  %v1339_v9 = vadd.f32 %v1307_v54, %v5347_v30  ;;  %v1373_v39 = vmul.f32 %v4471_v47, %v1153_v2  ;;  %v5565_v24 = vmul.f32 %v4502_v20, %v1830_v49  ;;  %v5568_v48 = vmul.f32 %v4509_v26, %v1828_v42 }
 0x25c   : > { %v1507_v10 = vrot.slane %v1153_v2, 1  ;;  %v1509_v37 = vrot.slane %v1239_v43, 1  ;;  %v2235_v18 = vadd.f32 1.0, %v3689_v31  ;;  %v5571_v7 = vmul.f32 %v4509_v26, %v1830_v49 }
 0x25d   : > { %v3691_v61 = vpop.eup %3690  ;;  %v1404_v15 = vadd.f32 %v1373_v39, %v5414_v5  ;;  %v1406_v25 = vadd.f32 %v1375_v50, %v1339_v9  ;;  %v2036_v46 = vmul.f32 %v4511_v28, %v1828_v42  ;;  %v2037_v55 = vmul.f32 %v4511_v28, %v1830_v49 }
 0x25e   : > { %v3693_v12 = vpop.eup %3692  ;;  %6598 = vst [vmem:[#allocation77_spill] sm:$0xff] %v5571_v7  ;;  %v2237_v17 = vadd.f32 1.0, %v3691_v61  ;;  %v1508_v56 = vsel %vm1445_vm1, %v1506_v34, %v1507_v10  ;;  %v1510_v58 = vsel %vm1445_vm1, %v1507_v10, %v1509_v37  ;;  %v1822_v54 = vrot.slane %v1153_v2, 2  ;;  %v6599_v7 = vld [vmem:[#allocation71_spill] sm:$0xff]  ;;  %v6600_v34 = vld [vmem:[#allocation72_spill] sm:$0xff] }
 0x25f   : > { %v3695_v30 = vpop.eup %3694  ;;  %v1616_v44 = vadd.f32 %v5428_v40, %v1404_v15  ;;  %v1824_v0 = vrot.slane %v1239_v43, 2  ;;  %v2236_v31 = vadd.f32 1.0, %v3693_v12  ;;  %v5579_v57 = vadd.f32 %v1309_v21, %v1273_v19 }
 0x260   : > { %v1618_v5 = vadd.f32 %v6599_v7, %v1406_v25  ;;  %v1653_v50 = vmul.f32 %v4494_v1, %v1508_v56  ;;  %v2238_v9 = vadd.f32 1.0, %v3695_v30  ;;  %v2267_v39 = vmul.f32 0.5, %v2235_v18 }
 0x261   : > { %v1654_v42 = vmul.f32 %v4494_v1, %v1510_v58  ;;  %v1684_v61 = vadd.f32 %v6600_v34, %v1616_v44  ;;  %v2269_v10 = vmul.f32 0.5, %v2237_v17  ;;  %v1719_v49 = vmul.f32 %v4496_v16, %v1508_v56 }
 0x262   : > { %v1685_v37 = vadd.f32 %v1653_v50, %v1617_v36  ;;  %v1720_v40 = vmul.f32 %v4496_v16, %v1510_v58  ;;  %v5588_v2 = vmul.f32 %v4481_v62, %v1510_v58  ;;  %v6601_v43 = vrot.slane %v5483_v22, 2 }
 0x263   : > { %v1686_v21 = vadd.f32 %v1654_v42, %v1618_v5  ;;  %v1825_v12 = vsel %vm1760_vm2, %v1822_v54, %v1824_v0  ;;  %v2268_v18 = vmul.f32 0.5, %v2236_v31  ;;  %v1750_v7 = vadd.f32 %v1719_v49, %v5523_v52  ;;  %v6602_v5 = vld [vmem:[#allocation73_spill] sm:$0xff]  ;;  %v6603_v0 = vld [vmem:[#allocation74_spill] sm:$0xff]  ;;  %v6606_v42 = vld [vmem:[#allocation76_spill] sm:$0xff] }
 0x264   : > { %v1823_v19 = vsel %vm1760_vm2, %v6601_v43, %v1822_v54  ;;  %v1751_v15 = vadd.f32 %v1720_v40, %v1684_v61  ;;  %v1752_v25 = vadd.f32 %v1721_v27, %v1685_v37  ;;  %v2270_v36 = vmul.f32 0.5, %v2238_v9  ;;  %v6604_v9 = vld [vmem:[#allocation54_spill] sm:$0xff] }
 0x265   : > { %v5596_v30 = vmul.f32 %v2267_v39, %v5470_v8  ;;  %v1753_v17 = vadd.f32 %v1722_v14, %v1686_v21  ;;  %v1968_v58 = vmul.f32 %v4509_v26, %v1823_v19  ;;  %v1930_v44 = vadd.f32 %v5444_v60, %v1750_v7  ;;  %v6605_v14 = vld [vmem:[#allocation75_spill] sm:$0xff] }
 0x266   : > { %v1931_v22 = vadd.f32 %v5460_v33, %v1751_v15  ;;  %v1932_v50 = vadd.f32 %v6602_v5, %v1752_v25  ;;  %v1969_v54 = vmul.f32 %v4509_v26, %v1825_v12  ;;  %v2034_v52 = vmul.f32 %v4511_v28, %v1823_v19 }
 0x267   : > { %v1933_v31 = vadd.f32 %v6603_v0, %v1753_v17  ;;  %v1160_v27 = vrot.slane %v5526_v23, 7  ;;  %v5608_v8 = vmul.f32 %v5533_v63, %v6604_v9  ;;  %v1998_v39 = vadd.f32 %v6605_v14, %v1930_v44  ;;  %v5647_v17 = vld [vmem:[#allocation10] ss:$0 sm:$0xff] }
 0x268   : > { %v1999_v60 = vadd.f32 %v6606_v42, %v1931_v22  ;;  %v2000_v34 = vadd.f32 %v1968_v58, %v1932_v50  ;;  %v2035_v33 = vmul.f32 %v4511_v28, %v1825_v12  ;;  %v5614_v61 = vmul.f32 %v2268_v18, %v5486_v32 }
 0x269   : > { %v5617_v37 = vmul.f32 %v2269_v10, %v5480_v6  ;;  %v2001_v49 = vadd.f32 %v1969_v54, %v1933_v31  ;;  %v1157_v23 = vrot.slane %v5608_v8, 7  ;;  %v5621_v40 = vmul.f32 %v2270_v36, %v5493_v35  ;;  %v5630_v6 = vld [vmem:[#allocation8] ss:$0 sm:$0xff] }
 0x26a   : > { %v2065_v63 = vadd.f32 %v2034_v52, %v1998_v39  ;;  %v2066_v21 = vadd.f32 %v2035_v33, %v1999_v60  ;;  %v2067_v43 = vadd.f32 %v2036_v46, %v2000_v34  ;;  %v5624_v7 = vmul.f32 %v4502_v20, %v1823_v19  ;;  %v6614_v8 = vld [vmem:[#allocation27_spill] sm:$0xff] }
 0x26b   : > { %6607 = vst [vmem:[#allocation71_spill] sm:$0xff] %v5621_v40  ;;  %v2068_v15 = vadd.f32 %v2037_v55, %v2001_v49  ;;  %v5627_v25 = vsel %vm1114_vm0, 0.0, %v1160_v27  ;;  %v1587_v32 = vmul.f32 %v4481_v62, %v1508_v56  ;;  %v5638_v46 = vsel %vm1114_vm0, 0.0, %v1157_v23 }
 0x26c   : > { %v2104_v10 = vmul.f32 %v5630_v6, %v2065_v63  ;;  %v2105_v18 = vmul.f32 %v5630_v6, %v2066_v21  ;;  %v2106_v35 = vmul.f32 %v5630_v6, %v2067_v43  ;;  %v1276_v19 = vmul.f32 %v4460_v38, %v5638_v46 }
 0x26d   : > { %v2107_v55 = vmul.f32 %v5630_v6, %v2068_v15  ;;  %v1310_v56 = vmul.f32 %v4464_v41, %v5638_v46  ;;  %v1376_v36 = vmul.f32 %v4471_v47, %v5638_v46  ;;  %v1312_v5 = vmul.f32 %v4464_v41, %v5627_v25  ;;  %v6609_v15 = vld [vmem:[#allocation62_spill] sm:$0xff] }
 0x26e   : > { %v5650_v58 = vadd.f32 %v5647_v17, %v2104_v10  ;;  %v5653_v44 = vadd.f32 %v5647_v17, %v2105_v18  ;;  %v5656_v22 = vadd.f32 %v5647_v17, %v2106_v35  ;;  %v1378_v54 = vmul.f32 %v4471_v47, %v5627_v25  ;;  %v6610_v35 = vld [vmem:[#allocation65_spill] sm:$0xff] }
 0x26f   : > { %v5661_v50 = vadd.f32 %v5647_v17, %v2107_v55  ;;  %v1342_v0 = vadd.f32 %v1310_v56, %v5474_v51  ;;  %v1407_v31 = vadd.f32 %v1376_v36, %v5513_v13  ;;  %v5668_v52 = vmul.f32 %v4502_v20, %v1825_v12  ;;  %v6608_v51 = vld [vmem:[#allocation53_spill] sm:$0xff] }
 0x270   : > { %v2175_v9 = vmul.f32 0.5, %v5650_v58  ;;  %v2176_v14 = vmul.f32 0.5, %v5653_v44  ;;  %v1344_v39 = vadd.f32 %v1312_v5, %v1276_v19  ;;  %v2177_v42 = vmul.f32 0.5, %v5656_v22 }
 0x271   : > { %v1409_v60 = vadd.f32 %v1378_v54, %v1342_v0  ;;  %v1589_v34 = vmul.f32 %v4481_v62, %v5530_v29  ;;  %v1619_v33 = vadd.f32 %v1587_v32, %v1407_v31  ;;  %v2178_v49 = vmul.f32 0.5, %v5661_v50  ;;  %v6611_v54 = vld [vmem:[#allocation66_spill] sm:$0xff]  ;;  %v6612_v31 = vld [vmem:[#allocation39_spill] sm:$0xff] }
 0x272   : > { %3696 = vtanh.f32 %v2175_v9  ;;  %v1078_v13 = vmul.f32 %v5543_v4, %v6608_v51  ;;  %v1044_v12 = vmul.f32 0.5, %v5536_v45  ;;  %v1521_v63 = vrot.slane %v5627_v25, 1 }
 0x273   : > { %3698 = vtanh.f32 %v2176_v14  ;;  %v1836_v21 = vrot.slane %v5627_v25, 2  ;;  %v1655_v43 = vmul.f32 %v4494_v1, %v5530_v29  ;;  %v1411_v10 = vadd.f32 %v6609_v15, %v1344_v39 }
 0x274   : > { %v1516_v32 = vrot.slane %v5638_v46, 1  ;;  %v1161_v18 = vrot.slane %v1078_v13, 7  ;;  %v1076_v55 = vmul.f32 %v1044_v12, %v6610_v35  ;;  %3700 = vtanh.f32 %v2177_v42  ;;  %v6613_v12 = vld [vmem:[#allocation26_spill] sm:$0xff] }
 0x275   : > { %v1621_v19 = vadd.f32 %v1589_v34, %v1409_v60  ;;  %v5686_v4 = vadd.f32 %v1655_v43, %v1619_v33  ;;  %3702 = vtanh.f32 %v2178_v49  ;;  %v1631_v0 = vmul.f32 %v4494_v1, %v6611_v54 }
 0x276   : > { %v1162_v56 = vsel %vm1114_vm0, %v1160_v27, %v1161_v18  ;;  %v1242_v25 = vsel %vm1114_vm0, %v1161_v18, 0.0  ;;  %v1158_v36 = vrot.slane %v1076_v55, 7  ;;  %v1633_v9 = vmul.f32 %v4494_v1, %v6612_v31 }
 0x277   : > { %v1522_v29 = vrot.slane %v1162_v56, 1  ;;  %v1524_v5 = vrot.slane %v1242_v25, 1  ;;  %v1313_v14 = vmul.f32 %v4464_v41, %v1162_v56  ;;  %v1837_v39 = vrot.slane %v1162_v56, 2 }
 0x278   : > { %v1839_v42 = vrot.slane %v1242_v25, 2  ;;  %v5699_v60 = vsel %vm1114_vm0, %v1157_v23, %v1158_v36  ;;  %v1379_v51 = vmul.f32 %v4471_v47, %v1162_v56  ;;  %v5709_v13 = vsel %vm1114_vm0, %v1158_v36, 0.0  ;;  %v6615_v23 = vld [vmem:[#allocation35_spill] sm:$0xff]  ;;  %v6616_v25 = vld [vmem:[#allocation34_spill] sm:$0xff] }
 0x279   : > { %v1523_v27 = vsel %vm1445_vm1, %v1521_v63, %v1522_v29  ;;  %v1525_v34 = vsel %vm1445_vm1, %v1522_v29, %v1524_v5  ;;  %v1277_v33 = vmul.f32 %v4460_v38, %v5699_v60  ;;  %v1311_v49 = vmul.f32 %v4464_v41, %v5699_v60 }
 0x27a   : > { %v5713_v43 = vadd.f32 %v6614_v8, %v6613_v12  ;;  %v5716_v18 = vadd.f32 %v1631_v0, %v6615_v23  ;;  %v1838_v63 = vsel %vm1760_vm2, %v1836_v21, %v1837_v39  ;;  %v1840_v35 = vsel %vm1760_vm2, %v1837_v39, %v1839_v42 }
 0x27b   : > { %v1343_v38 = vadd.f32 %v1311_v49, %v5539_v3  ;;  %v1345_v55 = vadd.f32 %v1313_v14, %v1277_v33  ;;  %v1659_v41 = vmul.f32 %v4494_v1, %v1523_v27  ;;  %v1660_v56 = vmul.f32 %v4494_v1, %v1525_v34 }
 0x27c   : > { %v5724_v36 = vadd.f32 %v1633_v9, %v6616_v25  ;;  %v5728_v29 = vmul.f32 %v4496_v16, %v6611_v54  ;;  %v1725_v5 = vmul.f32 %v4496_v16, %v1523_v27  ;;  %v1377_v21 = vmul.f32 %v4471_v47, %v5699_v60 }
 0x27d   : > { %v1410_v0 = vadd.f32 %v1379_v51, %v1343_v38  ;;  %v1517_v3 = vrot.slane %v5699_v60, 1  ;;  %v1726_v14 = vmul.f32 %v4496_v16, %v1525_v34  ;;  %v5736_v39 = vmul.f32 %v4509_v26, %v1838_v63 }
 0x27e   : > { %v5739_v9 = vmul.f32 %v4509_v26, %v1840_v35  ;;  %v1519_v42 = vrot.slane %v5709_v13, 1  ;;  %v5743_v33 = vmul.f32 %v4511_v28, %v1838_v63  ;;  %v1408_v27 = vadd.f32 %v1377_v21, %v5579_v57 }
 0x27f   : > { %v3697_v54 = vpop.eup %3696  ;;  %v1412_v47 = vadd.f32 %v6609_v15, %v1345_v55  ;;  %v1518_v49 = vsel %vm1445_vm1, %v1516_v32, %v1517_v3  ;;  %v1622_v8 = vadd.f32 %v5550_v11, %v1410_v0  ;;  %v2041_v25 = vmul.f32 %v4511_v28, %v1840_v35 }
 0x280   : > { %v3699_v51 = vpop.eup %3698  ;;  %v1520_v34 = vsel %vm1445_vm1, %v1517_v3, %v1519_v42  ;;  %v1591_v12 = vmul.f32 %v4481_v62, %v1518_v49  ;;  %v1657_v23 = vmul.f32 %v4494_v1, %v1518_v49  ;;  %v2239_v38 = vadd.f32 1.0, %v3697_v54 }
 0x281   : > { %v1592_v63 = vmul.f32 %v4481_v62, %v1520_v34  ;;  %v1620_v57 = vadd.f32 %v5588_v2, %v1408_v27  ;;  %v3701_v21 = vpop.eup %3700  ;;  %v1658_v32 = vmul.f32 %v4494_v1, %v1520_v34  ;;  %v1832_v3 = vrot.slane %v5699_v60, 2  ;;  %v6617_v2 = vld [vmem:[#allocation36_spill] sm:$0xff] }
 0x282   : > { %v1623_v15 = vadd.f32 %v1591_v12, %v1411_v10  ;;  %v1689_v55 = vadd.f32 %v1657_v23, %v1621_v19  ;;  %v3703_v42 = vpop.eup %3702  ;;  %v2240_v45 = vadd.f32 1.0, %v3699_v51  ;;  %v1834_v11 = vrot.slane %v5709_v13, 2 }
 0x283   : > { %v1624_v40 = vadd.f32 %v1592_v63, %v1412_v47  ;;  %v1699_v0 = vmul.f32 %v4496_v16, %v6612_v31  ;;  %v1688_v35 = vadd.f32 %v5553_v59, %v1620_v57  ;;  %v1690_v62 = vadd.f32 %v1658_v32, %v1622_v8  ;;  %v6618_v63 = vld [vmem:[#allocation63_spill] sm:$0xff] }
 0x284   : > { %v1691_v54 = vadd.f32 %v1659_v41, %v1623_v15  ;;  %v1701_v10 = vmul.f32 %v4496_v16, %v6617_v2  ;;  %v2241_v27 = vadd.f32 1.0, %v3701_v21  ;;  %v2271_v1 = vmul.f32 0.5, %v2239_v38 }
 0x285   : > { %v1692_v19 = vadd.f32 %v1660_v56, %v1624_v40  ;;  %v1723_v60 = vmul.f32 %v4496_v16, %v1518_v49  ;;  %v2242_v12 = vadd.f32 1.0, %v3703_v42  ;;  %v1724_v47 = vmul.f32 %v4496_v16, %v1520_v34 }
 0x286   : > { %v1756_v51 = vadd.f32 %v1725_v5, %v1689_v55  ;;  %v1757_v13 = vadd.f32 %v1726_v14, %v1690_v62  ;;  %v2272_v23 = vmul.f32 0.5, %v2240_v45  ;;  %v1758_v59 = vadd.f32 %v6618_v63, %v1691_v54  ;;  %v6620_v55 = vld [vmem:[#allocation77_spill] sm:$0xff] }
 0x287   : > { %v1754_v31 = vadd.f32 %v1723_v60, %v5686_v4  ;;  %v1759_v41 = vadd.f32 %v6618_v63, %v1692_v19  ;;  %v1755_v8 = vadd.f32 %v1724_v47, %v1688_v35  ;;  %v6619_v57 = vrot.slane %v5638_v46, 2  ;;  %v6627_v63 = vld [vmem:[#allocation21_spill] sm:$0xff] }
 0x288   : > { %v1835_v40 = vsel %vm1760_vm2, %v1832_v3, %v1834_v11  ;;  %v1936_v56 = vadd.f32 %v5560_v53, %v1756_v51  ;;  %v1937_v4 = vadd.f32 %v5565_v24, %v1757_v13  ;;  %v2273_v14 = vmul.f32 0.5, %v2241_v27 }
 0x289   : > { %v1833_v38 = vsel %vm1760_vm2, %v6619_v57, %v1832_v3  ;;  %v1907_v5 = vmul.f32 %v4502_v20, %v1835_v40  ;;  %v1934_v45 = vadd.f32 %v5624_v7, %v1754_v31  ;;  %v1935_v49 = vadd.f32 %v5668_v52, %v1755_v8  ;;  %v6631_v57 = vld [vmem:[#allocation22_spill] sm:$0xff] }
 0x28a   : > { %v1906_v16 = vmul.f32 %v4502_v20, %v1833_v38  ;;  %v1972_v34 = vmul.f32 %v4509_v26, %v1833_v38  ;;  %v1973_v46 = vmul.f32 %v4509_v26, %v1835_v40  ;;  %v2038_v53 = vmul.f32 %v4511_v28, %v1833_v38 }
 0x28b   : > { %v1939_v15 = vadd.f32 %v1907_v5, %v1759_v41  ;;  %v2002_v32 = vadd.f32 %v5568_v48, %v1934_v45  ;;  %v2003_v3 = vadd.f32 %v6620_v55, %v1935_v49  ;;  %v2039_v7 = vmul.f32 %v4511_v28, %v1835_v40  ;;  %v6636_v45 = vld [vmem:[#allocation46_spill] sm:$0xff]  ;;  %v6638_v49 = vld [vmem:[#allocation33_spill] sm:$0xff] }
 0x28c   : > { %v1938_v21 = vadd.f32 %v1906_v16, %v1758_v59  ;;  %v2004_v42 = vadd.f32 %v1972_v34, %v1936_v56  ;;  %v2005_v11 = vadd.f32 %v1973_v46, %v1937_v4  ;;  %v5784_v24 = vmul.f32 0.5, %v2242_v12  ;;  %v6622_v12 = vld [vmem:[#allocation29_spill] sm:$0xff]  ;;  %v6637_v4 = vld [vmem:[#allocation48_spill] sm:$0xff] }
 0x28d   : > { %v5787_v52 = vmul.f32 %v2271_v1, %v5650_v58  ;;  %v5790_v35 = vmul.f32 %v2272_v23, %v5653_v44  ;;  %v2069_v62 = vadd.f32 %v2038_v53, %v2002_v32  ;;  %v5793_v54 = vmul.f32 %v2273_v14, %v5656_v22  ;;  %v6621_v1 = vld [vmem:[#allocation31_spill] sm:$0xff]  ;;  %v6625_v23 = vld [vmem:[#allocation25_spill] sm:$0xff]  ;;  %v6640_v46 = vld [vmem:[#allocation32_spill] sm:$0xff] }
 0x28e   : > { %v2070_v48 = vadd.f32 %v2039_v7, %v2003_v3  ;;  %v2072_v2 = vadd.f32 %v2041_v25, %v2005_v11  ;;  %v1728_v27 = vadd.f32 %v5728_v29, %v5713_v43  ;;  %v5798_v19 = vadd.f32 %v5736_v39, %v1938_v21  ;;  %v6623_v39 = vld [vmem:[#allocation44_spill] sm:$0xff] }
 0x28f   : > { %v2007_v60 = vadd.f32 %v5739_v9, %v1939_v15  ;;  %v2108_v58 = vmul.f32 %v5630_v6, %v2069_v62  ;;  %v1729_v44 = vadd.f32 %v6622_v12, %v6621_v1  ;;  %v5805_v47 = vadd.f32 %v5743_v33, %v2004_v42  ;;  %v6624_v9 = vld [vmem:[#allocation38_spill] sm:$0xff] }
 0x290   : > { %v2109_v22 = vmul.f32 %v5630_v6, %v2070_v48  ;;  %v2111_v25 = vmul.f32 %v5630_v6, %v2072_v2  ;;  %v1730_v51 = vadd.f32 %v1699_v0, %v5716_v18  ;;  %v1732_v29 = vadd.f32 %v1701_v10, %v5724_v36  ;;  %v6629_v18 = vld [vmem:[#allocation23_spill] sm:$0xff]  ;;  %v6633_v10 = vld [vmem:[#allocation24_spill] sm:$0xff]  ;;  %v6643_v1 = vld [vmem:[#allocation30_spill] sm:$0xff] }
 0x291   : > { %v5811_v43 = vadd.f32 %v5647_v17, %v2108_v58  ;;  %v1733_v13 = vadd.f32 %v6624_v9, %v6623_v39  ;;  %v6626_v31 = vrot.slane %v6625_v23, 2  ;;  %v6628_v59 = vrot.slane %v6627_v63, 2  ;;  %v6642_v58 = vld [vmem:[#allocation45_spill] sm:$0xff]  ;;  %v6644_v23 = vld [vmem:[#allocation28_spill] sm:$0xff] }
 0x292   : > { %v5822_v41 = vadd.f32 %v5647_v17, %v2109_v22  ;;  %v5825_v8 = vadd.f32 %v5647_v17, %v2111_v25  ;;  %v6630_v0 = vrot.slane %v6629_v18, 2  ;;  %v6632_v38 = vrot.slane %v6631_v57, 2  ;;  %v6646_v18 = vld [vmem:[#allocation40_spill] sm:$0xff] }
 0x293   : > { %v1763_v33 = vsel %vm1760_vm2, %v6628_v59, %v6626_v31  ;;  %v6634_v40 = vrot.slane %v6633_v10, 2  ;;  %v2179_v5 = vmul.f32 0.5, %v5811_v43  ;;  %v1734_v14 = vadd.f32 %v6637_v4, %v6636_v45 }
 0x294   : > { %v1768_v36 = vsel %vm1760_vm2, %v6632_v38, %v6630_v0  ;;  %v6635_v56 = vmov %v6630_v0  ;;  %v6639_v34 = vrot.slane %v6638_v49, 2  ;;  %v6641_v21 = vrot.slane %v6640_v46, 2 }
 0x295   : > { %v1770_v16 = vsel %vm1760_vm2, %v6635_v56, %v6634_v40  ;;  %v1877_v32 = vmul.f32 0.0, %v4502_v20  ;;  %v2180_v53 = vmul.f32 0.5, %v5822_v41  ;;  %v2182_v55 = vmul.f32 0.5, %v5825_v8  ;;  %v6647_v56 = vld [vmem:[#allocation37_spill] sm:$0xff] }
 0x296   : > { %v1773_v15 = vsel %vm1760_vm2, %v6641_v21, %v6639_v34  ;;  %v1878_v3 = vmul.f32 %v4502_v20, %v1763_v33  ;;  %v1880_v42 = vmul.f32 %v4502_v20, %v1768_v36  ;;  %v1881_v11 = vmul.f32 %v4502_v20, %v1770_v16  ;;  %v6650_v34 = vld [vmem:[#allocation49_spill] sm:$0xff]  ;;  %v6651_v21 = vld [vmem:[#allocation50_spill] sm:$0xff] }
 0x297   : > { %v1882_v7 = vmul.f32 %v4502_v20, %v1773_v15  ;;  %v1908_v62 = vadd.f32 %v1877_v32, %v1728_v27  ;;  %v1909_v48 = vadd.f32 %v1877_v32, %v1729_v44  ;;  %3704 = vtanh.f32 %v2180_v53 }
 0x298   : > { %v1910_v2 = vadd.f32 %v1878_v3, %v1730_v51  ;;  %v1911_v12 = vadd.f32 %v6643_v1, %v6642_v58  ;;  %v1912_v22 = vadd.f32 %v1880_v42, %v1732_v29  ;;  %3706 = vtanh.f32 %v2179_v5  ;;  %v6645_v51 = vld [vmem:[#allocation42_spill] sm:$0xff] }
 0x299   : > { %v1913_v25 = vadd.f32 %v1881_v11, %v1733_v13  ;;  %v1914_v39 = vadd.f32 %v1882_v7, %v1734_v14  ;;  %v1944_v9 = vmul.f32 %v4509_v26, %v1763_v33  ;;  %v1945_v31 = vmul.f32 %v4509_v26, %v6644_v23  ;;  %v6649_v14 = vld [vmem:[#allocation41_spill] sm:$0xff]  ;;  %v6653_v11 = vld [vmem:[#allocation64_spill] sm:$0xff] }
 0x29a   : > { %v1946_v63 = vmul.f32 %v4509_v26, %v1768_v36  ;;  %v1947_v20 = vmul.f32 %v4509_v26, %v1770_v16  ;;  %v1948_v27 = vmul.f32 %v4509_v26, %v1773_v15  ;;  %v2012_v29 = vmul.f32 %v4511_v28, %v1768_v36  ;;  %v6648_v26 = vld [vmem:[#allocation43_spill] sm:$0xff] }
 0x29b   : > { %v1976_v44 = vadd.f32 %v1944_v9, %v1908_v62  ;;  %v1981_v59 = vadd.f32 %v6645_v51, %v1913_v25  ;;  %v1982_v0 = vadd.f32 %v6646_v18, %v1914_v39  ;;  %v1977_v13 = vadd.f32 %v1945_v31, %v1909_v48  ;;  %v6652_v36 = vld [vmem:[#allocation47_spill] sm:$0xff] }
 0x29c   : > { %v1978_v57 = vadd.f32 %v1946_v63, %v1910_v2  ;;  %v1979_v38 = vadd.f32 %v1947_v20, %v1911_v12  ;;  %v1980_v33 = vadd.f32 %v1948_v27, %v1912_v22  ;;  %v2013_v10 = vmul.f32 %v4511_v28, %v1770_v16  ;;  %v6654_v27 = vld [vmem:[#allocation52_spill] sm:$0xff] }
 0x29d   : > { %v2014_v40 = vmul.f32 %v4511_v28, %v1773_v15  ;;  %v2016_v5 = vmul.f32 %v4511_v28, %v6647_v56  ;;  %v2043_v45 = vadd.f32 %v2012_v29, %v1976_v44  ;;  %v2048_v49 = vadd.f32 %v6649_v14, %v1981_v59 }
 0x29e   : > { %v2046_v4 = vadd.f32 %v6648_v26, %v1979_v38  ;;  %v2049_v46 = vadd.f32 %v6650_v34, %v1982_v0  ;;  %v2051_v32 = vadd.f32 %v6652_v36, %v6651_v21  ;;  %v2044_v53 = vadd.f32 %v2013_v10, %v1977_v13  ;;  %v6655_v0 = vld [vmem:[#allocation58_spill] sm:$0xff] }
 0x29f   : > { %v2045_v3 = vadd.f32 %v2014_v40, %v1978_v57  ;;  %v2047_v42 = vadd.f32 %v2016_v5, %v1980_v33  ;;  %v2082_v16 = vmul.f32 %v5630_v6, %v2043_v45  ;;  %v2074_v15 = vadd.f32 %v6653_v11, %v2007_v60  ;;  %v6656_v57 = vld [vmem:[#allocation59_spill] sm:$0xff]  ;;  %v2366_v26 = vld [vmem:[%s6430_s7 + $0x70] sm:$0xff] }
 0x2a0   : > { %v2085_v7 = vmul.f32 %v5630_v6, %v2046_v4  ;;  %v2087_v28 = vmul.f32 %v5630_v6, %v2048_v49  ;;  %v2088_v62 = vmul.f32 %v5630_v6, %v2049_v46  ;;  %v2083_v48 = vmul.f32 %v5630_v6, %v2044_v53  ;;  %v2367_v40 = vld [vmem:[%s6430_s7 + $0x78] sm:$0xff] }
 0x2a1   : > { %v2084_v2 = vmul.f32 %v5630_v6, %v2045_v3  ;;  %v2086_v58 = vmul.f32 %v5630_v6, %v2047_v42  ;;  %v5881_v1 = vadd.f32 %v5647_v17, %v2082_v16  ;;  %v5885_v12 = vmul.f32 %v5784_v24, %v5661_v50  ;;  %v2364_v16 = vld [vmem:[%s6430_s7 + $0x60] sm:$0xff] }
 0x2a2   : > { %3708 = vtanh.f32 %v2182_v55  ;;  %v2090_v60 = vmul.f32 %v5630_v6, %v2051_v32  ;;  %v5889_v22 = vadd.f32 %v5647_v17, %v2085_v7  ;;  %v5892_v25 = vadd.f32 %v5647_v17, %v2083_v48  ;;  %v6658_v7 = vld [vmem:[#allocation68_spill] sm:$0xff] }
 0x2a3   : > { %v5895_v39 = vadd.f32 %v5647_v17, %v2084_v2  ;;  %v5898_v9 = vadd.f32 %v5647_v17, %v2086_v58  ;;  %v5901_v23 = vadd.f32 %v5647_v17, %v2087_v28  ;;  %v2073_v50 = vadd.f32 %v6653_v11, %v5798_v19 }
 0x2a4   : > { %v2110_v24 = vmul.f32 %v5630_v6, %v5805_v47  ;;  %v2113_v55 = vmul.f32 %v5630_v6, %v2074_v15  ;;  %v2153_v31 = vmul.f32 0.5, %v5881_v1  ;;  %v3705_v63 = vpop.eup %3704  ;;  %v5910_v20 = vadd.f32 %v5647_v17, %v2088_v62  ;;  %v6657_v15 = vld [vmem:[#allocation67_spill] sm:$0xff]  ;;  %v6660_v62 = vld [vmem:[#allocation70_spill] sm:$0xff] }
 0x2a5   : > { %v5914_v44 = vadd.f32 %v5647_v17, %v6654_v27  ;;  %v2154_v51 = vmul.f32 0.5, %v5892_v25  ;;  %v2155_v59 = vmul.f32 0.5, %v5895_v39  ;;  %v3707_v19 = vpop.eup %3706  ;;  %v2244_v18 = vadd.f32 1.0, %v3705_v63  ;;  %v6662_v63 = vld [vmem:[#allocation60_spill] sm:$0xff] }
 0x2a6   : > { %v5919_v47 = vadd.f32 %v5647_v17, %v2090_v60  ;;  %v5923_v29 = vadd.f32 %v5647_v17, %v6655_v0  ;;  %v2156_v13 = vmul.f32 0.5, %v5889_v22  ;;  %v5928_v38 = vadd.f32 %v5647_v17, %v6656_v57  ;;  %v6664_v0 = vld [vmem:[#allocation55_spill] sm:$0xff]  ;;  %v2362_v57 = vld [vmem:[%s6430_s7 + $0x50] sm:$0xff] }
 0x2a7   : > { %v2157_v33 = vmul.f32 0.5, %v5898_v9  ;;  %v2158_v10 = vmul.f32 0.5, %v5901_v23  ;;  %3710 = vtanh.f32 %v2153_v31  ;;  %v2276_v56 = vmul.f32 0.5, %v2244_v18 }
 0x2a8   : > { %3712 = vtanh.f32 %v2154_v51  ;;  %v2159_v5 = vmul.f32 0.5, %v5910_v20  ;;  %v4081_v45 = vmov 0.0   ;;  %v2112_v4 = vmul.f32 %v5630_v6, %v2073_v50  ;;  %v2365_v6 = vld [vmem:[%s6430_s7 + $0x68] sm:$0xff]  ;;  %v2363_v50 = vld [vmem:[%s6430_s7 + $0x58] sm:$0xff] }
 0x2a9   : > { %3714 = vtanh.f32 %v2155_v59  ;;  %3401 = vmatprep.subr.mxu0 %v4081_v45  ;;  %3433 = vmatprep.mubr.msk.f32.mxu0 %vm4082_vm3, %v4081_v45  ;;  %v5943_v14 = vadd.f32 %v5647_v17, %v2110_v24  ;;  %v2160_v49 = vmul.f32 0.5, %v5914_v44  ;;  %v2161_v34 = vmul.f32 0.5, %v5919_v47  ;;  %v6661_v24 = vld [vmem:[#allocation71_spill] sm:$0xff] }
 0x2aa   : > { %3716 = vtanh.f32 %v2156_v13  ;;  %3402 = vmatpush3.msra.mxu0 %v2367_v40  ;;  %v2243_v46 = vadd.f32 1.0, %v3707_v19  ;;  %v2163_v21 = vmul.f32 0.5, %v5923_v29  ;;  %v2165_v36 = vmul.f32 0.5, %v5928_v38  ;;  %v6663_v19 = vld [vmem:[#allocation61_spill] sm:$0xff] }
 0x2ab   : > { %3718 = vtanh.f32 %v2157_v33  ;;  %3403 = vmatprep.subr.mxu0 %v4081_v45  ;;  %v5954_v32 = vadd.f32 %v5647_v17, %v2112_v4  ;;  %v5957_v53 = vmul.f32 %v2276_v56, %v5822_v41  ;;  %v5960_v3 = vadd.f32 %v5647_v17, %v2113_v55  ;;  %v6659_v41 = vld [vmem:[#allocation69_spill] sm:$0xff] }
 0x2ac   : > { %3720 = vtanh.f32 %v2158_v10  ;;  %3404 = vmatpush3.msra.mxu0 %v2366_v26  ;;  %v2275_v42 = vmul.f32 0.5, %v2243_v46  ;;  %v2181_v11 = vmul.f32 0.5, %v5943_v14  ;;  %v2751_v28 = vpack.c.bf16 %v6658_v7, %v6657_v15  ;;  %v2361_v33 = vld [vmem:[%s6430_s7 + $0x48] sm:$0xff] }
 0x2ad   : > { %3722 = vtanh.f32 %v2159_v5  ;;  %3405 = vmatprep.subr.mxu0 %v4081_v45  ;;  %v2752_v48 = vpack.c.bf16 %v6660_v62, %v6659_v41  ;;  %v2183_v17 = vmul.f32 0.5, %v5954_v32  ;;  %v2753_v58 = vpack.c.bf16 %v5614_v61, %v5596_v30 }
 0x2ae   : > { %3724 = vtanh.f32 %v2160_v49  ;;  %3406 = vmatpush3.msra.mxu0 %v2365_v6  ;;  %v5973_v2 = vmul.f32 %v2275_v42, %v5811_v43  ;;  %v2228_v27 = vadd.f32 1.0, %v6662_v63  ;;  %v2184_v51 = vmul.f32 0.5, %v5960_v3 }
 0x2af   : > { %v3709_v60 = vpop.eup %3708  ;;  %3726 = vtanh.f32 %v2161_v34  ;;  %3407 = vmatprep.subr.mxu0 %v4081_v45  ;;  %v2230_v18 = vadd.f32 1.0, %v6663_v19  ;;  %v2226_v13 = vadd.f32 1.0, %v6664_v0  ;;  %v2360_v34 = vld [vmem:[%s6430_s7 + $0x40] sm:$0xff]  ;;  %v6666_v19 = vld [vmem:[#allocation57_spill] sm:$0xff] }
 0x2b0   : > { %3728 = vtanh.f32 %v2163_v21  ;;  %3408 = vmatpush3.msra.mxu0 %v2364_v16  ;;  %v2246_v10 = vadd.f32 1.0, %v3709_v60  ;;  %v2260_v56 = vmul.f32 0.5, %v2228_v27  ;;  %v2359_v16 = vld [vmem:[%s6430_s7 + $0x38] sm:$0xff]  ;;  %v6665_v60 = vld [vmem:[#allocation56_spill] sm:$0xff] }
 0x2b1   : > { %3730 = vtanh.f32 %v2165_v36  ;;  %3409 = vmatprep.subr.mxu0 %v4081_v45  ;;  %v2262_v26 = vmul.f32 0.5, %v2230_v18  ;;  %v2258_v49 = vmul.f32 0.5, %v2226_v13 }
 0x2b2   : > { %3410 = vmatpush3.msra.mxu0 %v2363_v50  ;;  %3732 = vtanh.f32 %v2181_v11  ;;  %v2278_v11 = vmul.f32 0.5, %v2246_v10  ;;  %v6010_v50 = vmul.f32 %v2260_v56, %v6665_v60  ;;  %v2358_v10 = vld [vmem:[%s6430_s7 + $0x30] sm:$0xff] }
 0x2b3   : > { %3411 = vmatprep.subr.mxu0 %v4081_v45  ;;  %3734 = vtanh.f32 %v2183_v17  ;;  %v6013_v18 = vmul.f32 %v2262_v26, %v6666_v19 }
 0x2b4   : > { %v3711_v40 = vpop.eup %3710  ;;  %3412 = vmatpush3.msra.mxu0 %v2362_v57  ;;  %3736 = vtanh.f32 %v2184_v51  ;;  %v6667_v57 = vld [vmem:[#allocation51_spill] sm:$0xff] }
 0x2b5   : > { %v3713_v5 = vpop.eup %3712  ;;  %v2217_v4 = vadd.f32 1.0, %v3711_v40  ;;  %3413 = vmatprep.subr.mxu0 %v4081_v45 }
 0x2b6   : > { %v3715_v46 = vpop.eup %3714  ;;  %v2218_v21 = vadd.f32 1.0, %v3713_v5  ;;  %3414 = vmatpush3.msra.mxu0 %v2361_v33  ;;  %v6016_v33 = vmul.f32 %v2258_v49, %v6667_v57 }
 0x2b7   : > { %v3717_v36 = vpop.eup %3716  ;;  %v2219_v6 = vadd.f32 1.0, %v3715_v46  ;;  %v2249_v42 = vmul.f32 0.5, %v2217_v4  ;;  %3415 = vmatprep.subr.mxu0 %v4081_v45 }
 0x2b8   : > { %v3719_v17 = vpop.eup %3718  ;;  %v2220_v63 = vadd.f32 1.0, %v3717_v36  ;;  %v2250_v27 = vmul.f32 0.5, %v2218_v21  ;;  %3416 = vmatpush3.msra.mxu0 %v2360_v34  ;;  %v2357_v36 = vld [vmem:[%s6430_s7 + $0x28] sm:$0xff] }
 0x2b9   : > { %v3721_v51 = vpop.eup %3720  ;;  %v2221_v0 = vadd.f32 1.0, %v3719_v17  ;;  %v2251_v13 = vmul.f32 0.5, %v2219_v6  ;;  %3417 = vmatprep.subr.mxu0 %v4081_v45  ;;  %v2281_v4 = vmul.f32 %v2249_v42, %v5881_v1  ;;  %v6032_v6 = vmul.f32 %v2278_v11, %v5825_v8  ;;  %v2356_v8 = vld [vmem:[%s6430_s7 + $0x20] sm:$0xff] }
 0x2ba   : > { %v3723_v40 = vpop.eup %3722  ;;  %v2222_v56 = vadd.f32 1.0, %v3721_v51  ;;  %v2252_v5 = vmul.f32 0.5, %v2220_v63  ;;  %v2282_v34 = vmul.f32 %v2250_v27, %v5892_v25  ;;  %3418 = vmatpush3.msra.mxu0 %v2359_v16 }
 0x2bb   : > { %v3725_v26 = vpop.eup %3724  ;;  %v2223_v46 = vadd.f32 1.0, %v3723_v40  ;;  %v2253_v21 = vmul.f32 0.5, %v2221_v0  ;;  %v6025_v49 = vmul.f32 %v2251_v13, %v5895_v39  ;;  %3419 = vmatprep.subr.mxu0 %v4081_v45 }
 0x2bc   : > { %v3727_v17 = vpop.eup %3726  ;;  %v2224_v1 = vadd.f32 1.0, %v3725_v26  ;;  %v2254_v42 = vmul.f32 0.5, %v2222_v56  ;;  %v6035_v25 = vmul.f32 %v2252_v5, %v5889_v22  ;;  %v2313_v16 = vadd.f32 %v2282_v34, %v2281_v4  ;;  %3420 = vmatpush3.msra.mxu0 %v2358_v10  ;;  %v2355_v56 = vld [vmem:[%s6430_s7 + $0x18] sm:$0xff] }
 0x2bd   : > { %v3729_v60 = vpop.eup %3728  ;;  %v2225_v39 = vadd.f32 1.0, %v3727_v17  ;;  %v2255_v63 = vmul.f32 0.5, %v2223_v46  ;;  %v6038_v27 = vmul.f32 %v2253_v21, %v5898_v9  ;;  %v2744_v51 = vpack.c.bf16 %v2282_v34, %v2281_v4  ;;  %3421 = vmatprep.subr.mxu0 %v4081_v45  ;;  %v2354_v17 = vld [vmem:[%s6430_s7 + $0x10] sm:$0xff] }
 0x2be   : > { %v3731_v11 = vpop.eup %3730  ;;  %v2227_v19 = vadd.f32 1.0, %v3729_v60  ;;  %v2256_v0 = vmul.f32 0.5, %v2224_v1  ;;  %v6045_v22 = vmul.f32 %v2254_v42, %v5901_v23  ;;  %v2314_v13 = vadd.f32 %v2313_v16, %v6025_v49  ;;  %3422 = vmatpush3.msra.mxu0 %v2357_v36 }
 0x2bf   : > { %v3733_v57 = vpop.eup %3732  ;;  %v2229_v10 = vadd.f32 1.0, %v3731_v11  ;;  %v2257_v9 = vmul.f32 0.5, %v2225_v39  ;;  %v6049_v40 = vmul.f32 %v2255_v63, %v5910_v20  ;;  %3452 = vmatprep.mubr.bf16.mxu1 %v2744_v51  ;;  %3423 = vmatprep.subr.mxu0 %v4081_v45  ;;  %v2745_v23 = vpack.c.bf16 %v6035_v25, %v6025_v49  ;;  %v2353_v63 = vld [vmem:[%s6430_s7 + $0x8] sm:$0xff] }
 0x2c0   : > { %v3735_v5 = vpop.eup %3734  ;;  %v2259_v4 = vmul.f32 0.5, %v2227_v19  ;;  %v6058_v34 = vmul.f32 %v2256_v0, %v5914_v44  ;;  %v2315_v26 = vadd.f32 %v2314_v13, %v6035_v25  ;;  %3424 = vmatpush3.msra.mxu0 %v2356_v8  ;;  %v2245_v20 = vadd.f32 1.0, %v3733_v57  ;;  %v2352_v13 = vld [vmem:[%s6430_s7] sm:$0xff]  ;;  %v3778_v25 = vld [vmem:[%s4348_s3 + $0x18] sm:$0xff] }
 0x2c1   : > { %v3737_v46 = vpop.eup %3736  ;;  %v2261_v21 = vmul.f32 0.5, %v2229_v10  ;;  %v6062_v36 = vmul.f32 %v2257_v9, %v5919_v47  ;;  %3425 = vmatprep.subr.mxu0 %v4081_v45  ;;  %v2247_v1 = vadd.f32 1.0, %v3735_v5  ;;  %v2746_v44 = vpack.c.bf16 %v6045_v22, %v6038_v27 }
 0x2c2   : > { %v6071_v42 = vmul.f32 %v2259_v4, %v5923_v29  ;;  %v2316_v16 = vadd.f32 %v2315_v26, %v6038_v27  ;;  %3426 = vmatpush3.msra.mxu0 %v2355_v56  ;;  %v2248_v60 = vadd.f32 1.0, %v3737_v46  ;;  %v2277_v39 = vmul.f32 0.5, %v2245_v20  ;;  %v2513_v56 = vld [vmem:[%s6433_s10 + $0x8] sm:$0xff] }
 0x2c3   : > { %v6075_v47 = vmul.f32 %v2261_v21, %v5928_v38  ;;  %3427 = vmatprep.subr.mxu0 %v4081_v45  ;;  %v2279_v51 = vmul.f32 0.5, %v2247_v1  ;;  %v2747_v8 = vpack.c.bf16 %v6058_v34, %v6049_v40  ;;  %v2748_v29 = vpack.c.bf16 %v6016_v33, %v6062_v36 }
 0x2c4   : > { %v2317_v11 = vadd.f32 %v2316_v16, %v6045_v22  ;;  %3428 = vmatpush3.msra.mxu0 %v2354_v17  ;;  %v2280_v19 = vmul.f32 0.5, %v2248_v60  ;;  %v6087_v38 = vmul.f32 %v2277_v39, %v5943_v14  ;;  %v2749_v0 = vpack.c.bf16 %v6010_v50, %v6071_v42 }
 0x2c5   : > { %3429 = vmatprep.subr.mxu0 %v4081_v45  ;;  %v6096_v57 = vmul.f32 %v2279_v51, %v5954_v32  ;;  %v2750_v10 = vpack.c.bf16 %v6013_v18, %v6075_v47  ;;  %v2515_v32 = vld [vmem:[%s6433_s10 + $0x18] sm:$0xff] }
 0x2c6   : > { %v2318_v9 = vadd.f32 %v2317_v11, %v6049_v40  ;;  %3430 = vmatpush3.msra.mxu0 %v2353_v63  ;;  %v6102_v14 = vmul.f32 %v2280_v19, %v5960_v3 }
 0x2c7   : > { %3431 = vmatprep.subr.mxu0 %v4081_v45 }
 0x2c8   : > { %v2319_v5 = vadd.f32 %v2318_v9, %v6058_v34  ;;  %3432 = vmatpush3.msra.mxu0 %v2352_v13  ;;  %v3779_v34 = vld [vmem:[%s4348_s3 + $0x8] sm:$0xff] }
 0x2ca   : > { %v2320_v4 = vadd.f32 %v2319_v5, %v6062_v36 }
 0x2cc   : > { %v2321_v26 = vadd.f32 %v2320_v4, %v6016_v33 }
 0x2ce   : > { %v2322_v20 = vadd.f32 %v2321_v26, %v6071_v42 }
 0x2d0   : > { %v2323_v3 = vadd.f32 %v2322_v20, %v6010_v50  ;;  %v3777_v50 = vld [vmem:[%s4348_s3] sm:$0xff] }
 0x2d2   : > { %v2324_v46 = vadd.f32 %v2323_v3, %v6075_v47 }
 0x2d4   : > { %v2325_v21 = vadd.f32 %v2324_v46, %v6013_v18 }
 0x2d6   : > { %v2326_v45 = vadd.f32 %v2325_v21, %v6657_v15  ;;  %v6671_v15 = vpack.c.bf16 %v5885_v12, %v5793_v54 }
 0x2d8   : > { %v2327_v17 = vadd.f32 %v2326_v45, %v6658_v7  ;;  %v6672_v7 = vpack.c.bf16 %v5957_v53, %v5973_v2 }
 0x2da   : > { %v2328_v1 = vadd.f32 %v2327_v17, %v6659_v41 }
 0x2dc   : > { %v2329_v16 = vadd.f32 %v2328_v1, %v6660_v62  ;;  %v3776_v62 = vld [vmem:[%s4348_s3 + $0x10] sm:$0xff] }
 0x2de   : > { %v2330_v60 = vadd.f32 %v2329_v16, %v5596_v30  ;;  %v6673_v30 = vpack.c.bf16 %v6032_v6, %v6087_v38 }
 0x2e0   : > { %v2331_v39 = vadd.f32 %v2330_v60, %v5614_v61  ;;  %v6674_v61 = vpack.c.bf16 %v6102_v14, %v6096_v57 }
 0x2e2   : > { %v2332_v63 = vadd.f32 %v2331_v39, %v5617_v37 }
 0x2e4   : > { %v2333_v51 = vadd.f32 %v2332_v63, %v6661_v24  ;;  %v2368_v63 = vld [vmem:[%s6431_s8] sm:$0x1] }
 0x2e6   : > { %v2334_v11 = vadd.f32 %v2333_v51, %v5787_v52 }
 0x2e8   : > { %v2335_v19 = vadd.f32 %v2334_v11, %v5790_v35 }
 0x2ea   : > { %v2336_v13 = vadd.f32 %v2335_v19, %v5793_v54 }
 0x2ec   : > { %v2337_v9 = vadd.f32 %v2336_v13, %v5885_v12 }
 0x2ee   : > { %v2338_v5 = vadd.f32 %v2337_v9, %v5973_v2 }
 0x2f0   : > { %v2339_v4 = vadd.f32 %v2338_v5, %v5957_v53 }
 0x2f2   : > { %v2340_v26 = vadd.f32 %v2339_v4, %v6087_v38 }
 0x2f4   : > { %v2341_v20 = vadd.f32 %v2340_v26, %v6032_v6 }
 0x2f6   : > { %v2342_v3 = vadd.f32 %v2341_v20, %v6096_v57  ;;  %v2458_v20 = vld [vmem:[#allocation11 + $0x70] sm:$0xff] }
 0x2f8   : > { %v2343_v46 = vadd.f32 %v2342_v3, %v6102_v14  ;;  %v2456_v3 = vld [vmem:[#allocation11 + $0x60] sm:$0xff] }
 0x2fa   : > { %v2344_v21 = vrot.slane %v2343_v46, 4 }
 0x2fc   : > { %v2345_v45 = vadd.f32 %v2344_v21, %v2343_v46  ;;  %v6668_v46 = vld [vmem:[#allocation20_spill] sm:$0xff] }
 0x2fe   : > { %v2346_v17 = vrot.slane %v2345_v45, 2 }
 0x300   : > { %v2347_v1 = vadd.f32 %v2346_v17, %v2345_v45 }
 0x302   : > { %v2348_v16 = vrot.slane %v2347_v1, 1 }
 0x304   : > { %v2349_v60 = vadd.f32 %v2348_v16, %v2347_v1  ;;  %v2459_v1 = vld [vmem:[#allocation11 + $0x78] sm:$0xff]  ;;  %v2457_v16 = vld [vmem:[#allocation11 + $0x68] sm:$0xff] }
 0x306   : > { %v2351_v39 = vmul.f32 0.00390625, %v2349_v60 }
 0x308   : > { %3434 = vmatmul.mubr.f32.vlgmr.msra.gmra.mxu0 %v2351_v39 }
 0x3c8   : > { %v2435_v51 = vpop.f32.mrf.mxu0 }
 0x3c9   : > { %v2436_v11 = vadd.f32 %v2435_v51, %v2368_v63  ;;  %v2455_v63 = vld [vmem:[#allocation11 + $0x58] sm:$0xff]  ;;  %v2454_v51 = vld [vmem:[#allocation11 + $0x50] sm:$0xff] }
 0x3ca   : > { %v3435_v19 = vpop.f32.mrf.mxu0 }
 0x3cb   : > { %v2439_v13 = vmul.f32 0.5, %v2436_v11 }
 0x3cd   : > { %3738 = vtanh.f32 %v2439_v13 }
 0x3da   : > { %v3739_v9 = vpop.eup %3738 }
 0x3db   : > { %v2441_v5 = vadd.f32 1.0, %v3739_v9  ;;  %v2453_v9 = vld [vmem:[#allocation11 + $0x48] sm:$0xff] }
 0x3dd   : > { %v2442_v4 = vmul.f32 0.5, %v2441_v5 }
 0x3df   : > { %v2443_v26 = vmul.f32 %v2442_v4, %v2436_v11  ;;  %v2452_v11 = vld [vmem:[#allocation11 + $0x40] sm:$0xff] }
 0x3e1   : > { %v2463_v21 = vrot.slane %v2443_v26, %v6668_v46  ;;  %v2451_v26 = vld [vmem:[#allocation11 + $0x38] sm:$0xff] }
 0x3e3   : > { %v2478_v45 = vmul.f32 %v2463_v21, %v2458_v20  ;;  %v2476_v17 = vmul.f32 %v2463_v21, %v2456_v3  ;;  %v2479_v60 = vmul.f32 %v2463_v21, %v2459_v1  ;;  %v2477_v39 = vmul.f32 %v2463_v21, %v2457_v16  ;;  %v2450_v20 = vld [vmem:[#allocation11 + $0x30] sm:$0xff] }
 0x3e4   : > { %v2475_v19 = vmul.f32 %v2463_v21, %v2455_v63  ;;  %v2474_v13 = vmul.f32 %v2463_v21, %v2454_v51  ;;  %v2473_v5 = vmul.f32 %v2463_v21, %v2453_v9  ;;  %v2472_v4 = vmul.f32 %v2463_v21, %v2452_v11 }
 0x3e5   : > { %2508 = vadd.xlane.f32.xlu0 %v2478_v45  ;;  %2504 = vadd.xlane.f32.xlu1 %v2476_v17  ;;  %v2471_v3 = vmul.f32 %v2463_v21, %v2451_v26  ;;  %v2470_v46 = vmul.f32 %v2463_v21, %v2450_v20  ;;  %v2449_v45 = vld [vmem:[#allocation11 + $0x28] sm:$0xff]  ;;  %v2448_v17 = vld [vmem:[#allocation11 + $0x20] sm:$0xff] }
 0x3e6   : > { %v2469_v1 = vmul.f32 %v2463_v21, %v2449_v45  ;;  %v2468_v16 = vmul.f32 %v2463_v21, %v2448_v17  ;;  %v2524_v26 = vld [vmem:[%s6433_s10 + $0x60] sm:$0xff]  ;;  %v2525_v17 = vld [vmem:[%s6433_s10 + $0x68] sm:$0xff] }
 0x3e9   : > { %2510 = vadd.xlane.f32.xlu0 %v2479_v60  ;;  %2506 = vadd.xlane.f32.xlu1 %v2477_v39  ;;  %v2447_v60 = vld [vmem:[#allocation11 + $0x18] sm:$0xff]  ;;  %v2446_v39 = vld [vmem:[#allocation11 + $0x10] sm:$0xff] }
 0x3ea   : > { %v2467_v63 = vmul.f32 %v2463_v21, %v2447_v60  ;;  %v2466_v51 = vmul.f32 %v2463_v21, %v2446_v39 }
 0x3ed   : > { %2502 = vadd.xlane.f32.xlu1 %v2475_v19  ;;  %2500 = vadd.xlane.f32.xlu0 %v2474_v13  ;;  %v2445_v19 = vld [vmem:[#allocation11 + $0x8] sm:$0xff]  ;;  %v2444_v13 = vld [vmem:[#allocation11] sm:$0xff] }
 0x3ee   : > { %v2465_v9 = vmul.f32 %v2463_v21, %v2445_v19  ;;  %v2464_v11 = vmul.f32 %v2463_v21, %v2444_v13  ;;  %v2527_v21 = vld [vmem:[%s6433_s10 + $0x78] sm:$0xff]  ;;  %v2522_v19 = vld [vmem:[%s6433_s10 + $0x50] sm:$0xff] }
 0x3f1   : > { %2498 = vadd.xlane.f32.xlu1 %v2473_v5  ;;  %2496 = vadd.xlane.f32.xlu0 %v2472_v4  ;;  %v4083_v5 = vmov 0   ;;  %v2526_v4 = vld [vmem:[%s6433_s10 + $0x70] sm:$0xff] }
 0x3f2   : > { %3600 = vset.pattern.permute.xlu0 %v4083_v5  ;;  %3601 = vset.pattern.permute.xlu1 %v4083_v5 }
 0x3f5   : > { %2494 = vadd.xlane.f32.xlu1 %v2471_v3  ;;  %2492 = vadd.xlane.f32.xlu0 %v2470_v46 }
 0x3f9   : > { %2490 = vadd.xlane.f32.xlu1 %v2469_v1  ;;  %2488 = vadd.xlane.f32.xlu0 %v2468_v16 }
 0x3fd   : > { %2486 = vadd.xlane.f32.xlu1 %v2467_v63  ;;  %2484 = vadd.xlane.f32.xlu0 %v2466_v51 }
 0x401   : > { %2482 = vadd.xlane.f32.xlu1 %v2465_v9  ;;  %2480 = vadd.xlane.f32.xlu0 %v2464_v11 }
 0x46e   : > { %v2509_v20 = vpop.xlane.xlu0 %2508  ;;  %v2505_v3 = vpop.xlane.xlu1 %2504 }
 0x46f   : > { %v2542_v46 = vadd.f32 %v2526_v4, %v2509_v20  ;;  %v2540_v45 = vadd.f32 %v2524_v26, %v2505_v3  ;;  %v2523_v4 = vld [vmem:[%s6433_s10 + $0x58] sm:$0xff] }
 0x471   : > { %v2558_v1 = vmul.f32 0.5, %v2542_v46  ;;  %v2556_v16 = vmul.f32 0.5, %v2540_v45 }
 0x472   : > { %v2511_v60 = vpop.xlane.xlu0 %2510  ;;  %v2507_v39 = vpop.xlane.xlu1 %2506 }
 0x473   : > { %3740 = vtanh.f32 %v2558_v1  ;;  %v2543_v63 = vadd.f32 %v2527_v21, %v2511_v60  ;;  %v2541_v51 = vadd.f32 %v2525_v17, %v2507_v39  ;;  %v2520_v21 = vld [vmem:[%s6433_s10 + $0x40] sm:$0xff]  ;;  %v2519_v17 = vld [vmem:[%s6433_s10 + $0x38] sm:$0xff] }
 0x474   : > { %3742 = vtanh.f32 %v2556_v16 }
 0x475   : > { %v2559_v13 = vmul.f32 0.5, %v2543_v63  ;;  %v2557_v5 = vmul.f32 0.5, %v2541_v51  ;;  %v2521_v63 = vld [vmem:[%s6433_s10 + $0x48] sm:$0xff] }
 0x476   : > { %v2503_v9 = vpop.xlane.xlu1 %2502  ;;  %v2501_v11 = vpop.xlane.xlu0 %2500 }
 0x477   : > { %3744 = vtanh.f32 %v2559_v13  ;;  %v2538_v26 = vadd.f32 %v2522_v19, %v2501_v11  ;;  %v2539_v20 = vadd.f32 %v2523_v4, %v2503_v9  ;;  %v2517_v13 = vld [vmem:[%s6433_s10 + $0x28] sm:$0xff] }
 0x478   : > { %3746 = vtanh.f32 %v2557_v5 }
 0x479   : > { %v2554_v45 = vmul.f32 0.5, %v2538_v26  ;;  %v2555_v1 = vmul.f32 0.5, %v2539_v20 }
 0x47a   : > { %v2499_v3 = vpop.xlane.xlu1 %2498  ;;  %v2497_v46 = vpop.xlane.xlu0 %2496 }
 0x47b   : > { %v2536_v16 = vadd.f32 %v2520_v21, %v2497_v46  ;;  %3748 = vtanh.f32 %v2554_v45  ;;  %v2537_v5 = vadd.f32 %v2521_v63, %v2499_v3  ;;  %v2518_v46 = vld [vmem:[%s6433_s10 + $0x30] sm:$0xff] }
 0x47c   : > { %3750 = vtanh.f32 %v2555_v1 }
 0x47d   : > { %v2552_v4 = vmul.f32 0.5, %v2536_v16  ;;  %v2553_v3 = vmul.f32 0.5, %v2537_v5 }
 0x47e   : > { %v2495_v60 = vpop.xlane.xlu1 %2494  ;;  %v2493_v39 = vpop.xlane.xlu0 %2492 }
 0x47f   : > { %v2535_v51 = vadd.f32 %v2519_v17, %v2495_v60  ;;  %v2534_v16 = vadd.f32 %v2518_v46, %v2493_v39 }
 0x480   : > { %v3741_v19 = vpop.eup %3740 }
 0x481   : > { %v2551_v9 = vmul.f32 0.5, %v2535_v51  ;;  %v2590_v11 = vadd.f32 1.0, %v3741_v19  ;;  %v3743_v20 = vpop.eup %3742  ;;  %v2516_v19 = vld [vmem:[%s6433_s10 + $0x20] sm:$0xff]  ;;  %v2550_v5 = vmul.f32 0.5, %v2534_v16 }
 0x482   : > { %v2491_v26 = vpop.xlane.xlu1 %2490  ;;  %v2489_v60 = vpop.xlane.xlu0 %2488 }
 0x483   : > { %3752 = vtanh.f32 %v2551_v9  ;;  %v2533_v45 = vadd.f32 %v2517_v13, %v2491_v26  ;;  %v2606_v21 = vmul.f32 0.5, %v2590_v11  ;;  %v2588_v11 = vadd.f32 1.0, %v3743_v20 }
 0x484   : > { %v3745_v17 = vpop.eup %3744  ;;  %3754 = vtanh.f32 %v2552_v4  ;;  %v2532_v4 = vadd.f32 %v2516_v19, %v2489_v60 }
 0x485   : > { %v2549_v51 = vmul.f32 0.5, %v2533_v45  ;;  %2712 = vperm.xlu0 %3600, %v2606_v21   ;;  %v2591_v1 = vadd.f32 1.0, %v3745_v17  ;;  %v3747_v26 = vpop.eup %3746  ;;  %v2604_v17 = vmul.f32 0.5, %v2588_v11 }
 0x486   : > { %v2487_v63 = vpop.xlane.xlu1 %2486  ;;  %v2485_v39 = vpop.xlane.xlu0 %2484 }
 0x487   : > { %3756 = vtanh.f32 %v2549_v51  ;;  %v2531_v13 = vadd.f32 %v2515_v32, %v2487_v63  ;;  %v2607_v9 = vmul.f32 0.5, %v2591_v1  ;;  %v2589_v51 = vadd.f32 1.0, %v3747_v26  ;;  %v2514_v32 = vld [vmem:[%s6433_s10 + $0x10] sm:$0xff] }
 0x488   : > { %3758 = vtanh.f32 %v2553_v3  ;;  %v3749_v59 = vpop.eup %3748  ;;  %v2548_v1 = vmul.f32 0.5, %v2532_v4 }
 0x489   : > { %v2547_v45 = vmul.f32 0.5, %v2531_v13  ;;  %2717 = vperm.xlu1 %3601, %v2607_v9   ;;  %v3751_v63 = vpop.eup %3750  ;;  %v2530_v13 = vadd.f32 %v2514_v32, %v2485_v39  ;;  %v2605_v3 = vmul.f32 0.5, %v2589_v51  ;;  %v2586_v60 = vadd.f32 1.0, %v3749_v59 }
 0x48a   : > { %v2483_v46 = vpop.xlane.xlu1 %2482  ;;  %v2481_v19 = vpop.xlane.xlu0 %2480  ;;  %v2587_v11 = vadd.f32 1.0, %v3751_v63 }
 0x48b   : > { %3760 = vtanh.f32 %v2547_v45  ;;  %v2529_v21 = vadd.f32 %v2513_v56, %v2483_v46  ;;  %v2512_v56 = vld [vmem:[%s6433_s10] sm:$0xff]  ;;  %v2546_v45 = vmul.f32 0.5, %v2530_v13 }
 0x48c   : > { %3762 = vtanh.f32 %v2550_v5  ;;  %v2528_v46 = vadd.f32 %v2512_v56, %v2481_v19  ;;  %v2602_v5 = vmul.f32 0.5, %v2586_v60  ;;  %v2603_v59 = vmul.f32 0.5, %v2587_v11 }
 0x48d   : > { %v2545_v20 = vmul.f32 0.5, %v2529_v21  ;;  %2702 = vperm.xlu1 %3601, %v2604_v17  }
 0x48e   : > { %v2544_v51 = vmul.f32 0.5, %v2528_v46 }
 0x48f   : > { %3764 = vtanh.f32 %v2545_v20 }
 0x490   : > { %v3753_v16 = vpop.eup %3752  ;;  %3766 = vtanh.f32 %v2548_v1 }
 0x491   : > { %2707 = vperm.xlu1 %3601, %v2605_v3   ;;  %v2583_v9 = vadd.f32 1.0, %v3753_v16  ;;  %v3755_v26 = vpop.eup %3754  ;;  %3768 = vtanh.f32 %v2546_v45 }
 0x492   : > { %v2584_v20 = vadd.f32 1.0, %v3755_v26  ;;  %3770 = vtanh.f32 %v2544_v51  ;;  %v3287_v51 = vld [vmem:[#allocation13 + $0x38] sm:$0xff]  }
 0x493   : > { %v2599_v4 = vmul.f32 0.5, %v2583_v9 }
 0x494   : > { %v3757_v21 = vpop.eup %3756  ;;  %v2600_v13 = vmul.f32 0.5, %v2584_v20  ;;  %v3280_v20 = vunpack.c.h.bf16 %v3287_v51 }
 0x495   : > { %2692 = vperm.xlu1 %3601, %v2602_v5   ;;  %2677 = vperm.xlu0 %3600, %v2599_v4   ;;  %v2581_v39 = vadd.f32 1.0, %v3757_v21  ;;  %v3759_v17 = vpop.eup %3758 }
 0x496   : > { %v2585_v60 = vadd.f32 1.0, %v3759_v17 }
 0x497   : > { %v2597_v32 = vmul.f32 0.5, %v2581_v39 }
 0x498   : > { %v3761_v43 = vpop.eup %3760  ;;  %v2601_v9 = vmul.f32 0.5, %v2585_v60  ;;  %v3286_v60 = vld [vmem:[#allocation13 + $0x30] sm:$0xff]  }
 0x499   : > { %2697 = vperm.xlu1 %3601, %v2603_v59   ;;  %2667 = vperm.xlu0 %3600, %v2597_v32   ;;  %v2579_v1 = vadd.f32 1.0, %v3761_v43  ;;  %v3763_v63 = vpop.eup %3762  ;;  %v3279_v32 = vunpack.c.l.bf16 %v3287_v51  ;;  %v3284_v51 = vld [vmem:[#allocation13 + $0x20] sm:$0xff]  }
 0x49a   : > { %v2582_v45 = vadd.f32 1.0, %v3763_v63 }
 0x49b   : > { %v2595_v3 = vmul.f32 0.5, %v2579_v1 }
 0x49c   : > { %v3765_v16 = vpop.eup %3764  ;;  %v2598_v26 = vmul.f32 0.5, %v2582_v45 }
 0x49d   : > { %2682 = vperm.xlu1 %3601, %v2600_v13   ;;  %2657 = vperm.xlu0 %3600, %v2595_v3   ;;  %v2577_v56 = vadd.f32 1.0, %v3765_v16  ;;  %v3767_v19 = vpop.eup %3766 }
 0x49e   : > { %v2580_v46 = vadd.f32 1.0, %v3767_v19  ;;  %v3769_v5 = vpop.eup %3768  ;;  %v3275_v19 = vunpack.c.l.bf16 %v3286_v60 }
 0x49f   : > { %v2593_v11 = vmul.f32 0.5, %v2577_v56  ;;  %v2578_v4 = vadd.f32 1.0, %v3769_v5  ;;  %v3771_v21 = vpop.eup %3770 }
 0x4a0   : > { %v2596_v43 = vmul.f32 0.5, %v2580_v46  ;;  %v2576_v59 = vadd.f32 1.0, %v3771_v21  ;;  %v3285_v46 = vld [vmem:[#allocation13 + $0x28] sm:$0xff]  }
 0x4a1   : > { %2687 = vperm.xlu1 %3601, %v2601_v9   ;;  %2647 = vperm.xlu0 %3600, %v2593_v11   ;;  %v2594_v39 = vmul.f32 0.5, %v2578_v4  ;;  %v3276_v9 = vunpack.c.h.bf16 %v3286_v60  ;;  %v3271_v4 = vunpack.c.l.bf16 %v3285_v46  ;;  %v3272_v21 = vunpack.c.h.bf16 %v3285_v46 }
 0x4a2   : > { %v2592_v17 = vmul.f32 0.5, %v2576_v59 }
 0x4a5   : > { %2672 = vperm.xlu1 %3601, %v2598_v26  }
 0x4a9   : > { %2662 = vperm.xlu1 %3601, %v2596_v43  }
 0x4ad   : > { %2652 = vperm.xlu1 %3601, %v2594_v39  }
 0x4b1   : > { %2642 = vperm.xlu1 %3601, %v2592_v17  }
 0x500   : > { %v2713_v1 = vpop.permute.xlu0 %2712 }
 0x501   : > { %v2734_v13 = vmul.f32 %v3279_v32, %v2713_v1 }
 0x504   : > { %v2718_v63 = vpop.permute.xlu1 %2717 }
 0x505   : > { %v2735_v3 = vmul.f32 %v3280_v20, %v2718_v63  ;;  %v3267_v63 = vunpack.c.l.bf16 %v3284_v51 }
 0x507   : > { %v2743_v16 = vpack.c.bf16 %v2735_v3, %v2734_v13  ;;  %v3268_v13 = vunpack.c.h.bf16 %v3284_v51  ;;  %v3283_v3 = vld [vmem:[#allocation13 + $0x18] sm:$0xff]  }
 0x508   : > { %v2703_v56 = vpop.permute.xlu1 %2702 }
 0x509   : > { %3436 = vmatprep.subr.bf16.mxu1 %v2743_v16  ;;  %v2732_v45 = vmul.f32 %v3275_v19, %v2703_v56 }
 0x50a   : > { %3437 = vmatpush3.bf16.msra.mxu1 %v2743_v16  ;;  %v3264_v16 = vunpack.c.h.bf16 %v3283_v3 }
 0x50c   : > { %v2708_v11 = vpop.permute.xlu1 %2707 }
 0x50d   : > { %v2733_v26 = vmul.f32 %v3276_v9, %v2708_v11  ;;  %v3263_v9 = vunpack.c.l.bf16 %v3283_v3  ;;  %v3282_v11 = vld [vmem:[#allocation13 + $0x10] sm:$0xff]  }
 0x50f   : > { %v2742_v5 = vpack.c.bf16 %v2733_v26, %v2732_v45 }
 0x510   : > { %v2693_v43 = vpop.permute.xlu1 %2692  ;;  %v2678_v20 = vpop.permute.xlu0 %2677 }
 0x511   : > { %3438 = vmatprep.subr.bf16.mxu1 %v2742_v5  ;;  %v2730_v59 = vmul.f32 %v3271_v4, %v2693_v43  ;;  %v3260_v43 = vunpack.c.h.bf16 %v3282_v11 }
 0x512   : > { %3439 = vmatpush3.bf16.msra.mxu1 %v2742_v5  ;;  %v2727_v5 = vmul.f32 %v3264_v16, %v2678_v20 }
 0x514   : > { %v2698_v39 = vpop.permute.xlu1 %2697  ;;  %v2668_v45 = vpop.permute.xlu0 %2667 }
 0x515   : > { %v2731_v17 = vmul.f32 %v3272_v21, %v2698_v39  ;;  %v3259_v21 = vunpack.c.l.bf16 %v3282_v11  ;;  %v3281_v39 = vld [vmem:[#allocation13 + $0x8] sm:$0xff]  }
 0x516   : > { %v3256_v31 = vunpack.c.h.bf16 %v3281_v39 }
 0x517   : > { %v2741_v32 = vpack.c.bf16 %v2731_v17, %v2730_v59 }
 0x518   : > { %v2683_v1 = vpop.permute.xlu1 %2682  ;;  %v2658_v17 = vpop.permute.xlu0 %2657 }
 0x519   : > { %3440 = vmatprep.subr.bf16.mxu1 %v2741_v32  ;;  %v2728_v56 = vmul.f32 %v3267_v63, %v2683_v1  ;;  %v3255_v1 = vunpack.c.l.bf16 %v3281_v39  ;;  %v3250_v63 = vld [vmem:[#allocation13] sm:$0xff]  }
 0x51a   : > { %3441 = vmatpush3.bf16.msra.mxu1 %v2741_v32  ;;  %v2725_v32 = vmul.f32 %v3260_v43, %v2668_v45  ;;  %v3252_v20 = vunpack.c.h.bf16 %v3250_v63 }
 0x51c   : > { %v2688_v60 = vpop.permute.xlu1 %2687 }
 0x51d   : > { %v2729_v19 = vmul.f32 %v3268_v13, %v2688_v60  ;;  %v2723_v60 = vmul.f32 %v3256_v31, %v2658_v17  ;;  %v6670_v31 = vpack.c.bf16 %v5790_v35, %v5787_v52  ;;  %v6239_v35 = vld [vmem:[%s6676_s6] ss:$0 sm:$0xff] }
 0x51f   : > { %v2740_v26 = vpack.c.bf16 %v2729_v19, %v2728_v56  ;;  %v3251_v56 = vunpack.c.l.bf16 %v3250_v63  ;;  %v2648_v19 = vpop.permute.xlu0 %2647 }
 0x520   : > { %v2673_v46 = vpop.permute.xlu1 %2672 }
 0x521   : > { %v2726_v4 = vmul.f32 %v3263_v9, %v2673_v46  ;;  %3442 = vmatprep.subr.bf16.mxu1 %v2740_v26 }
 0x522   : > { %3443 = vmatpush3.bf16.msra.mxu1 %v2740_v26  ;;  %v2721_v26 = vmul.f32 %v3252_v20, %v2648_v19 }
 0x523   : > { %v2739_v59 = vpack.c.bf16 %v2727_v5, %v2726_v4 }
 0x524   : > { %v2663_v51 = vpop.permute.xlu1 %2662 }
 0x525   : > { %v2724_v55 = vmul.f32 %v3259_v21, %v2663_v51  ;;  %3444 = vmatprep.subr.bf16.mxu1 %v2739_v59  ;;  %v3782_v21 = vld [vmem:[%s4348_s3 + $0x38] sm:$0xff] }
 0x526   : > { %3445 = vmatpush3.bf16.msra.mxu1 %v2739_v59 }
 0x527   : > { %v2738_v13 = vpack.c.bf16 %v2725_v32, %v2724_v55  ;;  %v6669_v55 = vpack.c.bf16 %v6661_v24, %v5617_v37  ;;  %v6234_v37 = vld [vmem:[%s6675_s13] ss:$0 sm:$0xff]  ;;  %v3783_v32 = vld [vmem:[%s4348_s3 + $0x28] sm:$0xff]  ;;  %s3996_s13 = sshll.u32 %s4084_s23, 4  ;;  %s3997_s13 = int_to_ptr.vmem [resolvable:$false] %s3996_s13 }
 0x528   : > { %v2653_v3 = vpop.permute.xlu1 %2652  ;;  %s3998_s25 = scalar_lea.vmem %s3997_s13, 8192  ;;  %p3999_p7 = scmp.lt.s32.totalorder %s6377_s17, %s3997_s13 }
 0x529   : > { %v2722_v16 = vmul.f32 %v3255_v1, %v2653_v3  ;;  %3446 = vmatprep.subr.bf16.mxu1 %v2738_v13  ;;  %p4000_p11 = scmp.lt.s32.totalorder %s3998_s25, %s3992_s27 }
 0x52a   : > { %3447 = vmatpush3.bf16.msra.mxu1 %v2738_v13 }
 0x52b   : > { %v2737_v9 = vpack.c.bf16 %v2723_v60, %v2722_v16  ;;  %v3784_v60 = vld [vmem:[%s4348_s3 + $0x50] sm:$0xff]  ;;  %p4001_p4 = por %p4000_p11, %p3999_p7 }
 0x52c   : > { %v2643_v11 = vpop.permute.xlu1 %2642 }
 0x52d   : > { %v2720_v46 = vmul.f32 %v3251_v56, %v2643_v11  ;;  %3448 = vmatprep.subr.bf16.mxu1 %v2737_v9  ;;  %p4002_p3 = pnand %p4001_p4, %p3995_p9 }
 0x52e   : > { %3449 = vmatpush3.bf16.msra.mxu1 %v2737_v9  ;;  %v3785_v9 = vld [vmem:[%s4348_s3 + $0x40] sm:$0xff] }
 0x52f   : > { %v2736_v45 = vpack.c.bf16 %v2721_v26, %v2720_v46 }
 0x531   : > { %3450 = vmatprep.subr.bf16.mxu1 %v2736_v45 }
 0x532   : > { %3451 = vmatpush3.bf16.msra.mxu1 %v2736_v45 }
 0x535   : > { %3453 = vmatmul.mubr.bf16.vlgmr.msra.gmra.mxu1 %v2745_v23 }
 0x536   : > { %3456 = vmatprep.mubr.bf16.mxu1 %v2746_v44 }
 0x53d   : > { %3457 = vmatmul.mubr.bf16.gmra.mxu1 %v2747_v8  ;;  %v3780_v8 = vld [vmem:[%s4348_s3 + $0x30] sm:$0xff] }
 0x53e   : > { %3460 = vmatprep.mubr.bf16.mxu1 %v2748_v29 }
 0x545   : > { %3461 = vmatmul.mubr.bf16.gmra.mxu1 %v2749_v0 }
 0x546   : > { %3464 = vmatprep.mubr.bf16.mxu1 %v2750_v10  ;;  %v3781_v10 = vld [vmem:[%s4348_s3 + $0x20] sm:$0xff] }
 0x54d   : > { %3465 = vmatmul.mubr.bf16.gmra.mxu1 %v2751_v28 }
 0x54e   : > { %3468 = vmatprep.mubr.bf16.mxu1 %v2752_v48 }
 0x555   : > { %3469 = vmatmul.mubr.bf16.gmra.mxu1 %v2753_v58 }
 0x556   : > { %3472 = vmatprep.mubr.bf16.mxu1 %v6669_v55  ;;  %v3786_v55 = vld [vmem:[%s4348_s3 + $0x58] sm:$0xff] }
 0x55d   : > { %3473 = vmatmul.mubr.bf16.gmra.mxu1 %v6670_v31 }
 0x55e   : > { %3476 = vmatprep.mubr.bf16.mxu1 %v6671_v15 }
 0x565   : > { %3477 = vmatmul.mubr.bf16.gmra.mxu1 %v6672_v7 }
 0x566   : > { %3480 = vmatprep.mubr.bf16.mxu1 %v6673_v30 }
 0x56d   : > { %3481 = vmatmul.mubr.bf16.gmra.mxu1 %v6674_v61  ;;  %v3787_v61 = vld [vmem:[%s4348_s3 + $0x48] sm:$0xff] }
 0x5f5   : > { %v3454_v52 = vpop.f32.mrf.mxu1 }
 0x5f6   : > { %v2930_v54 = vmul.f32 %v3454_v52, %v6234_v37 }
 0x5f7   : > { %v2794_v12 = vpop.f32.mrf.mxu1 }
 0x5f8   : > { %v2969_v53 = vadd.f32 %v6239_v35, %v2930_v54  ;;  %v2928_v28 = vmul.f32 %v6234_v37, %v2794_v12 }
 0x5f9   : > { %v3455_v41 = vpop.f32.mrf.mxu1 }
 0x5fa   : > { %v3001_v48 = vadd.f32 %v3776_v62, %v2969_v53  ;;  %v2967_v2 = vadd.f32 %v6239_v35, %v2928_v28  ;;  %v2931_v58 = vmul.f32 %v3455_v41, %v6234_v37  ;;  %v3788_v28 = vld [vmem:[%s4348_s3 + $0x70] sm:$0xff] }
 0x5fb   : > { %v2797_v24 = vpop.f32.mrf.mxu1 }
 0x5fc   : > { %3033 = vst [vmem:[%s6249_s28 + $0x10] sm:$0xff] %v3001_v48  ;;  %v2999_v18 = vadd.f32 %v3777_v50, %v2967_v2  ;;  %v2970_v33 = vadd.f32 %v6239_v35, %v2931_v58  ;;  %v2929_v49 = vmul.f32 %v6234_v37, %v2797_v24  ;;  %v3789_v58 = vld [vmem:[%s4348_s3 + $0x60] sm:$0xff] }
 0x5fd   : > { %v3458_v6 = vpop.f32.mrf.mxu1 }
 0x5fe   : > { %3031 = vst [vmem:[%s6249_s28] sm:$0xff] %v2999_v18  ;;  %v3002_v27 = vadd.f32 %v3778_v25, %v2970_v33  ;;  %v2968_v22 = vadd.f32 %v6239_v35, %v2929_v49  ;;  %v2934_v40 = vmul.f32 %v3458_v6, %v6234_v37  ;;  %v3790_v49 = vld [vmem:[%s4348_s3 + $0x78] sm:$0xff] }
 0x5ff   : > { %v2810_v23 = vpop.f32.mrf.mxu1 }
 0x600   : > { %3034 = vst [vmem:[%s6249_s28 + $0x18] sm:$0xff] %v3002_v27  ;;  %v3000_v36 = vadd.f32 %v3779_v34, %v2968_v22  ;;  %v2973_v44 = vadd.f32 %v6239_v35, %v2934_v40  ;;  %v2932_v42 = vmul.f32 %v6234_v37, %v2810_v23  ;;  %v3791_v40 = vld [vmem:[%s4348_s3 + $0x68] sm:$0xff] }
 0x601   : > { %v3459_v47 = vpop.f32.mrf.mxu1 }
 0x602   : > { %3032 = vst [vmem:[%s6249_s28 + $0x8] sm:$0xff] %v3000_v36  ;;  %v3005_v29 = vadd.f32 %v3780_v8, %v2973_v44  ;;  %v2971_v38 = vadd.f32 %v6239_v35, %v2932_v42  ;;  %v2935_v0 = vmul.f32 %v3459_v47, %v6234_v37  ;;  %v3792_v42 = vld [vmem:[%s4348_s3 + $0x90] sm:$0xff] }
 0x603   : > { %v2813_v57 = vpop.f32.mrf.mxu1 }
 0x604   : > { %3037 = vst [vmem:[%s6249_s28 + $0x30] sm:$0xff] %v3005_v29  ;;  %v3003_v14 = vadd.f32 %v3781_v10, %v2971_v38  ;;  %v2974_v5 = vadd.f32 %v6239_v35, %v2935_v0  ;;  %v2933_v43 = vmul.f32 %v6234_v37, %v2813_v57  ;;  %v3793_v0 = vld [vmem:[%s4348_s3 + $0x80] sm:$0xff] }
 0x605   : > { %v3462_v4 = vpop.f32.mrf.mxu1 }
 0x606   : > { %3035 = vst [vmem:[%s6249_s28 + $0x20] sm:$0xff] %v3003_v14  ;;  %v3006_v39 = vadd.f32 %v3782_v21, %v2974_v5  ;;  %v2972_v59 = vadd.f32 %v6239_v35, %v2933_v43  ;;  %v2938_v17 = vmul.f32 %v3462_v4, %v6234_v37  ;;  %v3794_v43 = vld [vmem:[%s4348_s3 + $0x98] sm:$0xff] }
 0x607   : > { %v2826_v51 = vpop.f32.mrf.mxu1 }
 0x608   : > { %3038 = vst [vmem:[%s6249_s28 + $0x38] sm:$0xff] %v3006_v39  ;;  %v3004_v1 = vadd.f32 %v3783_v32, %v2972_v59  ;;  %v2977_v63 = vadd.f32 %v6239_v35, %v2938_v17  ;;  %v2936_v13 = vmul.f32 %v6234_v37, %v2826_v51  ;;  %v3795_v17 = vld [vmem:[%s4348_s3 + $0x88] sm:$0xff] }
 0x609   : > { %v3463_v3 = vpop.f32.mrf.mxu1 }
 0x60a   : > { %3036 = vst [vmem:[%s6249_s28 + $0x28] sm:$0xff] %v3004_v1  ;;  %v3009_v20 = vadd.f32 %v3784_v60, %v2977_v63  ;;  %v2975_v16 = vadd.f32 %v6239_v35, %v2936_v13  ;;  %v2939_v56 = vmul.f32 %v3463_v3, %v6234_v37  ;;  %v3796_v13 = vld [vmem:[%s4348_s3 + $0xb0] sm:$0xff] }
 0x60b   : > { %v2829_v19 = vpop.f32.mrf.mxu1 }
 0x60c   : > { %3041 = vst [vmem:[%s6249_s28 + $0x50] sm:$0xff] %v3009_v20  ;;  %v3007_v11 = vadd.f32 %v3785_v9, %v2975_v16  ;;  %v2978_v26 = vadd.f32 %v6239_v35, %v2939_v56  ;;  %v2937_v46 = vmul.f32 %v6234_v37, %v2829_v19  ;;  %v3797_v56 = vld [vmem:[%s4348_s3 + $0xa0] sm:$0xff] }
 0x60d   : > { %v3466_v45 = vpop.f32.mrf.mxu1 }
 0x60e   : > { %3039 = vst [vmem:[%s6249_s28 + $0x40] sm:$0xff] %v3007_v11  ;;  %v3010_v31 = vadd.f32 %v3786_v55, %v2978_v26  ;;  %v2976_v15 = vadd.f32 %v6239_v35, %v2937_v46  ;;  %v2942_v7 = vmul.f32 %v3466_v45, %v6234_v37  ;;  %v3798_v46 = vld [vmem:[%s4348_s3 + $0xb8] sm:$0xff] }
 0x60f   : > { %v2842_v30 = vpop.f32.mrf.mxu1 }
 0x610   : > { %3042 = vst [vmem:[%s6249_s28 + $0x58] sm:$0xff] %v3010_v31  ;;  %v3008_v52 = vadd.f32 %v3787_v61, %v2976_v15  ;;  %v2981_v54 = vadd.f32 %v6239_v35, %v2942_v7  ;;  %v2940_v12 = vmul.f32 %v6234_v37, %v2842_v30  ;;  %v3799_v7 = vld [vmem:[%s4348_s3 + $0xa8] sm:$0xff] }
 0x611   : > { %v3467_v53 = vpop.f32.mrf.mxu1 }
 0x612   : > { %3040 = vst [vmem:[%s6249_s28 + $0x48] sm:$0xff] %v3008_v52  ;;  %v3013_v41 = vadd.f32 %v3788_v28, %v2981_v54  ;;  %v2979_v62 = vadd.f32 %v6239_v35, %v2940_v12  ;;  %v2943_v48 = vmul.f32 %v3467_v53, %v6234_v37  ;;  %v3800_v12 = vld [vmem:[%s4348_s3 + $0xd0] sm:$0xff] }
 0x613   : > { %v2845_v2 = vpop.f32.mrf.mxu1 }
 0x614   : > { %3045 = vst [vmem:[%s6249_s28 + $0x70] sm:$0xff] %v3013_v41  ;;  %v3011_v24 = vadd.f32 %v3789_v58, %v2979_v62  ;;  %v2982_v50 = vadd.f32 %v6239_v35, %v2943_v48  ;;  %v2941_v18 = vmul.f32 %v6234_v37, %v2845_v2  ;;  %v3801_v48 = vld [vmem:[%s4348_s3 + $0xc0] sm:$0xff] }
 0x615   : > { %v3470_v33 = vpop.f32.mrf.mxu1 }
 0x616   : > { %3043 = vst [vmem:[%s6249_s28 + $0x60] sm:$0xff] %v3011_v24  ;;  %v3014_v6 = vadd.f32 %v3790_v49, %v2982_v50  ;;  %v2980_v25 = vadd.f32 %v6239_v35, %v2941_v18  ;;  %v2946_v27 = vmul.f32 %v3470_v33, %v6234_v37  ;;  %v3802_v18 = vld [vmem:[%s4348_s3 + $0xd8] sm:$0xff] }
 0x617   : > { %v2858_v22 = vpop.f32.mrf.mxu1 }
 0x618   : > { %3046 = vst [vmem:[%s6249_s28 + $0x78] sm:$0xff] %v3014_v6  ;;  %v3012_v23 = vadd.f32 %v3791_v40, %v2980_v25  ;;  %v2985_v34 = vadd.f32 %v6239_v35, %v2946_v27  ;;  %v2944_v36 = vmul.f32 %v6234_v37, %v2858_v22  ;;  %v3803_v27 = vld [vmem:[%s4348_s3 + $0xc8] sm:$0xff] }
 0x619   : > { %v3471_v44 = vpop.f32.mrf.mxu1 }
 0x61a   : > { %3044 = vst [vmem:[%s6249_s28 + $0x68] sm:$0xff] %v3012_v23  ;;  %v3017_v47 = vadd.f32 %v3792_v42, %v2985_v34  ;;  %v2983_v8 = vadd.f32 %v6239_v35, %v2944_v36  ;;  %v2947_v29 = vmul.f32 %v3471_v44, %v6234_v37  ;;  %v3804_v36 = vld [vmem:[%s4348_s3 + $0xf0] sm:$0xff] }
 0x61b   : > { %v2861_v38 = vpop.f32.mrf.mxu1 }
 0x61c   : > { %3049 = vst [vmem:[%s6249_s28 + $0x90] sm:$0xff] %v3017_v47  ;;  %v3015_v57 = vadd.f32 %v3793_v0, %v2983_v8  ;;  %v2986_v10 = vadd.f32 %v6239_v35, %v2947_v29  ;;  %v2945_v14 = vmul.f32 %v6234_v37, %v2861_v38  ;;  %v3805_v29 = vld [vmem:[%s4348_s3 + $0xe0] sm:$0xff] }
 0x61d   : > { %v3474_v5 = vpop.f32.mrf.mxu1 }
 0x61e   : > { %3047 = vst [vmem:[%s6249_s28 + $0x80] sm:$0xff] %v3015_v57  ;;  %v3018_v4 = vadd.f32 %v3794_v43, %v2986_v10  ;;  %v2984_v21 = vadd.f32 %v6239_v35, %v2945_v14  ;;  %v2950_v39 = vmul.f32 %v3474_v5, %v6234_v37  ;;  %v3806_v10 = vld [vmem:[%s4348_s3 + $0xf8] sm:$0xff] }
 0x61f   : > { %v2874_v59 = vpop.f32.mrf.mxu1 }
 0x620   : > { %3050 = vst [vmem:[%s6249_s28 + $0x98] sm:$0xff] %v3018_v4  ;;  %v3016_v51 = vadd.f32 %v3795_v17, %v2984_v21  ;;  %v2989_v32 = vadd.f32 %v6239_v35, %v2950_v39  ;;  %v2948_v1 = vmul.f32 %v6234_v37, %v2874_v59 }
 0x621   : > { %v3475_v63 = vpop.f32.mrf.mxu1 }
 0x622   : > { %3048 = vst [vmem:[%s6249_s28 + $0x88] sm:$0xff] %v3016_v51  ;;  %v3021_v3 = vadd.f32 %v3796_v13, %v2989_v32  ;;  %v2987_v60 = vadd.f32 %v6239_v35, %v2948_v1  ;;  %v2951_v20 = vmul.f32 %v3475_v63, %v6234_v37 }
 0x623   : > { %v2877_v16 = vpop.f32.mrf.mxu1 }
 0x624   : > { %3053 = vst [vmem:[%s6249_s28 + $0xb0] sm:$0xff] %v3021_v3  ;;  %v3019_v19 = vadd.f32 %v3797_v56, %v2987_v60  ;;  %v2990_v9 = vadd.f32 %v6239_v35, %v2951_v20  ;;  %v2949_v11 = vmul.f32 %v6234_v37, %v2877_v16 }
 0x625   : > { %v3478_v26 = vpop.f32.mrf.mxu1 }
 0x626   : > { %3051 = vst [vmem:[%s6249_s28 + $0xa0] sm:$0xff] %v3019_v19  ;;  %v3022_v45 = vadd.f32 %v3798_v46, %v2990_v9  ;;  %v2988_v55 = vadd.f32 %v6239_v35, %v2949_v11  ;;  %v2954_v31 = vmul.f32 %v3478_v26, %v6234_v37 }
 0x627   : > { %v2890_v15 = vpop.f32.mrf.mxu1 }
 0x628   : > { %3054 = vst [vmem:[%s6249_s28 + $0xb8] sm:$0xff] %v3022_v45  ;;  %v3020_v30 = vadd.f32 %v3799_v7, %v2988_v55  ;;  %v2993_v61 = vadd.f32 %v6239_v35, %v2954_v31  ;;  %v2952_v52 = vmul.f32 %v6234_v37, %v2890_v15 }
 0x629   : > { %v3479_v54 = vpop.f32.mrf.mxu1 }
 0x62a   : > { %3052 = vst [vmem:[%s6249_s28 + $0xa8] sm:$0xff] %v3020_v30  ;;  %v3025_v53 = vadd.f32 %v3800_v12, %v2993_v61  ;;  %v2991_v28 = vadd.f32 %v6239_v35, %v2952_v52  ;;  %v2955_v41 = vmul.f32 %v3479_v54, %v6234_v37 }
 0x62b   : > { %v2893_v62 = vpop.f32.mrf.mxu1 }
 0x62c   : > { %3057 = vst [vmem:[%s6249_s28 + $0xd0] sm:$0xff] %v3025_v53  ;;  %v3023_v2 = vadd.f32 %v3801_v48, %v2991_v28  ;;  %v2994_v58 = vadd.f32 %v6239_v35, %v2955_v41  ;;  %v2953_v24 = vmul.f32 %v6234_v37, %v2893_v62 }
 0x62d   : > { %v3482_v50 = vpop.f32.mrf.mxu1 }
 0x62e   : > { %3055 = vst [vmem:[%s6249_s28 + $0xc0] sm:$0xff] %v3023_v2  ;;  %v3026_v33 = vadd.f32 %v3802_v18, %v2994_v58  ;;  %v2992_v49 = vadd.f32 %v6239_v35, %v2953_v24  ;;  %v2958_v6 = vmul.f32 %v3482_v50, %v6234_v37 }
 0x62f   : > { %v2906_v25 = vpop.f32.mrf.mxu1 }
 0x630   : > { %3058 = vst [vmem:[%s6249_s28 + $0xd8] sm:$0xff] %v3026_v33  ;;  %v3024_v22 = vadd.f32 %v3803_v27, %v2992_v49  ;;  %v2997_v40 = vadd.f32 %v6239_v35, %v2958_v6  ;;  %v2956_v23 = vmul.f32 %v6234_v37, %v2906_v25 }
 0x631   : > { %v3483_v34 = vpop.f32.mrf.mxu1 }
 0x632   : > { %3056 = vst [vmem:[%s6249_s28 + $0xc8] sm:$0xff] %v3024_v22  ;;  %v3029_v44 = vadd.f32 %v3804_v36, %v2997_v40  ;;  %v2995_v42 = vadd.f32 %v6239_v35, %v2956_v23  ;;  %v2959_v47 = vmul.f32 %v3483_v34, %v6234_v37 }
 0x633   : > { %v2909_v8 = vpop.f32.mrf.mxu1 }
 0x634   : > { %3061 = vst [vmem:[%s6249_s28 + $0xf0] sm:$0xff] %v3029_v44  ;;  %v3027_v38 = vadd.f32 %v3805_v29, %v2995_v42  ;;  %v2998_v0 = vadd.f32 %v6239_v35, %v2959_v47  ;;  %v2957_v57 = vmul.f32 %v6234_v37, %v2909_v8  ;;  %v3807_v37 = vld [vmem:[%s4348_s3 + $0xe8] sm:$0xff] }
 0x636   : > { %3059 = vst [vmem:[%s6249_s28 + $0xe0] sm:$0xff] %v3027_v38  ;;  %v3030_v14 = vadd.f32 %v3806_v10, %v2998_v0  ;;  %v2996_v5 = vadd.f32 %v6239_v35, %v2957_v57 }
 0x638   : > { %3062 = vst [vmem:[%s6249_s28 + $0xf8] sm:$0xff] %v3030_v14  ;;  %v3028_v43 = vadd.f32 %v3807_v37, %v2996_v5 }
 0x63a   : > { %3060 = vst [vmem:[%s6249_s28 + $0xe8] sm:$0xff] %v3028_v43 }
 0x63b   : > { %4005 = shalt.err (!%p4002_p3)
}
 0x63c   : > { %s4006_s3 = scalar_lea.hbm %s6375_s12, 4096  ;;  %s4010_s28 = scalar_lea.hbm %s6677_s20, 8192 }
 0x63d   : > { %p4007_p6 = scmp.ne.s32.totalorder %s6375_s12, %s4006_s3  ;;  %p4011_p10 = scmp.lt.s32.totalorder %s6375_s12, %s6677_s20 }
 0x63e   : > { %p4012_p12 = scmp.lt.s32.totalorder %s4010_s28, %s4006_s3 }
 0x63f   : > { %p4008_p8 = pnand %p4007_p6, %p6678_p2 }
 0x640   : > { %p4013_p0 = por %p4012_p12, %p4011_p10 }
 0x641   : > { %p4009_p1 = pneg %p4008_p8 }
 0x643   : > { %p4014_p13 = pnand %p4013_p0, %p4009_p1 }
 0x645   : > { %4017 = shalt.err (!%p4014_p13)
}
 0x646   : > { %s4085_s5 = smov 128   ;;  %s4086_s27 = smov 8  }
 0x647   : > { %3510 = dma.vmem_to_hbm [thread:$0]  (%p6678_p2), %s6377_s17, 4096, %s6375_s12, %s3064_s19, %s4085_s5, %s4085_s5, %s4086_s27  }
 0x648 PF: > { %s3092_s23 = sand.u32 1, %s4056_s29   ;;  %p6679_p5 = scmp.ne.s32.totalorder %s6507_s21, 0 }
 0x649   : > { %p6680_p9 = scmp.ge.s32.totalorder %s4068_s16, 2  ;;  %s3093_s13 = scalar_lea.sflag [#allocation4], %s3092_s23 }
 0x64b   : > { %p3536_p7 = pnand %p6680_p9, %p6679_p5 }
 0x64d   : > { %p3537_p11 = pneg %p3536_p7 }
 0x64f   : > { %4051 = dma.done.wait (%p3537_p11), %s3093_s13, 4096  }
 0x650   : > { %4053 = vsyncadd (%p3537_p11), %s3093_s13, 4294963200  ;;  %p30_p4 = scmp.ge.s32.totalorder %s4267_s26, 4   ;;  %s6681_s29 = smov %s4060_s30 }
 0x651   : > { %s6682_s30 = smov %s4064_s15  ;;  %s6683_s15 = smov %s4278_s24 }
 0x652   : > { %s6684_s16 = smov %s4267_s26  ;;  %32 = sbr.rel (!%p30_p4) target bundleno = 17 (0x11), region = 145 }
 0x657   :  { %3098 = vsyncpa [#allocation3], 1 }
 0x658   :  { %3100 = vsyncpa [#allocation3 + $0x1], 1 }
 0x659   :  { %3101 = vsyncpa [#allocation6], 1 }
 0x65a   :  { %3102 = vsyncpa [#allocation9], 1 }
 0x65b   :  { %3103 = vsyncpa [#allocation12], 1 }
 0x65c   :  { %3104 = vsyncpa [#allocation4], 1 }
 0x65d   :  { %3106 = vsyncpa [#allocation4 + $0x1], 1 }

</bundles_post_ra>
